<compile_context>
chip_gen: v7x
topology: tpu7x:2x2x1
jax: 0.10.0
libtpu: 0.0.40
codegen_flags: <defaults>
</compile_context>

<pallas_src>
import functools
import math

import jax
import jax.numpy as jnp
from jax.experimental import pallas as pl
from jax.experimental.pallas import tpu as pltpu


# ----------------------------------------------------------------------------
# Tiling / compile configuration
# ----------------------------------------------------------------------------
_KXK_TILE_TARGET = 256          # output-position tile target for k>1 convs
                                # (kept small so the 64x64 demo exercises the
                                # multi-tile path; 512-1024 at real res).
_PW_TILE_CANDIDATES = (1024, 512, 256, 128, 64, 32, 16, 8)
_VMEM_LIMIT = 48 * 1024 * 1024  # explicit scoped-VMEM limit (v7x: 64 MiB
                                # physical per TensorCore, leave headroom).

# Flipped to False (once, globally) if the single-matmul VMEM-im2col variant
# fails to lower on the running Mosaic version; the per-tap-matmul variant is
# then used instead.  Both variants are numerically identical.
_FUSE_TAPS = True


def _round_up(x, m):
    return ((x + m - 1) // m) * m


def _compiler_params(semantics):
    return pltpu.CompilerParams(dimension_semantics=semantics,
                                vmem_limit_bytes=_VMEM_LIMIT)


# ----------------------------------------------------------------------------
# Pallas kernels
# ----------------------------------------------------------------------------

@functools.lru_cache(maxsize=None)
def _make_conv_kxk_kernel(taps, tile_m, cin_p, fuse):
    """k x k conv (+ folded-BN bias + SiLU) over the stride-phase flat slab.

    taps: tuple of (tap_index, phase, flat_offset).  Each grid step computes
    `tile_m` output positions.  If `fuse`, the k*k shifted patches are staged
    contiguously in a VMEM scratch (VMEM-local im2col) and contracted with a
    single (tile_m, k*k*cin) @ (k*k*cin, cout) MXU matmul; otherwise one
    K=cin matmul per tap is accumulated in f32 (fallback path).
    """
    by_phase = {}
    for t, ph, off in taps:
        by_phase.setdefault(ph, []).append((t, off))

    def kernel(x_ref, w_ref, b_ref, o_ref, *scratch):
        base = pl.program_id(1) * tile_m
        if tile_m % 8 == 0:
            base = pl.multiple_of(base, 8)
        acc = None
        for ph in sorted(by_phase):
            tap_list = by_phase[ph]
            win_len = tile_m + max(off for _, off in tap_list)
            # One aligned dynamic-start load per stride phase; per-tap views
            # are compile-time-static sublane slices of that window.
            win = x_ref[0, ph, pl.ds(base, win_len), :]
            for t, off in tap_list:
                patch = win[off:off + tile_m, :]
                if fuse:
                    scratch[0][:, t * cin_p:(t + 1) * cin_p] = patch
                else:
                    part = jnp.dot(patch,
                                   w_ref[t * cin_p:(t + 1) * cin_p, :],
                                   preferred_element_type=jnp.float32)
                    acc = part if acc is None else acc + part
        if fuse:
            acc = jnp.dot(scratch[0][...], w_ref[...],
                          preferred_element_type=jnp.float32)
        y = acc + b_ref[...]                  # folded-BN bias (f32)
        y = y * jax.nn.sigmoid(y)             # SiLU
        o_ref[0] = y.astype(o_ref.dtype)

    return kernel


@functools.lru_cache(maxsize=None)
def _make_pointwise_kernel(ch_slices, tile_m):
    """Fused multi-input 1x1 conv (+ folded-BN bias + SiLU).

    Each input contributes one K=C_i MXU matmul accumulated in f32, so channel
    concatenation of the inputs never materialises in HBM.  ch_slices[i] =
    (start, width): only those channels of input i are consumed (lets a
    sibling-fused producer feed its second half straight in).
    """
    n_in = len(ch_slices)

    def kernel(*refs):
        x_refs = refs[:n_in]
        w_ref, b_ref, o_ref = refs[n_in:n_in + 3]
        base = pl.program_id(1) * tile_m
        if tile_m % 8 == 0:
            base = pl.multiple_of(base, 8)
        acc = None
        woff = 0
        for i, (lo, wd) in enumerate(ch_slices):
            patch = x_refs[i][0, pl.ds(base, tile_m), :]
            if (lo, lo + wd) != (0, patch.shape[-1]):
                patch = patch[:, lo:lo + wd]
            part = jnp.dot(patch, w_ref[woff:woff + wd, :],
                           preferred_element_type=jnp.float32)
            acc = part if acc is None else acc + part
            woff += wd
        y = acc + b_ref[...]
        y = y * jax.nn.sigmoid(y)
        o_ref[0] = y.astype(o_ref.dtype)

    return kernel


@functools.lru_cache(maxsize=None)
def _make_sppf_pool_kernel(H, W):
    """Three cascaded 5x5 / stride-1 maxpools (separable) in one kernel.

    One -inf padded tile is pooled three times; max idempotence makes this
    exactly equivalent to PyTorch's per-stage -inf padded MaxPool2d(5,1,2).
    """

    def kernel(xp_ref, y1_ref, y2_ref, y3_ref):
        z = xp_ref[0]                          # (H+12, W+12, C)

        def pool5(v):
            h, w = v.shape[0], v.shape[1]
            m = v[0:h - 4]                     # H direction first: leading-axis
            for d in range(1, 5):              # shifts are pure addressing
                m = jnp.maximum(m, v[d:d + h - 4])
            r = m[:, 0:w - 4, :]               # W direction (sublane shifts)
            for d in range(1, 5):
                r = jnp.maximum(r, m[:, d:d + w - 4, :])
            return r

        p1 = pool5(z)                          # (H+8, W+8, C)
        p2 = pool5(p1)                         # (H+4, W+4, C)
        p3 = pool5(p2)                         # (H,   W,   C)
        y1_ref[0] = p1[4:4 + H, 4:4 + W, :]
        y2_ref[0] = p2[2:2 + H, 2:2 + W, :]
        y3_ref[0] = p3

    return kernel


# ----------------------------------------------------------------------------
# Wrappers around pallas_call
# ----------------------------------------------------------------------------

def pointwise_conv_fwd(inputs, w, b, cout):
    """Fused multi-input 1x1 Conv + BN(-folded) + SiLU.

    inputs: list of (x_nhwc, ch_start, ch_width) sharing the same (B, H, W).
    `w`: (sum of ch_widths, cout) bf16 (BN scale folded), `b`: (1, cout) f32.
    """
    B, H, W = inputs[0][0].shape[:3]
    M = H * W
    tile_m = M
    if M > _PW_TILE_CANDIDATES[0]:
        for cand in _PW_TILE_CANDIDATES:
            if M % cand == 0:
                tile_m = cand
                break
    R = M // tile_m
    slabs = tuple(xi.reshape(B, M, xi.shape[-1]) for xi, _, _ in inputs)
    ch_slices = tuple((int(lo), int(wd)) for _, lo, wd in inputs)
    k_used = sum(wd for _, wd in ch_slices)

    out = pl.pallas_call(
        _make_pointwise_kernel(ch_slices, tile_m),
        out_shape=jax.ShapeDtypeStruct((B, M, cout), jnp.bfloat16),
        grid=(B, R),
        in_specs=(
            [pl.BlockSpec((1, M, s.shape[-1]), lambda bb, rr: (bb, 0, 0))
             for s in slabs]
            + [pl.BlockSpec(w.shape, lambda bb, rr: (0, 0)),
               pl.BlockSpec(b.shape, lambda bb, rr: (0, 0))]),
        out_specs=pl.BlockSpec((1, tile_m, cout), lambda bb, rr: (bb, rr, 0)),
        compiler_params=_compiler_params(("parallel", "parallel")),
        cost_estimate=pl.CostEstimate(
            flops=int(2 * B * M * k_used * cout),
            transcendentals=int(B * M * cout),
            bytes_accessed=int(2 * (sum(int(s.size) for s in slabs)
                                    + int(w.size) + B * M * cout))),
    )(*slabs, w, b)
    return out.reshape(B, H, W, cout)


def _conv_kxk_fwd(x, p, s):
    """k x k Conv(stride=s, pad=k//2) + BN(-folded) + SiLU, for k > 1."""
    global _FUSE_TAPS
    k = p["k"]
    B, H, W, cin = x.shape
    cin_p, cout = p["cin_p"], p["cout"]
    pad = k // 2
    Ho = (H + 2 * pad - k) // s + 1
    Wo = (W + 2 * pad - k) // s + 1
    q = (k - 1) // s                      # max per-axis tap offset (phase coords)
    Gw = Wo + q
    m_real = Ho * Gw

    # ---- output-position (M) tiling -> grid = (B, R) ------------------------
    if m_real <= 2 * _KXK_TILE_TARGET:
        R, tile_m = 1, m_real
    else:
        R = pl.cdiv(m_real, _KXK_TILE_TARGET)
        tile_m = _round_up(pl.cdiv(m_real, R), 32)
        R = pl.cdiv(m_real, tile_m)
    m_pad = R * tile_m

    max_off = q * Gw + q
    Gh = pl.cdiv(m_pad + max_off, Gw)
    L = Gh * Gw
    # Invariant keeping every in-kernel tap read in bounds; only the cropped
    # spare columns / padded tail rows ever see wrapped garbage.
    assert L >= m_pad + max_off
    Lh, Lw = s * Gh, s * Gw

    # Zero-pad (conv pad top/left, fill to the phase grid, pad channels) and
    # split into s*s stride phases, flattened row-major.  This is the only
    # XLA-side activation copy per conv.
    xp = jnp.pad(x, ((0, 0), (pad, Lh - H - pad), (pad, Lw - W - pad),
                     (0, cin_p - cin)))
    if s == 1:
        phases = xp.reshape(B, 1, L, cin_p)
    else:
        phases = xp.reshape(B, Gh, s, Gw, s, cin_p)
        phases = phases.transpose(0, 2, 4, 1, 3, 5).reshape(B, s * s, L, cin_p)
    P = s * s

    taps = tuple((dy * k + dx, (dy % s) * s + (dx % s),
                  (dy // s) * Gw + (dx // s))
                 for dy in range(k) for dx in range(k))

    cost = pl.CostEstimate(
        flops=int(2 * B * m_pad * k * k * cin_p * cout),
        transcendentals=int(B * m_pad * cout),
        bytes_accessed=int(2 * (int(phases.size) + int(p["w"].size)
                                + B * m_pad * cout)))

    def run(fuse):
        scratch = ([pltpu.VMEM((tile_m, k * k * cin_p), jnp.bfloat16)]
                   if fuse else [])
        return pl.pallas_call(
            _make_conv_kxk_kernel(taps, tile_m, cin_p, fuse),
            out_shape=jax.ShapeDtypeStruct((B, m_pad, cout), jnp.bfloat16),
            grid=(B, R),
            in_specs=[
                # phase slab resident across the M axis (fetched once per
                # batch element); weights / bias resident across the grid.
                pl.BlockSpec((1, P, L, cin_p), lambda bb, rr: (bb, 0, 0, 0)),
                pl.BlockSpec(p["w"].shape, lambda bb, rr: (0, 0)),
                pl.BlockSpec(p["b"].shape, lambda bb, rr: (0, 0)),
            ],
            out_specs=pl.BlockSpec((1, tile_m, cout),
                                   lambda bb, rr: (bb, rr, 0)),
            scratch_shapes=scratch,
            compiler_params=_compiler_params(("parallel", "parallel")),
            cost_estimate=cost,
        )(phases, p["w"], p["b"])

    fuse_ok = _FUSE_TAPS and (128 % cin_p == 0 or cin_p % 128 == 0)
    if fuse_ok:
        try:
            out = run(True)
        except Exception:                      # pragma: no cover
            _FUSE_TAPS = False                 # lowering fallback (once)
            out = run(False)
    else:
        out = run(False)

    out = out[:, :m_real, :].reshape(B, Ho, Gw, cout)
    if Gw != Wo:
        out = out[:, :, :Wo, :]   # spare columns; XLA fuses into consumer pad
    return out


def conv_fwd(x, p, s=1):
    """Conv(k, stride=s, pad=k//2, bias=False) + folded BN + SiLU (NHWC bf16)."""
    if p["k"] == 1 and s == 1:
        return pointwise_conv_fwd([(x, 0, x.shape[-1])], p["w"], p["b"],
                                  p["cout"])
    return _conv_kxk_fwd(x, p, s)


def _sppf_fwd(x, params):
    """SPPF: cv1 -> fused cascaded 5x5 maxpools -> fused concat+cv2."""
    x = conv_fwd(x, params["sppf_cv1"], 1)
    B, H, W, C = x.shape
    xp = jnp.pad(x, ((0, 0), (6, 6), (6, 6), (0, 0)),
                 constant_values=-jnp.inf)

    spec_out = pl.BlockSpec((1, H, W, C), lambda b: (b, 0, 0, 0))
    y1, y2, y3 = pl.pallas_call(
        _make_sppf_pool_kernel(H, W),
        out_shape=(jax.ShapeDtypeStruct((B, H, W, C), x.dtype),) * 3,
        grid=(B,),
        in_specs=[pl.BlockSpec((1, H + 12, W + 12, C),
                               lambda b: (b, 0, 0, 0))],
        out_specs=(spec_out,) * 3,
        compiler_params=_compiler_params(("parallel",)),
    )(xp)

    p = params["sppf_cv2"]
    return pointwise_conv_fwd([(x, 0, C), (y1, 0, C), (y2, 0, C), (y3, 0, C)],
                              p["w"], p["b"], p["cout"])


# ----------------------------------------------------------------------------
# Parameter construction (deterministic synthetic init; BN folded)
# ----------------------------------------------------------------------------

def make_divisible(x, divisor=8):
    return int(math.ceil(x / divisor) * divisor)


_BN_EPS = 1e-3                               # ultralytics Conv BN eps
_BN_SCALE = 1.0 / math.sqrt(1.0 + _BN_EPS)   # fresh BN (gamma=1, var=1) folded


def _conv_params(key, cin, cout, k):
    # kaiming_normal_(fan_out, relu) conv weight; fresh BN folded into weights.
    cin_p = _round_up(max(cin, 8), 8)        # lane/sublane friendly channels
    fan_out = cout * k * k
    std = math.sqrt(2.0 / fan_out)
    w = jax.random.normal(key, (k * k, cin, cout), jnp.float32) * std
    if cin_p != cin:
        w = jnp.pad(w, ((0, 0), (0, cin_p - cin), (0, 0)))
    w = (w * _BN_SCALE).reshape(k * k * cin_p, cout).astype(jnp.bfloat16)
    b = jnp.zeros((1, cout), jnp.float32)    # folded BN bias
    return {"w": w, "b": b, "k": k, "cin": cin, "cin_p": cin_p, "cout": cout}


def _c3f_params(keys, c1, c2, n):
    c_ = c2 // 2
    cv1 = _conv_params(next(keys), c1, c_, 1)
    cv2 = _conv_params(next(keys), c1, c_, 1)
    d = {
        # cv1 & cv2 share one input -> fused into one lane-denser 1x1 conv
        "cv12": {"w": jnp.concatenate([cv1["w"], cv2["w"]], axis=-1),
                 "b": jnp.concatenate([cv1["b"], cv2["b"]], axis=-1),
                 "k": 1, "cin": c1, "cin_p": cv1["cin_p"], "cout": 2 * c_},
        "cv3": _conv_params(next(keys), 2 * c_, c2, 1),
        "n": n,
        "c_": c_,
    }
    for i in range(n):
        d[f"b{i}_cv1"] = _conv_params(next(keys), c_, c_, 3)
        d[f"b{i}_cv2"] = _conv_params(next(keys), c_, c_, 3)
    return d


def init_backbone_params(key, width_multiple=0.25, depth_multiple=0.33,
                         max_channels=1024, input_channels=3):
    base_channels = [64, 128, 256, 512, 1024]
    channels = [min(max_channels, make_divisible(c * width_multiple, 8))
                for c in base_channels]
    base_depths = [1, 2, 2, 1]
    depths = [max(1, round(d * depth_multiple)) for d in base_depths]

    keys = iter(jax.random.split(key, 256))
    params = {
        "channels": channels,
        "depths": depths,
        "stem1": _conv_params(next(keys), input_channels, channels[0], 3),
        "stem2": _conv_params(next(keys), channels[0], channels[1], 3),
        "stage1_conv": _conv_params(next(keys), channels[1], channels[1], 3),
        "stage1_block": _c3f_params(keys, channels[1], channels[1], depths[0]),
        "stage2_conv": _conv_params(next(keys), channels[1], channels[2], 3),
        "stage2_block": _c3f_params(keys, channels[2], channels[2], depths[1]),
        "stage3_conv": _conv_params(next(keys), channels[2], channels[3], 3),
        "stage3_block": _c3f_params(keys, channels[3], channels[3], depths[2]),
        "stage4_block": _c3f_params(keys, channels[3], channels[4], depths[3]),
        "sppf_cv1": _conv_params(next(keys), channels[4], channels[4] // 2, 1),
        "sppf_cv2": _conv_params(next(keys), (channels[4] // 2) * 4,
                                 channels[4], 1),
    }
    return params


# ----------------------------------------------------------------------------
# Forward pass
# ----------------------------------------------------------------------------

def _c3f_fwd(x, bp):
    c_ = bp["c_"]
    ab = conv_fwd(x, bp["cv12"], 1)            # fused cv1 | cv2 (1x1)
    a = ab[..., :c_]
    for i in range(bp["n"]):
        y = conv_fwd(a, bp[f"b{i}_cv1"], 1)
        y = conv_fwd(y, bp[f"b{i}_cv2"], 1)
        a = a + y          # bottleneck shortcut; XLA fuses with downstream pad
    # cv3 consumes cat(a, b) without materialising it: a as one input, the
    # second half of ab lane-sliced in-kernel as the other.
    cv3 = bp["cv3"]
    return pointwise_conv_fwd([(a, 0, c_), (ab, c_, c_)],
                              cv3["w"], cv3["b"], cv3["cout"])


def backbone_forward(params, x_nchw):
    """x_nchw: (B, 3, H, W) f32 -> list of 4 NCHW f32 feature maps (P3..P6)."""
    x = jnp.transpose(x_nchw, (0, 2, 3, 1)).astype(jnp.bfloat16)   # NHWC bf16

    # stem
    x = conv_fwd(x, params["stem1"], 2)
    x = conv_fwd(x, params["stem2"], 2)

    feats = []
    # stage 1
    x = conv_fwd(x, params["stage1_conv"], 2)
    x = _c3f_fwd(x, params["stage1_block"])
    feats.append(x)
    # stage 2
    x = conv_fwd(x, params["stage2_conv"], 2)
    x = _c3f_fwd(x, params["stage2_block"])
    feats.append(x)
    # stage 3
    x = conv_fwd(x, params["stage3_conv"], 2)
    x = _c3f_fwd(x, params["stage3_block"])
    feats.append(x)
    # stage 4 + SPPF
    x = _c3f_fwd(x, params["stage4_block"])
    x = _sppf_fwd(x, params)
    feats.append(x)

    return [jnp.transpose(f, (0, 3, 1, 2)).astype(jnp.float32) for f in feats]


# ----------------------------------------------------------------------------
# Demo
# ----------------------------------------------------------------------------

if __name__ == "__main__":
    key = jax.random.PRNGKey(0)
    pkey, xkey = jax.random.split(key)

    params = init_backbone_params(pkey, width_multiple=0.25,
                                  depth_multiple=0.33, input_channels=3)
    x = jax.random.normal(xkey, (2, 3, 64, 64), jnp.float32)

    feats = backbone_forward(params, x)
    feats = [jax.block_until_ready(f) for f in feats]

    # Expected shapes (B=2, input 64x64, width 0.25): P3..P6
    expected = [(2, 32, 8, 8), (2, 64, 4, 4), (2, 128, 2, 2), (2, 256, 2, 2)]
    got = [tuple(map(int, f.shape)) for f in feats]
    assert got == expected, got
    assert all(bool(jnp.isfinite(f).all()) for f in feats)

    print("KERNEL_OK")
</pallas_src>

<mosaic_0001>
module attributes {stable_mosaic.version = 11 : i64} {
  func.func @kernel(%arg0: i32, %arg1: i32, %arg2: memref<1x4x1155x8xbf16, #tpu.memory_space<vmem>>, %arg3: memref<72x16xbf16, #tpu.memory_space<vmem>>, %arg4: memref<1x16xf32, #tpu.memory_space<vmem>>, %arg5: memref<1x224x16xbf16, #tpu.memory_space<vmem>>, %arg6: memref<224x72xbf16, #tpu.memory_space<vmem>>) attributes {dimension_semantics = [#tpu.dimension_semantics<parallel>, #tpu.dimension_semantics<parallel>], iteration_bounds = array<i64: 2, 5>, scalar_prefetch = 0 : i64, scratch_operands = 1 : i64, tpu.core_type = #tpu.core_type<tc>, window_params = [{transform_indices = @transform_0, window_bounds = array<i64: 1, 4, 1155, 8>}, {pipeline_mode = #tpu.pipeline_mode<synchronous>, transform_indices = @transform_1, window_bounds = array<i64: 72, 16>}, {pipeline_mode = #tpu.pipeline_mode<synchronous>, transform_indices = @transform_2, window_bounds = array<i64: 1, 16>}, {transform_indices = @transform_3, window_bounds = array<i64: 1, 224, 16>}]} {
    %c224_i32 = arith.constant 224 : i32
    %0 = arith.muli %arg1, %c224_i32 : i32
    %1 = tpu.assume_multiple %0, 8 : i32
    %c0 = arith.constant 0 : index
    %c0_0 = arith.constant 0 : index
    %2 = arith.index_cast %1 : i32 to index
    %c0_1 = arith.constant 0 : index
    %3 = vector.load %arg2[%c0, %c0_0, %2, %c0_1] : memref<1x4x1155x8xbf16, #tpu.memory_space<vmem>>, vector<1x1x258x8xbf16>
    %4 = vector.shape_cast %3 : vector<1x1x258x8xbf16> to vector<258x8xbf16>
    %5 = vector.extract_strided_slice %4 {offsets = [0, 0], sizes = [224, 8], strides = [1, 1]} : vector<258x8xbf16> to vector<224x8xbf16>
    %c0_2 = arith.constant 0 : index
    %c0_3 = arith.constant 0 : index
    %6 = vector.load %arg6[%c0_2, %c0_3] : memref<224x72xbf16, #tpu.memory_space<vmem>>, vector<224x8xbf16>
    tpu.vector_store %arg6[%c0_2, %c0_3], %5 {strides = array<i32>} : memref<224x72xbf16, #tpu.memory_space<vmem>>, vector<224x8xbf16>,
    %7 = vector.extract_strided_slice %4 {offsets = [1, 0], sizes = [224, 8], strides = [1, 1]} : vector<258x8xbf16> to vector<224x8xbf16>
    %c0_4 = arith.constant 0 : index
    %c16 = arith.constant 16 : index
    %8 = vector.load %arg6[%c0_4, %c16] : memref<224x72xbf16, #tpu.memory_space<vmem>>, vector<224x8xbf16>
    tpu.vector_store %arg6[%c0_4, %c16], %7 {strides = array<i32>} : memref<224x72xbf16, #tpu.memory_space<vmem>>, vector<224x8xbf16>,
    %9 = vector.extract_strided_slice %4 {offsets = [33, 0], sizes = [224, 8], strides = [1, 1]} : vector<258x8xbf16> to vector<224x8xbf16>
    %c0_5 = arith.constant 0 : index
    %c48 = arith.constant 48 : index
    %10 = vector.load %arg6[%c0_5, %c48] : memref<224x72xbf16, #tpu.memory_space<vmem>>, vector<224x8xbf16>
    tpu.vector_store %arg6[%c0_5, %c48], %9 {strides = array<i32>} : memref<224x72xbf16, #tpu.memory_space<vmem>>, vector<224x8xbf16>,
    %11 = vector.extract_strided_slice %4 {offsets = [34, 0], sizes = [224, 8], strides = [1, 1]} : vector<258x8xbf16> to vector<224x8xbf16>
    %c0_6 = arith.constant 0 : index
    %c64 = arith.constant 64 : index
    %12 = vector.load %arg6[%c0_6, %c64] : memref<224x72xbf16, #tpu.memory_space<vmem>>, vector<224x8xbf16>
    tpu.vector_store %arg6[%c0_6, %c64], %11 {strides = array<i32>} : memref<224x72xbf16, #tpu.memory_space<vmem>>, vector<224x8xbf16>,
    %c0_7 = arith.constant 0 : index
    %c1 = arith.constant 1 : index
    %13 = arith.index_cast %1 : i32 to index
    %c0_8 = arith.constant 0 : index
    %14 = vector.load %arg2[%c0_7, %c1, %13, %c0_8] : memref<1x4x1155x8xbf16, #tpu.memory_space<vmem>>, vector<1x1x257x8xbf16>
    %15 = vector.shape_cast %14 : vector<1x1x257x8xbf16> to vector<257x8xbf16>
    %16 = vector.extract_strided_slice %15 {offsets = [0, 0], sizes = [224, 8], strides = [1, 1]} : vector<257x8xbf16> to vector<224x8xbf16>
    %c0_9 = arith.constant 0 : index
    %c8 = arith.constant 8 : index
    %17 = vector.load %arg6[%c0_9, %c8] : memref<224x72xbf16, #tpu.memory_space<vmem>>, vector<224x8xbf16>
    tpu.vector_store %arg6[%c0_9, %c8], %16 {strides = array<i32>} : memref<224x72xbf16, #tpu.memory_space<vmem>>, vector<224x8xbf16>,
    %18 = vector.extract_strided_slice %15 {offsets = [33, 0], sizes = [224, 8], strides = [1, 1]} : vector<257x8xbf16> to vector<224x8xbf16>
    %c0_10 = arith.constant 0 : index
    %c56 = arith.constant 56 : index
    %19 = vector.load %arg6[%c0_10, %c56] : memref<224x72xbf16, #tpu.memory_space<vmem>>, vector<224x8xbf16>
    tpu.vector_store %arg6[%c0_10, %c56], %18 {strides = array<i32>} : memref<224x72xbf16, #tpu.memory_space<vmem>>, vector<224x8xbf16>,
    %c0_11 = arith.constant 0 : index
    %c2 = arith.constant 2 : index
    %20 = arith.index_cast %1 : i32 to index
    %c0_12 = arith.constant 0 : index
    %21 = vector.load %arg2[%c0_11, %c2, %20, %c0_12] : memref<1x4x1155x8xbf16, #tpu.memory_space<vmem>>, vector<1x1x225x8xbf16>
    %22 = vector.shape_cast %21 : vector<1x1x225x8xbf16> to vector<225x8xbf16>
    %23 = vector.extract_strided_slice %22 {offsets = [0, 0], sizes = [224, 8], strides = [1, 1]} : vector<225x8xbf16> to vector<224x8xbf16>
    %c0_13 = arith.constant 0 : index
    %c24 = arith.constant 24 : index
    %24 = vector.load %arg6[%c0_13, %c24] : memref<224x72xbf16, #tpu.memory_space<vmem>>, vector<224x8xbf16>
    tpu.vector_store %arg6[%c0_13, %c24], %23 {strides = array<i32>} : memref<224x72xbf16, #tpu.memory_space<vmem>>, vector<224x8xbf16>,
    %25 = vector.extract_strided_slice %22 {offsets = [1, 0], sizes = [224, 8], strides = [1, 1]} : vector<225x8xbf16> to vector<224x8xbf16>
    %c0_14 = arith.constant 0 : index
    %c40 = arith.constant 40 : index
    %26 = vector.load %arg6[%c0_14, %c40] : memref<224x72xbf16, #tpu.memory_space<vmem>>, vector<224x8xbf16>
    tpu.vector_store %arg6[%c0_14, %c40], %25 {strides = array<i32>} : memref<224x72xbf16, #tpu.memory_space<vmem>>, vector<224x8xbf16>,
    %c0_15 = arith.constant 0 : index
    %c3 = arith.constant 3 : index
    %27 = arith.index_cast %1 : i32 to index
    %c0_16 = arith.constant 0 : index
    %28 = vector.load %arg2[%c0_15, %c3, %27, %c0_16] : memref<1x4x1155x8xbf16, #tpu.memory_space<vmem>>, vector<1x1x224x8xbf16>
    %29 = vector.shape_cast %28 : vector<1x1x224x8xbf16> to vector<224x8xbf16>
    %c0_17 = arith.constant 0 : index
    %c32 = arith.constant 32 : index
    %30 = vector.load %arg6[%c0_17, %c32] : memref<224x72xbf16, #tpu.memory_space<vmem>>, vector<224x8xbf16>
    tpu.vector_store %arg6[%c0_17, %c32], %29 {strides = array<i32>} : memref<224x72xbf16, #tpu.memory_space<vmem>>, vector<224x8xbf16>,
    %c0_18 = arith.constant 0 : index
    %c0_19 = arith.constant 0 : index
    %31 = vector.load %arg6[%c0_18, %c0_19] : memref<224x72xbf16, #tpu.memory_space<vmem>>, vector<224x72xbf16>
    %c0_20 = arith.constant 0 : index
    %c0_21 = arith.constant 0 : index
    %32 = vector.load %arg3[%c0_20, %c0_21] : memref<72x16xbf16, #tpu.memory_space<vmem>>, vector<72x16xbf16>
    %cst = arith.constant dense<0.000000e+00> : vector<224x16xf32>
    %33 = tpu.matmul %31, %32, %cst {dimension_numbers = #tpu.dot_dimension_numbers<[1], [0], [0], [1], [0, 0, 1, 1], [], []>} : vector<224x72xbf16>, vector<72x16xbf16>, vector<224x16xf32> -> vector<224x16xf32>
    %c0_22 = arith.constant 0 : index
    %c0_23 = arith.constant 0 : index
    %34 = vector.load %arg4[%c0_22, %c0_23] : memref<1x16xf32, #tpu.memory_space<vmem>>, vector<1x16xf32>
    %35 = vector.broadcast %34 : vector<1x16xf32> to vector<224x16xf32>
    %36 = arith.addf %33, %35 : vector<224x16xf32>
    %37 = arith.negf %36 : vector<224x16xf32>
    %38 = math.exp %37 : vector<224x16xf32>
    %cst_24 = arith.constant 1.000000e+00 : f32
    %39 = vector.broadcast %cst_24 : f32 to vector<224x16xf32>
    %40 = arith.addf %39, %38 : vector<224x16xf32>
    %41 = arith.divf %39, %40 : vector<224x16xf32>
    %42 = arith.mulf %36, %41 : vector<224x16xf32>
    %43 = arith.truncf %42 : vector<224x16xf32> to vector<224x16xbf16>
    %c0_25 = arith.constant 0 : index
    %c0_26 = arith.constant 0 : index
    %c0_27 = arith.constant 0 : index
    %44 = vector.load %arg5[%c0_25, %c0_26, %c0_27] : memref<1x224x16xbf16, #tpu.memory_space<vmem>>, vector<1x224x16xbf16>
    %45 = vector.shape_cast %44 : vector<1x224x16xbf16> to vector<224x16xbf16>
    %46 = vector.shape_cast %43 : vector<224x16xbf16> to vector<1x224x16xbf16>
    tpu.vector_store %arg5[%c0_25, %c0_26, %c0_27], %46 {strides = array<i32>} : memref<1x224x16xbf16, #tpu.memory_space<vmem>>, vector<1x224x16xbf16>,
    return
  }
  func.func @transform_0(%arg0: i32, %arg1: i32) -> (i32, i32, i32, i32) {
    %c0_i32 = arith.constant 0 : i32
    %c0_i32_0 = arith.constant 0 : i32
    %c0_i32_1 = arith.constant 0 : i32
    %c0_i32_2 = arith.constant 0 : i32
    return %arg0, %c0_i32, %c0_i32_0, %c0_i32_1 : i32, i32, i32, i32
  }
  func.func @transform_1(%arg0: i32, %arg1: i32) -> (i32, i32) {
    %c0_i32 = arith.constant 0 : i32
    %c0_i32_0 = arith.constant 0 : i32
    %c0_i32_1 = arith.constant 0 : i32
    return %c0_i32, %c0_i32_0 : i32, i32
  }
  func.func @transform_2(%arg0: i32, %arg1: i32) -> (i32, i32) {
    %c0_i32 = arith.constant 0 : i32
    %c0_i32_0 = arith.constant 0 : i32
    %c0_i32_1 = arith.constant 0 : i32
    return %c0_i32, %c0_i32_0 : i32, i32
  }
  func.func @transform_3(%arg0: i32, %arg1: i32) -> (i32, i32, i32) {
    %c0_i32 = arith.constant 0 : i32
    %c0_i32_0 = arith.constant 0 : i32
    return %arg0, %arg1, %c0_i32 : i32, i32, i32
  }
}

module attributes {stable_mosaic.version = 11 : i64} {
  func.func @kernel(%arg0: i32, %arg1: i32, %arg2: memref<1x4x1155x8xbf16, #tpu.memory_space<vmem>>, %arg3: memref<72x16xbf16, #tpu.memory_space<vmem>>, %arg4: memref<1x16xf32, #tpu.memory_space<vmem>>, %arg5: memref<1x224x16xbf16, #tpu.memory_space<vmem>>) attributes {dimension_semantics = [#tpu.dimension_semantics<parallel>, #tpu.dimension_semantics<parallel>], iteration_bounds = array<i64: 2, 5>, scalar_prefetch = 0 : i64, scratch_operands = 0 : i64, tpu.core_type = #tpu.core_type<tc>, window_params = [{transform_indices = @transform_0, window_bounds = array<i64: 1, 4, 1155, 8>}, {pipeline_mode = #tpu.pipeline_mode<synchronous>, transform_indices = @transform_1, window_bounds = array<i64: 72, 16>}, {pipeline_mode = #tpu.pipeline_mode<synchronous>, transform_indices = @transform_2, window_bounds = array<i64: 1, 16>}, {transform_indices = @transform_3, window_bounds = array<i64: 1, 224, 16>}]} {
    %c224_i32 = arith.constant 224 : i32
    %0 = arith.muli %arg1, %c224_i32 : i32
    %1 = tpu.assume_multiple %0, 8 : i32
    %c0 = arith.constant 0 : index
    %c0_0 = arith.constant 0 : index
    %2 = arith.index_cast %1 : i32 to index
    %c0_1 = arith.constant 0 : index
    %3 = vector.load %arg2[%c0, %c0_0, %2, %c0_1] : memref<1x4x1155x8xbf16, #tpu.memory_space<vmem>>, vector<1x1x258x8xbf16>
    %4 = vector.shape_cast %3 : vector<1x1x258x8xbf16> to vector<258x8xbf16>
    %5 = vector.extract_strided_slice %4 {offsets = [0, 0], sizes = [224, 8], strides = [1, 1]} : vector<258x8xbf16> to vector<224x8xbf16>
    %c0_2 = arith.constant 0 : index
    %c0_3 = arith.constant 0 : index
    %6 = vector.load %arg3[%c0_2, %c0_3] : memref<72x16xbf16, #tpu.memory_space<vmem>>, vector<8x16xbf16>
    %cst = arith.constant dense<0.000000e+00> : vector<224x16xf32>
    %7 = tpu.matmul %5, %6, %cst {dimension_numbers = #tpu.dot_dimension_numbers<[1], [0], [0], [1], [0, 0, 1, 1], [], []>} : vector<224x8xbf16>, vector<8x16xbf16>, vector<224x16xf32> -> vector<224x16xf32>
    %8 = vector.extract_strided_slice %4 {offsets = [1, 0], sizes = [224, 8], strides = [1, 1]} : vector<258x8xbf16> to vector<224x8xbf16>
    %c16 = arith.constant 16 : index
    %c0_4 = arith.constant 0 : index
    %9 = vector.load %arg3[%c16, %c0_4] : memref<72x16xbf16, #tpu.memory_space<vmem>>, vector<8x16xbf16>
    %cst_5 = arith.constant dense<0.000000e+00> : vector<224x16xf32>
    %10 = tpu.matmul %8, %9, %cst_5 {dimension_numbers = #tpu.dot_dimension_numbers<[1], [0], [0], [1], [0, 0, 1, 1], [], []>} : vector<224x8xbf16>, vector<8x16xbf16>, vector<224x16xf32> -> vector<224x16xf32>
    %11 = arith.addf %7, %10 : vector<224x16xf32>
    %12 = vector.extract_strided_slice %4 {offsets = [33, 0], sizes = [224, 8], strides = [1, 1]} : vector<258x8xbf16> to vector<224x8xbf16>
    %c48 = arith.constant 48 : index
    %c0_6 = arith.constant 0 : index
    %13 = vector.load %arg3[%c48, %c0_6] : memref<72x16xbf16, #tpu.memory_space<vmem>>, vector<8x16xbf16>
    %cst_7 = arith.constant dense<0.000000e+00> : vector<224x16xf32>
    %14 = tpu.matmul %12, %13, %cst_7 {dimension_numbers = #tpu.dot_dimension_numbers<[1], [0], [0], [1], [0, 0, 1, 1], [], []>} : vector<224x8xbf16>, vector<8x16xbf16>, vector<224x16xf32> -> vector<224x16xf32>
    %15 = arith.addf %11, %14 : vector<224x16xf32>
    %16 = vector.extract_strided_slice %4 {offsets = [34, 0], sizes = [224, 8], strides = [1, 1]} : vector<258x8xbf16> to vector<224x8xbf16>
    %c64 = arith.constant 64 : index
    %c0_8 = arith.constant 0 : index
    %17 = vector.load %arg3[%c64, %c0_8] : memref<72x16xbf16, #tpu.memory_space<vmem>>, vector<8x16xbf16>
    %cst_9 = arith.constant dense<0.000000e+00> : vector<224x16xf32>
    %18 = tpu.matmul %16, %17, %cst_9 {dimension_numbers = #tpu.dot_dimension_numbers<[1], [0], [0], [1], [0, 0, 1, 1], [], []>} : vector<224x8xbf16>, vector<8x16xbf16>, vector<224x16xf32> -> vector<224x16xf32>
    %19 = arith.addf %15, %18 : vector<224x16xf32>
    %c0_10 = arith.constant 0 : index
    %c1 = arith.constant 1 : index
    %20 = arith.index_cast %1 : i32 to index
    %c0_11 = arith.constant 0 : index
    %21 = vector.load %arg2[%c0_10, %c1, %20, %c0_11] : memref<1x4x1155x8xbf16, #tpu.memory_space<vmem>>, vector<1x1x257x8xbf16>
    %22 = vector.shape_cast %21 : vector<1x1x257x8xbf16> to vector<257x8xbf16>
    %23 = vector.extract_strided_slice %22 {offsets = [0, 0], sizes = [224, 8], strides = [1, 1]} : vector<257x8xbf16> to vector<224x8xbf16>
    %c8 = arith.constant 8 : index
    %c0_12 = arith.constant 0 : index
    %24 = vector.load %arg3[%c8, %c0_12] : memref<72x16xbf16, #tpu.memory_space<vmem>>, vector<8x16xbf16>
    %cst_13 = arith.constant dense<0.000000e+00> : vector<224x16xf32>
    %25 = tpu.matmul %23, %24, %cst_13 {dimension_numbers = #tpu.dot_dimension_numbers<[1], [0], [0], [1], [0, 0, 1, 1], [], []>} : vector<224x8xbf16>, vector<8x16xbf16>, vector<224x16xf32> -> vector<224x16xf32>
    %26 = arith.addf %19, %25 : vector<224x16xf32>
    %27 = vector.extract_strided_slice %22 {offsets = [33, 0], sizes = [224, 8], strides = [1, 1]} : vector<257x8xbf16> to vector<224x8xbf16>
    %c56 = arith.constant 56 : index
    %c0_14 = arith.constant 0 : index
    %28 = vector.load %arg3[%c56, %c0_14] : memref<72x16xbf16, #tpu.memory_space<vmem>>, vector<8x16xbf16>
    %cst_15 = arith.constant dense<0.000000e+00> : vector<224x16xf32>
    %29 = tpu.matmul %27, %28, %cst_15 {dimension_numbers = #tpu.dot_dimension_numbers<[1], [0], [0], [1], [0, 0, 1, 1], [], []>} : vector<224x8xbf16>, vector<8x16xbf16>, vector<224x16xf32> -> vector<224x16xf32>
    %30 = arith.addf %26, %29 : vector<224x16xf32>
    %c0_16 = arith.constant 0 : index
    %c2 = arith.constant 2 : index
    %31 = arith.index_cast %1 : i32 to index
    %c0_17 = arith.constant 0 : index
    %32 = vector.load %arg2[%c0_16, %c2, %31, %c0_17] : memref<1x4x1155x8xbf16, #tpu.memory_space<vmem>>, vector<1x1x225x8xbf16>
    %33 = vector.shape_cast %32 : vector<1x1x225x8xbf16> to vector<225x8xbf16>
    %34 = vector.extract_strided_slice %33 {offsets = [0, 0], sizes = [224, 8], strides = [1, 1]} : vector<225x8xbf16> to vector<224x8xbf16>
    %c24 = arith.constant 24 : index
    %c0_18 = arith.constant 0 : index
    %35 = vector.load %arg3[%c24, %c0_18] : memref<72x16xbf16, #tpu.memory_space<vmem>>, vector<8x16xbf16>
    %cst_19 = arith.constant dense<0.000000e+00> : vector<224x16xf32>
    %36 = tpu.matmul %34, %35, %cst_19 {dimension_numbers = #tpu.dot_dimension_numbers<[1], [0], [0], [1], [0, 0, 1, 1], [], []>} : vector<224x8xbf16>, vector<8x16xbf16>, vector<224x16xf32> -> vector<224x16xf32>
    %37 = arith.addf %30, %36 : vector<224x16xf32>
    %38 = vector.extract_strided_slice %33 {offsets = [1, 0], sizes = [224, 8], strides = [1, 1]} : vector<225x8xbf16> to vector<224x8xbf16>
    %c40 = arith.constant 40 : index
    %c0_20 = arith.constant 0 : index
    %39 = vector.load %arg3[%c40, %c0_20] : memref<72x16xbf16, #tpu.memory_space<vmem>>, vector<8x16xbf16>
    %cst_21 = arith.constant dense<0.000000e+00> : vector<224x16xf32>
    %40 = tpu.matmul %38, %39, %cst_21 {dimension_numbers = #tpu.dot_dimension_numbers<[1], [0], [0], [1], [0, 0, 1, 1], [], []>} : vector<224x8xbf16>, vector<8x16xbf16>, vector<224x16xf32> -> vector<224x16xf32>
    %41 = arith.addf %37, %40 : vector<224x16xf32>
    %c0_22 = arith.constant 0 : index
    %c3 = arith.constant 3 : index
    %42 = arith.index_cast %1 : i32 to index
    %c0_23 = arith.constant 0 : index
    %43 = vector.load %arg2[%c0_22, %c3, %42, %c0_23] : memref<1x4x1155x8xbf16, #tpu.memory_space<vmem>>, vector<1x1x224x8xbf16>
    %44 = vector.shape_cast %43 : vector<1x1x224x8xbf16> to vector<224x8xbf16>
    %c32 = arith.constant 32 : index
    %c0_24 = arith.constant 0 : index
    %45 = vector.load %arg3[%c32, %c0_24] : memref<72x16xbf16, #tpu.memory_space<vmem>>, vector<8x16xbf16>
    %cst_25 = arith.constant dense<0.000000e+00> : vector<224x16xf32>
    %46 = tpu.matmul %44, %45, %cst_25 {dimension_numbers = #tpu.dot_dimension_numbers<[1], [0], [0], [1], [0, 0, 1, 1], [], []>} : vector<224x8xbf16>, vector<8x16xbf16>, vector<224x16xf32> -> vector<224x16xf32>
    %47 = arith.addf %41, %46 : vector<224x16xf32>
    %c0_26 = arith.constant 0 : index
    %c0_27 = arith.constant 0 : index
    %48 = vector.load %arg4[%c0_26, %c0_27] : memref<1x16xf32, #tpu.memory_space<vmem>>, vector<1x16xf32>
    %49 = vector.broadcast %48 : vector<1x16xf32> to vector<224x16xf32>
    %50 = arith.addf %47, %49 : vector<224x16xf32>
    %51 = arith.negf %50 : vector<224x16xf32>
    %52 = math.exp %51 : vector<224x16xf32>
    %cst_28 = arith.constant 1.000000e+00 : f32
    %53 = vector.broadcast %cst_28 : f32 to vector<224x16xf32>
    %54 = arith.addf %53, %52 : vector<224x16xf32>
    %55 = arith.divf %53, %54 : vector<224x16xf32>
    %56 = arith.mulf %50, %55 : vector<224x16xf32>
    %57 = arith.truncf %56 : vector<224x16xf32> to vector<224x16xbf16>
    %c0_29 = arith.constant 0 : index
    %c0_30 = arith.constant 0 : index
    %c0_31 = arith.constant 0 : index
    %58 = vector.load %arg5[%c0_29, %c0_30, %c0_31] : memref<1x224x16xbf16, #tpu.memory_space<vmem>>, vector<1x224x16xbf16>
    %59 = vector.shape_cast %58 : vector<1x224x16xbf16> to vector<224x16xbf16>
    %60 = vector.shape_cast %57 : vector<224x16xbf16> to vector<1x224x16xbf16>
    tpu.vector_store %arg5[%c0_29, %c0_30, %c0_31], %60 {strides = array<i32>} : memref<1x224x16xbf16, #tpu.memory_space<vmem>>, vector<1x224x16xbf16>,
    return
  }
  func.func @transform_0(%arg0: i32, %arg1: i32) -> (i32, i32, i32, i32) {
    %c0_i32 = arith.constant 0 : i32
    %c0_i32_0 = arith.constant 0 : i32
    %c0_i32_1 = arith.constant 0 : i32
    %c0_i32_2 = arith.constant 0 : i32
    return %arg0, %c0_i32, %c0_i32_0, %c0_i32_1 : i32, i32, i32, i32
  }
  func.func @transform_1(%arg0: i32, %arg1: i32) -> (i32, i32) {
    %c0_i32 = arith.constant 0 : i32
    %c0_i32_0 = arith.constant 0 : i32
    %c0_i32_1 = arith.constant 0 : i32
    return %c0_i32, %c0_i32_0 : i32, i32
  }
  func.func @transform_2(%arg0: i32, %arg1: i32) -> (i32, i32) {
    %c0_i32 = arith.constant 0 : i32
    %c0_i32_0 = arith.constant 0 : i32
    %c0_i32_1 = arith.constant 0 : i32
    return %c0_i32, %c0_i32_0 : i32, i32
  }
  func.func @transform_3(%arg0: i32, %arg1: i32) -> (i32, i32, i32) {
    %c0_i32 = arith.constant 0 : i32
    %c0_i32_0 = arith.constant 0 : i32
    return %arg0, %arg1, %c0_i32 : i32, i32, i32
  }
}

</mosaic_0001>

<bundles_post_ra>
// kernel: tpu_custom_call.1
= control target key start
LH: loop header
LB: loop body
LE: loop exit
PB: predicated region body
PF: predicated region fallthrough
CT: control target
= control target key end

     0   :  { %s2846_s12 = smov 0   ;;  %s2848_s13 = smov 0   ;;  %s3733_s0 = inlined_call_operand.vmem [shape: bf16[2,4,1155,8], index: 0, kind: input, shape index: {}]   ;;  %s3734_s1 = inlined_call_operand.vmem [shape: bf16[72,16], index: 1, kind: input, shape index: {}]   ;;  %s3735_s2 = inlined_call_operand.vmem [shape: f32[1,16], index: 2, kind: input, shape index: {}]   ;;  %s3736_s3 = inlined_call_operand.vmem [shape: bf16[2,1120,16], index: 3, kind: output, shape index: {}]  }
   0x1   :  { %s2850_s14 = smov 0   ;;  %s2852_s15 = smov 0  }
   0x2   :  { %s2854_s16 = smov 0  }
   0x3 LB: > { %s22_s17 = sadd.s32 1, %s2808_s14  ;;  %s25_s18 = sadd.s32 1, %s2812_s15  ;;  %s2816_s16 = sphi %s2854_s16, %s13_s16   ;;  %s2812_s15 = sphi %s2852_s15, %s3740_s15   ;;  %s2808_s14 = sphi %s2850_s14, %s3739_s14   ;;  %s2804_s13 = sphi %s2848_s13, %s3738_s13   ;;  %s2800_s12 = sphi %s2846_s12, %s3737_s12  }
   0x4   : > { %p23_p0 = scmp.ge.s32.totalorder %s22_s17, 5  ;;  %p2212_p1 = scmp.ge.s32.totalorder %s2816_s16, 1 }
   0x5   : > { %p151_p2 = scmp.lt.s32.totalorder %s2816_s16, 11 }
   0x6   : > { %s3742_s17 = smov (%p23_p0, %s22_s17), 0  ;;  %s3744_s18 = smov (!%p23_p0, %s25_s18), %s2812_s15 }
   0x7   : > { %p152_p3 = pnand %p2212_p1, %p151_p2  ;;  %p27_p4 = scmp.ge.s32.totalorder %s3744_s18, 2 }
   0x8   : > { %p179_p5 = scmp.lt.s32.totalorder (!%p152_p3), %s2804_s13, 1  ;;  %s195_s19 = smul.u32 (!%p152_p3), 224, %s2800_s12  ;;  %vm598_vm0 = vcmask (!%p152_p3), 1046528   ;;  %vm335_vm1 = vsmask.f32 (!%p152_p3), 7424  ;;  %vm317_vm2 = vcmask (!%p152_p3), 64512  }
   0x9   : > { %s3746_s18 = smov (%p27_p4, %s3744_s18), 0  ;;  %155 = sbr.rel (%p152_p3) target bundleno = 617 (0x269), region = 32 }
   0xa   : > { %s196_s20 = sshra.s32 (!%p152_p3), %s195_s19, 3  ;;  %s2818_s27 = smov (!%p152_p3), 8   ;;  %vm1627_vm3 = vcmask (!%p152_p3), 1043456   ;;  %vm494_vm4 = vcmask (!%p152_p3), 195712   ;;  %vm583_vm5 = vcmask (!%p152_p3), 458112   ;;  %vm670_vm6 = vcmask (!%p152_p3), 589312  }
   0xb   : > { %s2215_s22 = sshll.u32 (!%p152_p3), %s196_s20, 2  ;;  %s2819_s28 = smov (!%p152_p3), 64   ;;  %vm833_vm7 = vcmask (!%p152_p3), 130112   ;;  %vm1019_vm8 = vcmask (!%p152_p3), 523712   ;;  %vm1178_vm9 = vcmask (!%p152_p3), 261312   ;;  %vm1354_vm10 = vcmask (!%p152_p3), 392512  }
   0xc   : > { %s2820_s29 = smov (!%p152_p3), 48   ;;  %s2821_s30 = smov (!%p152_p3), 16   ;;  %vm1512_vm11 = vcmask (!%p152_p3), 326912   ;;  %vm1584_vm12 = vcmask (!%p152_p3), 588800   ;;  %vm2084_vm13 = vcmask (!%p152_p3), 125952  }
   0xd   : > { %s2822_s4 = smov (!%p152_p3), 56   ;;  %s2823_s5 = smov (!%p152_p3), 24  }
   0xe   : > { %s2824_s6 = smov (!%p152_p3), 40   ;;  %s2825_s7 = smov (!%p152_p3), 32  }
  0x10   : > { %s3748_s13 = smov (!%p179_p5, %s2804_s13), 1 }
  0x11   : > { %s2548_s21 = smul.u32 2320, %s3748_s13 }
  0x13   : > { %s183_s25 = scalar_lea.vmem %s3733_s0, %s2548_s21 }
  0x14   : > { %s2885_s26 = scalar_lea.vmem %s183_s25, %s2215_s22 }
  0x15   : > { %v2598_v0 = vld [vmem:[%s2885_s26 + $0x24c] sm:$0xff]   ;;  %v2599_v1 = vld [vmem:[%s2885_s26 + $0x244] sm:$0xff]   ;;  %v2600_v2 = vld [vmem:[%s2885_s26 + $0x18] sm:$0xff]  }
  0x16   : > { %793 = vrot.lane.b32.xlu1 %v2598_v0, %s2818_s27  ;;  %791 = vrot.lane.b32.xlu0 %v2599_v1, %s2818_s27  ;;  %v2893_v3 = vld [vmem:[%s2885_s26 + $0x20] sm:$0xff]   ;;  %v2602_v4 = vld [vmem:[%s2885_s26 + $0x10] sm:$0xff]   ;;  %v600_v5 = vrot.slane %v2600_v2, 1  ;;  %v360_v7 = vshll.u32 %v2600_v2, 16  ;;  %321 = vst.msk [vmem:[#allocation2 + $0x18] sm:$0xff] %vm317_vm2, %v2600_v2  ;;  %v364_v21 = vshrl.u32 %v2600_v2, 16 }
  0x17   : > { %v602_v6 = vrot.slane %v2893_v3, 1  ;;  %v2603_v8 = vld [vmem:[%s2885_s26] sm:$0xff]   ;;  %322 = vst.msk [vmem:[#allocation2 + $0x20] sm:$0xff] %vm317_vm2, %v2893_v3  ;;  %v599_v9 = vrot.slane %v2602_v4, 1  ;;  %v352_v10 = vshll.u32 %v2602_v4, 16  ;;  %v356_v11 = vshrl.u32 %v2602_v4, 16 }
  0x18   : > { %v2604_v12 = vld [vmem:[%s2885_s26 + $0x8] sm:$0xff]   ;;  %320 = vst.msk [vmem:[#allocation2 + $0x10] sm:$0xff] %vm317_vm2, %v2602_v4  ;;  %v362_v14 = vrot.slane %v360_v7, 1  ;;  %v337_v15 = vshrl.u32 %v2603_v8, 16  ;;  %318 = vst.msk [vmem:[#allocation2] sm:$0xff] %vm317_vm2, %v2603_v8  ;;  %v339_v18 = vshll.u32 %v2603_v8, 16 }
  0x19   : > { %v603_v13 = vsel %vm598_vm0, %v600_v5, %v602_v6  ;;  %v601_v16 = vsel %vm598_vm0, %v599_v9, %v600_v5  ;;  %v354_v17 = vrot.slane %v352_v10, 1  ;;  %v344_v19 = vshll.u32 %v2604_v12, 16  ;;  %v2910_v20 = vld [vmem:[%s2885_s26 + $0x25c] sm:$0xff]   ;;  %319 = vst.msk [vmem:[#allocation2 + $0x8] sm:$0xff] %vm317_vm2, %v2604_v12  ;;  %v2916_v24 = vld [vmem:[%s2885_s26 + $0x264] sm:$0xff]   ;;  %v2923_v32 = vld [vmem:[%s2885_s26 + $0x254] sm:$0xff]  }
  0x1a   : > { %630 = vrot.lane.b32.xlu1 %v603_v13, %s2819_s28  ;;  %628 = vrot.lane.b32.xlu0 %v601_v16, %s2819_s28  ;;  %v368_v22 = vshll.u32 %v2893_v3, 16  ;;  %v348_v23 = vshrl.u32 %v2604_v12, 16  ;;  %v341_v26 = vrot.slane %v339_v18, 1  ;;  %v366_v28 = vor.u32 %v364_v21, %v362_v14  ;;  %v2608_v37 = vld [vmem:[%s2885_s26 + $0x490] sm:$0xff]   ;;  %v2609_v41 = vld [vmem:[%s2885_s26 + $0x488] sm:$0xff]  }
  0x1b   : > { %v358_v25 = vor.u32 %v356_v11, %v354_v17  ;;  %v346_v27 = vrot.slane %v344_v19, 1  ;;  %v869_v30 = vshll.u32 %v2910_v20, 16  ;;  %v873_v31 = vshrl.u32 %v2910_v20, 16  ;;  %v2945_v50 = vld [vmem:[%s2885_s26 + $0x498] sm:$0xff]   ;;  %v2955_v59 = vld [vmem:[%s2885_s26 + $0x40] sm:$0xff]   ;;  %v2958_v60 = vld [vmem:[%s2885_s26 + $0x48] sm:$0xff]  }
  0x1c   : > { %v2918_v29 = vrot.slane %v368_v22, 1  ;;  %v342_v34 = vor.u32 %v341_v26, %v337_v15  ;;  %v877_v36 = vshll.u32 %v2916_v24, 16  ;;  %v862_v39 = vshrl.u32 %v2923_v32, 16  ;;  %v2962_v61 = vld [vmem:[%s2885_s26 + $0x50] sm:$0xff]   ;;  %v2967_v0 = vld [vmem:[%s2885_s26 + $0x58] sm:$0xff]   ;;  %326 = vst.msk [vmem:[#allocation2 + $0x40] sm:$0xff] %vm317_vm2, %v2955_v59 }
  0x1d   : > { %v2926_v33 = vsel %vm335_vm1, %v358_v25, %v362_v14  ;;  %v350_v35 = vor.u32 %v348_v23, %v346_v27  ;;  %v871_v38 = vrot.slane %v869_v30, 1  ;;  %v864_v40 = vshll.u32 %v2923_v32, 16  ;;  %327 = vst.msk [vmem:[#allocation2 + $0x48] sm:$0xff] %vm317_vm2, %v2958_v60  ;;  %v2975_v1 = vld [vmem:[%s2885_s26 + $0x28] sm:$0xff]   ;;  %328 = vst.msk [vmem:[#allocation2 + $0x50] sm:$0xff] %vm317_vm2, %v2962_v61  ;;  %v2981_v5 = vld [vmem:[%s2885_s26 + $0x60] sm:$0xff]  }
  0x1e   : > { %541 = vrot.lane.b32.xlu1 %v2926_v33, %s2820_s29  ;;  %v347_v42 = vsel %vm335_vm1, %v342_v34, %v346_v27  ;;  %v2938_v43 = vsel %vm335_vm1, %v366_v28, %v2918_v29  ;;  %v2940_v44 = vrot.slane %v877_v36, 1  ;;  %v1204_v45 = vshll.u32 %v2608_v37, 16  ;;  %329 = vst.msk [vmem:[#allocation2 + $0x58] sm:$0xff] %vm317_vm2, %v2967_v0  ;;  %323 = vst.msk [vmem:[#allocation2 + $0x28] sm:$0xff] %vm317_vm2, %v2975_v1  ;;  %v2995_v9 = vld [vmem:[%s2885_s26 + $0x30] sm:$0xff]  }
  0x1f   : > { %452 = vrot.lane.b32.xlu0 %v347_v42, %s2821_s30  ;;  %v875_v46 = vor.u32 %v873_v31, %v871_v38  ;;  %v866_v47 = vrot.slane %v864_v40, 1  ;;  %v355_v48 = vsel %vm335_vm1, %v350_v35, %v354_v17  ;;  %v1199_v49 = vshll.u32 %v2609_v41, 16  ;;  %330 = vst.msk [vmem:[#allocation2 + $0x60] sm:$0xff] %vm317_vm2, %v2981_v5  ;;  %324 = vst.msk [vmem:[#allocation2 + $0x30] sm:$0xff] %vm317_vm2, %v2995_v9  ;;  %v2611_v15 = vld [vmem:[%s2885_s26 + $0x6cc] sm:$0xff]   ;;  %v2612_v18 = vld [vmem:[%s2885_s26 + $0x6d4] sm:$0xff]  }
  0x20   : > { %v1206_v52 = vrot.slane %v1204_v45, 1  ;;  %v1208_v54 = vshrl.u32 %v2608_v37, 16  ;;  %v1212_v55 = vshll.u32 %v2945_v50, 16  ;;  %v1197_v57 = vshrl.u32 %v2609_v41, 16 }
  0x21   : > { %v867_v51 = vor.u32 %v866_v47, %v862_v39  ;;  %v880_v53 = vsel %vm335_vm1, %v875_v46, %v2940_v44  ;;  %v1201_v58 = vrot.slane %v1199_v49, 1  ;;  %v400_v4 = vshll.u32 %v2955_v59, 16 }
  0x22   : > { %543 = vrot.lane.b32.xlu1 %v2938_v43, %s2820_s29  ;;  %v1210_v62 = vor.u32 %v1208_v54, %v1206_v52  ;;  %v2964_v63 = vrot.slane %v1212_v55, 1  ;;  %v404_v8 = vshrl.u32 %v2955_v59, 16  ;;  %v408_v12 = vshll.u32 %v2958_v60, 16  ;;  %v3075_v55 = vld [vmem:[%s2885_s26 + $0x294] sm:$0xff]  }
  0x23   : > { %454 = vrot.lane.b32.xlu0 %v355_v48, %s2821_s30  ;;  %v872_v56 = vsel %vm335_vm1, %v867_v51, %v871_v38  ;;  %v1202_v2 = vor.u32 %v1201_v58, %v1197_v57  ;;  %v2998_v11 = vrot.slane %v400_v4, 1  ;;  %v412_v13 = vshrl.u32 %v2958_v60, 16  ;;  %v3087_v58 = vld [vmem:[%s2885_s26 + $0x29c] sm:$0xff]   ;;  %v3103_v4 = vld [vmem:[%s2885_s26 + $0x26c] sm:$0xff]  }
  0x24   : > { %v1215_v7 = vsel %vm335_vm1, %v1210_v62, %v2964_v63  ;;  %v416_v14 = vshll.u32 %v2962_v61, 16  ;;  %v410_v17 = vrot.slane %v408_v12, 1  ;;  %v424_v19 = vshll.u32 %v2967_v0, 16 }
  0x25   : > { %v1207_v10 = vsel %vm335_vm1, %v1202_v2, %v1206_v52  ;;  %v406_v16 = vor.u32 %v404_v8, %v2998_v11  ;;  %v420_v23 = vshrl.u32 %v2962_v61, 16  ;;  %v376_v25 = vshll.u32 %v2975_v1, 16  ;;  %v3068_v52 = vld [vmem:[%s2885_s26 + $0x38] sm:$0xff]   ;;  %v2643_v2 = vld [vmem:[%s3734_s1 + $0x8] sm:$0xff]  }
  0x26   : > { %979 = vrot.lane.b32.xlu1 %v880_v53, %s2822_s4  ;;  %v414_v21 = vor.u32 %v412_v13, %v410_v17  ;;  %v418_v22 = vrot.slane %v416_v14, 1  ;;  %v372_v27 = vshrl.u32 %v2893_v3, 16  ;;  %v426_v28 = vrot.slane %v424_v19, 1  ;;  %325 = vst.msk [vmem:[#allocation2 + $0x38] sm:$0xff] %vm317_vm2, %v3068_v52  ;;  %v3122_v14 = vld [vmem:[%s2885_s26 + $0x2a4] sm:$0xff]   ;;  %v3133_v19 = vld [vmem:[%s2885_s26 + $0x274] sm:$0xff]  }
  0x27   : > { %977 = vrot.lane.b32.xlu0 %v872_v56, %s2822_s4  ;;  %v3017_v26 = vsel %vm335_vm1, %v406_v16, %v410_v17  ;;  %v432_v34 = vshll.u32 %v2981_v5, 16  ;;  %v378_v35 = vrot.slane %v376_v25, 1  ;;  %v384_v38 = vshll.u32 %v2995_v9, 16  ;;  %v2646_v16 = vld [vmem:[%s3734_s1 + $0x10] sm:$0xff]  }
  0x28   : > { %v3022_v30 = vsel %vm335_vm1, %v414_v21, %v418_v22  ;;  %v422_v31 = vor.u32 %v420_v23, %v418_v22  ;;  %v374_v36 = vor.u32 %v372_v27, %v2918_v29  ;;  %v614_v46 = vrot.slane %v2962_v61, 1  ;;  %v3138_v21 = vld [vmem:[%s2885_s26 + $0x28c] sm:$0xff]  }
  0x29   : > { %v3043_v45 = vrot.slane %v384_v38, 1  ;;  %v616_v48 = vrot.slane %v2967_v0, 1  ;;  %v604_v51 = vrot.slane %v2975_v1, 1  ;;  %v618_v54 = vrot.slane %v2981_v5, 1 }
  0x2a   : > { %1138 = vrot.lane.b32.xlu1 %v2608_v37, %s2823_s5  ;;  %v380_v37 = vshrl.u32 %v2975_v1, 16  ;;  %v3034_v39 = vsel %vm335_vm1, %v422_v31, %v426_v28  ;;  %v3041_v42 = vsel %vm335_vm1, %v374_v36, %v378_v35  ;;  %v606_v57 = vrot.slane %v2995_v9, 1  ;;  %v2642_v1 = vld [vmem:[%s3734_s1] sm:$0xff]   ;;  %v2627_v36 = vld [vmem:[%s2885_s26 + $0x4c8] sm:$0xff]  }
  0x2b   : > { %1136 = vrot.lane.b32.xlu0 %v2609_v41, %s2823_s5  ;;  %v3036_v41 = vrot.slane %v432_v34, 1  ;;  %v617_v53 = vsel %vm598_vm0, %v614_v46, %v616_v48  ;;  %v605_v56 = vsel %vm598_vm0, %v602_v6, %v604_v51  ;;  %v608_v62 = vrot.slane %v3068_v52, 1  ;;  %2498 = vmatprep.subr.bf16.mxu0 %v2642_v1 }
  0x2c   : > { %v382_v29 = vor.u32 %v380_v37, %v378_v35  ;;  %v619_v3 = vsel %vm598_vm0, %v616_v48, %v618_v54  ;;  %v925_v6 = vshll.u32 %v3075_v55, 16  ;;  %v607_v8 = vsel %vm598_vm0, %v604_v51, %v606_v57  ;;  %2536 = vmatprep.subr.bf16.mxu1 %v2642_v1  ;;  %2499 = vmatpush3.bf16.msra.mxu0 %v2642_v1 }
  0x2d   : > { %v929_v12 = vshrl.u32 %v3075_v55, 16  ;;  %v933_v13 = vshll.u32 %v3087_v58, 16  ;;  %2500 = vmatprep.subr.bf16.mxu0 %v2643_v2  ;;  %2541 = vmatpush3.bf16.msra.mxu1 %v2642_v1  ;;  %v881_v17 = vshrl.u32 %v2916_v24, 16  ;;  %v937_v22 = vshrl.u32 %v3087_v58, 16  ;;  %v2629_v1 = vld [vmem:[%s2885_s26 + $0x4a0] sm:$0xff]  }
  0x2e   : > { %1314 = vrot.lane.b32.xlu1 %v1215_v7, %s2824_s6  ;;  %v3060_v49 = vsel %vm335_vm1, %v382_v29, %v3043_v45  ;;  %2537 = vmatprep.subr.bf16.mxu1 %v2643_v2  ;;  %v941_v23 = vshll.u32 %v3122_v14, 16  ;;  %v889_v34 = vshrl.u32 %v3103_v4, 16  ;;  %v893_v35 = vshll.u32 %v3133_v19, 16  ;;  %v2628_v29 = vld [vmem:[%s2885_s26 + $0x4d0] sm:$0xff]  }
  0x2f   : > { %1312 = vrot.lane.b32.xlu0 %v1207_v10, %s2824_s6  ;;  %v3117_v10 = vld [vmem:[%s2885_s26 + $0x284] sm:$0xff]   ;;  %v935_v27 = vrot.slane %v933_v13, 1  ;;  %v883_v31 = vor.u32 %v881_v17, %v2940_v44  ;;  %v2650_v44 = vld [vmem:[%s3734_s1 + $0x20] ss:$0 sps:$4 sm:$0xff]   ;;  %v1264_v17 = vshrl.u32 %v2627_v36, 16  ;;  %v917_v61 = vshll.u32 %v3138_v21, 16 }
  0x30   : > { %2501 = vmatpush3.bf16.msra.mxu0 %v2643_v2  ;;  %v3154_v37 = vrot.slane %v941_v23, 1  ;;  %v3164_v51 = vrot.slane %v893_v35, 1  ;;  %v913_v23 = vshrl.u32 %v3117_v10, 16 }
  0x31   : > { %2502 = vmatprep.subr.bf16.mxu0 %v2646_v16  ;;  %2542 = vmatpush3.bf16.msra.mxu1 %v2643_v2  ;;  %v921_v2 = vshrl.u32 %v3138_v21, 16 }
  0x32   : > { %456 = vrot.lane.b32.xlu1 %v2926_v33, %s2821_s30  ;;  %v428_v33 = vshrl.u32 %v2967_v0, 16  ;;  %v610_v0 = vrot.slane %v2955_v59, 1  ;;  %2538 = vmatprep.subr.bf16.mxu1 %v2646_v16  ;;  %v1220_v59 = vshll.u32 %v2629_v1, 16 }
  0x33   : > { %1470 = vrot.lane.b32.xlu0 %v2611_v15, %s2825_s7  ;;  %v3124_v15 = vrot.slane %v925_v6, 1  ;;  %v1629_v6 = vsel %vm1627_vm3, %v2650_v44, 0 }
  0x34   : > { %v430_v40 = vor.u32 %v428_v33, %v426_v28  ;;  %v3110_v7 = vsel %vm598_vm0, %v608_v62, %v610_v0  ;;  %v2647_v28 = vld [vmem:[%s3734_s1 + $0x18] sm:$0xff]   ;;  %2503 = vmatpush3.bf16.msra.mxu0 %v2646_v16 }
  0x35   : > { %v931_v25 = vor.u32 %v929_v12, %v3124_v15  ;;  %2504 = vmatprep.subr.bf16.mxu0 %v2647_v28  ;;  %2543 = vmatpush3.bf16.msra.mxu1 %v2646_v16 }
  0x36   : > { %1472 = vrot.lane.b32.xlu1 %v2612_v18, %s2825_s7  ;;  %v3050_v47 = vsel %vm335_vm1, %v430_v40, %v3036_v41  ;;  %v885_v18 = vshll.u32 %v3103_v4, 16  ;;  %2539 = vmatprep.subr.bf16.mxu1 %v2647_v28 }
  0x37   : > { %468 = vrot.lane.b32.xlu0 %v3017_v26, %s2821_s30  ;;  %v936_v38 = vsel %vm335_vm1, %v931_v25, %v935_v27 }
  0x38   : > { %v887_v33 = vrot.slane %v885_v18, 1  ;;  %2505 = vmatpush3.bf16.msra.mxu0 %v2647_v28 }
  0x39   : > { %2546 = vmatprep.subr.msk.bf16.mxu0 %vm1627_vm3, %v2650_v44  ;;  %2544 = vmatpush3.bf16.msra.mxu1 %v2647_v28  ;;  %v3201_v28 = vld [vmem:[%s2885_s26 + $0x4a8] sm:$0xff]  }
  0x3a   : > { %470 = vrot.lane.b32.xlu1 %v3022_v30, %s2821_s30  ;;  %v888_v40 = vsel %vm335_vm1, %v883_v31, %v887_v33  ;;  %v891_v48 = vor.u32 %v889_v34, %v887_v33  ;;  %2547 = vmatprep.subr.msk.bf16.mxu1 %vm1627_vm3, %v2650_v44  ;;  %v919_v33 = vrot.slane %v917_v61, 1  ;;  %v1228_v44 = vshll.u32 %v3201_v28, 16 }
  0x3b   : > { %458 = vrot.lane.b32.xlu0 %v2938_v43, %s2821_s30  ;;  %v3054_v43 = vld [vmem:[%s2885_s26 + $0x68] sm:$0xff]  }
  0x3c   : > { %331 = vst.msk [vmem:[#allocation2 + $0x68] sm:$0xff] %vm317_vm2, %v3054_v43  ;;  %v896_v13 = vsel %vm335_vm1, %v891_v48, %v3164_v51  ;;  %2507 = vmatpush3.bf16.msra.mxu0 %v1629_v6  ;;  %v923_v35 = vor.u32 %v921_v2, %v919_v33  ;;  %v2634_v2 = vld [vmem:[%s2885_s26 + $0x714] sm:$0xff]  }
  0x3d   : > { %2545 = vmatpush3.bf16.msra.mxu1 %v1629_v6  ;;  %v229_v6 = vld [vmem:[%s2885_s26 + $0x74] sm:$0xf] }
  0x3e   : > { %557 = vrot.lane.b32.xlu1 %v3034_v39, %s2820_s29 }
  0x3f   : > { %545 = vrot.lane.b32.xlu0 %v3041_v42, %s2820_s29 }
  0x42   : > { %559 = vrot.lane.b32.xlu1 %v3050_v47, %s2820_s29 }
  0x43   : > { %547 = vrot.lane.b32.xlu0 %v3060_v49, %s2820_s29 }
  0x46   : > { %644 = vrot.lane.b32.xlu1 %v617_v53, %s2819_s28  ;;  %v1260_v53 = vshll.u32 %v2627_v36, 16 }
  0x47   : > { %632 = vrot.lane.b32.xlu0 %v605_v56, %s2819_s28  ;;  %v612_v56 = vrot.slane %v2958_v60, 1  ;;  %v1268_v60 = vshll.u32 %v2628_v29, 16 }
  0x48   : > { %v3185_v16 = vrot.slane %v1260_v53, 1 }
  0x49   : > { %v3180_v12 = vsel %vm598_vm0, %v610_v0, %v612_v56  ;;  %v3190_v18 = vsel %vm598_vm0, %v612_v56, %v614_v46  ;;  %v1270_v25 = vrot.slane %v1268_v60, 1  ;;  %v3225_v56 = vrot.slane %v1228_v44, 1 }
  0x4a   : > { %646 = vrot.lane.b32.xlu1 %v619_v3, %s2819_s28  ;;  %v1266_v34 = vor.u32 %v1264_v17, %v3185_v16  ;;  %v436_v60 = vshrl.u32 %v2981_v5, 16  ;;  %v2635_v17 = vld [vmem:[%s2885_s26 + $0x6e4] sm:$0xff]  }
  0x4b   : > { %634 = vrot.lane.b32.xlu0 %v607_v8, %s2819_s28  ;;  %v1216_v8 = vshrl.u32 %v2945_v50, 16 }
  0x4e   : > { %807 = vrot.lane.b32.xlu1 %v3117_v10, %s2818_s27 }
  0x4f   : > { %795 = vrot.lane.b32.xlu0 %v2923_v32, %s2818_s27  ;;  %v939_v32 = vor.u32 %v937_v22, %v935_v27  ;;  %v3194_v22 = vld [vmem:[%s2885_s26 + $0x4d8] sm:$0xff]   ;;  %v1272_v27 = vshrl.u32 %v2628_v29, 16 }
  0x50   : > { %v1276_v31 = vshll.u32 %v3194_v22, 16 }
  0x51   : > { %v944_v3 = vsel %vm335_vm1, %v939_v32, %v3154_v37  ;;  %v1222_v32 = vrot.slane %v1220_v59, 1  ;;  %v388_v59 = vshrl.u32 %v2995_v9, 16  ;;  %v945_v9 = vshrl.u32 %v3122_v14, 16 }
  0x52   : > { %809 = vrot.lane.b32.xlu1 %v3138_v21, %s2818_s27  ;;  %v1224_v21 = vshrl.u32 %v2629_v1, 16  ;;  %v3221_v48 = vrot.slane %v1276_v31, 1 }
  0x53   : > { %797 = vrot.lane.b32.xlu0 %v2910_v20, %s2818_s27  ;;  %v909_v20 = vshll.u32 %v3117_v10, 16 }
  0x54   : > { %v1226_v53 = vor.u32 %v1224_v21, %v1222_v32 }
  0x55   : > { %v3196_v0 = vrot.slane %v909_v20, 1  ;;  %v3240_v20 = vld [vmem:[%s2885_s26 + $0x70] sm:$0xf] }
  0x56   : > { %993 = vrot.lane.b32.xlu1 %v936_v38, %s2822_s4  ;;  %v1218_v38 = vor.u32 %v1216_v8, %v2964_v63  ;;  %v440_v8 = vshll.u32 %v3054_v43, 16 }
  0x57   : > { %981 = vrot.lane.b32.xlu0 %v888_v40, %s2822_s4  ;;  %v915_v46 = vor.u32 %v913_v23, %v3196_v0  ;;  %v1274_v40 = vor.u32 %v1272_v27, %v1270_v25  ;;  %v392_v23 = vshll.u32 %v3068_v52, 16  ;;  %v444_v27 = vshrl.u32 %v3054_v43, 16 }
  0x58   : > { %v1223_v63 = vsel %vm335_vm1, %v1218_v38, %v1222_v32  ;;  %v620_v38 = vrot.slane %v3054_v43, 1  ;;  %v609_v43 = vsel %vm598_vm0, %v606_v57, %v608_v62  ;;  %v3316_v62 = vld [vmem:[%s2885_s26 + $0x2b4] sm:$0xff]  }
  0x59   : > { %v3211_v10 = vsel %vm335_vm1, %v915_v46, %v919_v33  ;;  %v390_v46 = vor.u32 %v388_v59, %v3043_v45  ;;  %v394_v31 = vrot.slane %v392_v23, 1 }
  0x5a   : > { %995 = vrot.lane.b32.xlu1 %v944_v3, %s2822_s4  ;;  %v2633_v3 = vld [vmem:[%s2885_s26 + $0x6dc] sm:$0xff]   ;;  %v621_v32 = vsel %vm598_vm0, %v618_v54, %v620_v38  ;;  %v3306_v54 = vld [vmem:[%s2885_s26 + $0x2ac] sm:$0xff]  }
  0x5b   : > { %983 = vrot.lane.b32.xlu0 %v896_v13, %s2822_s4  ;;  %v3249_v13 = vcombine.low %v3240_v20, %v229_v6  ;;  %v949_v57 = vshll.u32 %v3306_v54, 16 }
  0x5d   : > { %v521_v61 = vshll.u32 %v3249_v13, 16  ;;  %v622_v21 = vrot.slane %v3249_v13, 1 }
  0x5e   : > { %1152 = vrot.lane.b32.xlu1 %v2627_v36, %s2823_s5  ;;  %v3218_v36 = vsel %vm335_vm1, %v923_v35, %v3124_v15  ;;  %v1279_v15 = vsel %vm335_vm1, %v1274_v40, %v3221_v48  ;;  %v3275_v35 = vsel %vm335_vm1, %v390_v46, %v394_v31  ;;  %v1280_v46 = vshrl.u32 %v3194_v22, 16 }
  0x5f   : > { %1140 = vrot.lane.b32.xlu0 %v2945_v50, %s2823_s5  ;;  %v1271_v50 = vsel %vm335_vm1, %v1266_v34, %v1270_v25  ;;  %v442_v25 = vrot.slane %v440_v8, 1  ;;  %v623_v5 = vsel %vm598_vm0, %v620_v38, %v622_v21  ;;  %v3366_v38 = vld [vmem:[%s2885_s26 + $0x4b8] sm:$0xff]  }
  0x61   : > { %v3268_v34 = vor.u32 %v444_v27, %v442_v25  ;;  %v2645_v27 = vld [vmem:[%s2885_s26 + $0x4b0] sm:$0xff]  }
  0x62   : > { %1154 = vrot.lane.b32.xlu1 %v2628_v29, %s2823_s5  ;;  %v1231_v29 = vsel %vm335_vm1, %v1226_v53, %v3225_v56 }
  0x63   : > { %1142 = vrot.lane.b32.xlu0 %v2629_v1, %s2823_s5  ;;  %v2632_v1 = vld [vmem:[%s2885_s26 + $0x70c] sm:$0xff]  }
  0x66   : > { %1328 = vrot.lane.b32.xlu1 %v1271_v50, %s2824_s6  ;;  %v3310_v50 = vld [vmem:[%s2885_s26 + $0x27c] sm:$0xff]  }
  0x67   : > { %1316 = vrot.lane.b32.xlu0 %v1223_v63, %s2824_s6  ;;  %v897_v63 = vshrl.u32 %v3133_v19, 16  ;;  %v901_v53 = vshll.u32 %v3310_v50, 16 }
  0x6a   : > { %1330 = vrot.lane.b32.xlu1 %v1279_v15, %s2824_s6  ;;  %v947_v15 = vor.u32 %v945_v9, %v3154_v37 }
  0x6b   : > { %1318 = vrot.lane.b32.xlu0 %v1231_v29, %s2824_s6  ;;  %v951_v29 = vrot.slane %v949_v57, 1 }
  0x6e   : > { %1486 = vrot.lane.b32.xlu1 %v2632_v1, %s2825_s7  ;;  %v953_v1 = vshrl.u32 %v3306_v54, 16 }
  0x6f   : > { %1474 = vrot.lane.b32.xlu0 %v2633_v3, %s2825_s7  ;;  %v957_v3 = vshll.u32 %v3316_v62, 16 }
  0x71   : > { %v3335_v37 = vrot.slane %v957_v3, 1 }
  0x72   : > { %472 = vrot.lane.b32.xlu1 %v3034_v39, %s2821_s30  ;;  %v438_v39 = vor.u32 %v436_v60, %v3036_v41  ;;  %v3270_v41 = vrot.slane %v521_v61, 1  ;;  %v905_v60 = vshrl.u32 %v3310_v50, 16 }
  0x73   : > { %460 = vrot.lane.b32.xlu0 %v3041_v42, %s2821_s30  ;;  %v396_v42 = vshrl.u32 %v3068_v52, 16 }
  0x74   : > { %v3266_v33 = vsel %vm335_vm1, %v438_v39, %v442_v25  ;;  %v2644_v39 = vld [vmem:[%s2885_s26 + $0x4e0] sm:$0xff]  }
  0x75   : > { %v398_v45 = vor.u32 %v396_v42, %v394_v31  ;;  %v1284_v31 = vshll.u32 %v2644_v39, 16  ;;  %v3360_v42 = vld [vmem:[%s2885_s26 + $0x4e8] sm:$0xff]  }
  0x76   : > { %1488 = vrot.lane.b32.xlu1 %v2634_v2, %s2825_s7  ;;  %v903_v2 = vrot.slane %v901_v53, 1 }
  0x77   : > { %1476 = vrot.lane.b32.xlu0 %v2635_v17, %s2825_s7 }
  0x7a   : > { %474 = vrot.lane.b32.xlu1 %v3050_v47, %s2821_s30  ;;  %v524_v47 = vsel %vm335_vm1, %v3268_v34, %v3270_v41 }
  0x7b   : > { %462 = vrot.lane.b32.xlu0 %v3060_v49, %s2821_s30  ;;  %v3287_v49 = vsel %vm335_vm1, %v398_v45, %v2998_v11  ;;  %v1232_v45 = vshrl.u32 %v3201_v28, 16 }
  0x7d   : > { %v1234_v9 = vor.u32 %v1232_v45, %v3225_v56  ;;  %v2654_v45 = vld [vmem:[%s2885_s26 + $0x6f4] sm:$0xff]  }
  0x7e   : > { %561 = vrot.lane.b32.xlu1 %v3266_v33, %s2820_s29 }
  0x7f   : > { %549 = vrot.lane.b32.xlu0 %v3275_v35, %s2820_s29 }
  0x82   : > { %563 = vrot.lane.b32.xlu1 %v524_v47, %s2820_s29  ;;  %v1236_v47 = vshll.u32 %v2645_v27, 16 }
  0x83   : > { %551 = vrot.lane.b32.xlu0 %v3287_v49, %s2820_s29 }
  0x84   : > { %v1238_v57 = vrot.slane %v1236_v47, 1 }
  0x86   : > { %648 = vrot.lane.b32.xlu1 %v621_v32, %s2819_s28  ;;  %v1239_v56 = vsel %vm335_vm1, %v1234_v9, %v1238_v57 }
  0x87   : > { %636 = vrot.lane.b32.xlu0 %v609_v43, %s2819_s28  ;;  %v1282_v43 = vor.u32 %v1280_v46, %v3221_v48 }
  0x88   : > { %v794_v11 = vpop.permute.xlu1 %793  ;;  %v792_v44 = vpop.permute.xlu0 %791 }
  0x8a   : > { %650 = vrot.lane.b32.xlu1 %v623_v5, %s2819_s28  ;;  %v1292_v5 = vshll.u32 %v3360_v42, 16 }
  0x8b   : > { %638 = vrot.lane.b32.xlu0 %v3110_v7, %s2819_s28  ;;  %v899_v7 = vor.u32 %v897_v63, %v3164_v51 }
  0x8c   : > { %v631_v52 = vpop.permute.xlu1 %630  ;;  %v629_v40 = vpop.permute.xlu0 %628 }
  0x8d   : > { %v904_v17 = vsel %vm335_vm1, %v899_v7, %v903_v2 }
  0x8e   : > { %811 = vrot.lane.b32.xlu1 %v3075_v55, %s2818_s27  ;;  %v952_v55 = vsel %vm335_vm1, %v947_v15, %v951_v29  ;;  %v3381_v15 = vrot.slane %v1292_v5, 1 }
  0x8f   : > { %799 = vrot.lane.b32.xlu0 %v2916_v24, %s2818_s27  ;;  %v955_v24 = vor.u32 %v953_v1, %v951_v29 }
  0x90   : > { %v542_v6 = vpop.permute.xlu1 %541 }
  0x91   : > { %v453_v8 = vpop.permute.xlu0 %452  ;;  %v960_v23 = vsel %vm335_vm1, %v955_v24, %v3335_v37 }
  0x92   : > { %813 = vrot.lane.b32.xlu1 %v3087_v58, %s2818_s27  ;;  %495 = vst.msk [vmem:[#allocation2] sm:$0xff] %vm494_vm4, %v453_v8  ;;  %v907_v58 = vor.u32 %v905_v60, %v903_v2  ;;  %v2651_v8 = vld [vmem:[%s2885_s26 + $0x71c] sm:$0xff]  }
  0x93   : > { %584 = vst.msk [vmem:[#allocation2] sm:$0xff] %vm583_vm5, %v542_v6  ;;  %801 = vrot.lane.b32.xlu0 %v3103_v4, %s2818_s27 }
  0x94   : > { %v544_v51 = vpop.permute.xlu1 %543  ;;  %671 = vst.msk [vmem:[#allocation2] sm:$0xff] %vm670_vm6, %v629_v40  ;;  %v912_v25 = vsel %vm335_vm1, %v907_v58, %v3196_v0  ;;  %v1240_v40 = vshrl.u32 %v2645_v27, 16 }
  0x95   : > { %v455_v59 = vpop.permute.xlu0 %454  ;;  %834 = vst.msk [vmem:[#allocation2] sm:$0xff] %vm833_vm7, %v792_v44  ;;  %v1288_v44 = vshrl.u32 %v2644_v39, 16 }
  0x96   : > { %997 = vrot.lane.b32.xlu1 %v952_v55, %s2822_s4  ;;  %496 = vst.msk [vmem:[#allocation2 + $0x8] sm:$0xff] %vm494_vm4, %v455_v59  ;;  %v1242_v29 = vor.u32 %v1240_v40, %v1238_v57  ;;  %v2230_v55 = vcombine.low %v3240_v20, %v3240_v20 }
  0x97   : > { %585 = vst.msk [vmem:[#allocation2 + $0x8] sm:$0xff] %vm583_vm5, %v544_v51  ;;  %985 = vrot.lane.b32.xlu0 %v904_v17, %s2822_s4  ;;  %v2652_v51 = vld [vmem:[%s2885_s26 + $0x6ec] sm:$0xff]  }
  0x98   : > { %v980_v4 = vpop.permute.xlu1 %979  ;;  %672 = vst.msk [vmem:[#allocation2 + $0x8] sm:$0xff] %vm670_vm6, %v631_v52  ;;  %v448_v59 = vshll.u32 %v2230_v55, 16 }
  0x99   : > { %835 = vst.msk [vmem:[#allocation2 + $0x8] sm:$0xff] %vm833_vm7, %v794_v11  ;;  %v978_v61 = vpop.permute.xlu0 %977  ;;  %v1286_v11 = vrot.slane %v1284_v31, 1  ;;  %v2656_v31 = vld [vmem:[%s2885_s26 + $0x80] ss:$0 sps:$4 sm:$0x11]  }
  0x9a   : > { %999 = vrot.lane.b32.xlu1 %v960_v23, %s2822_s4  ;;  %1021 = vst.msk [vmem:[#allocation2 + $0x8] sm:$0xff] %vm1019_vm8, %v980_v4  ;;  %1020 = vst.msk [vmem:[#allocation2] sm:$0xff] %vm1019_vm8, %v978_v61  ;;  %v2655_v23 = vld [vmem:[%s2885_s26 + $0x78] sm:$0xff]   ;;  %v450_v61 = vrot.slane %v448_v59, 1  ;;  %v2660_v59 = vld [vmem:[%s2885_s26 + $0x4c0] sm:$0xff]  }
  0x9b   : > { %987 = vrot.lane.b32.xlu0 %v912_v25, %s2822_s4  ;;  %v1287_v48 = vsel %vm335_vm1, %v1282_v43, %v1286_v11  ;;  %v1290_v53 = vor.u32 %v1288_v44, %v1286_v11  ;;  %v2653_v25 = vld [vmem:[%s2885_s26 + $0x724] sm:$0xff]   ;;  %v529_v46 = vshll.u32 %v2655_v23, 16  ;;  %v533_v11 = vshrl.u32 %v2655_v23, 16 }
  0x9c   : > { %v1139_v0 = vpop.permute.xlu1 %1138  ;;  %v537_v44 = vshll.u32 %v2656_v31, 16 }
  0x9d   : > { %1180 = vst.msk [vmem:[#allocation2 + $0x8] sm:$0xff] %vm1178_vm9, %v1139_v0  ;;  %v1137_v32 = vpop.permute.xlu0 %1136  ;;  %v1295_v6 = vsel %vm335_vm1, %v1290_v53, %v3381_v15  ;;  %v531_v43 = vrot.slane %v529_v46, 1  ;;  %v626_v53 = vrot.slane %v2656_v31, 1 }
  0x9e   : > { %1156 = vrot.lane.b32.xlu1 %v3194_v22, %s2823_s5  ;;  %1179 = vst.msk [vmem:[#allocation2] sm:$0xff] %vm1178_vm9, %v1137_v32  ;;  %v1244_v22 = vshll.u32 %v3366_v38, 16  ;;  %v451_v32 = vsel %vm335_vm1, %v3268_v34, %v450_v61  ;;  %v539_v9 = vrot.slane %v537_v44, 1 }
  0x9f   : > { %1144 = vrot.lane.b32.xlu0 %v3201_v28, %s2823_s5 }
  0xa0   : > { %v1315_v52 = vpop.permute.xlu1 %1314  ;;  %v3386_v1 = vrot.slane %v1244_v22, 1  ;;  %v624_v22 = vrot.slane %v2655_v23, 1  ;;  %v1296_v23 = vshrl.u32 %v3360_v42, 16 }
  0xa1   : > { %1356 = vst.msk [vmem:[#allocation2 + $0x8] sm:$0xff] %vm1354_vm10, %v1315_v52  ;;  %v1313_v63 = vpop.permute.xlu0 %1312  ;;  %v535_v52 = vor.u32 %v533_v11, %v531_v43 }
  0xa2   : > { %1158 = vrot.lane.b32.xlu1 %v2644_v39, %s2823_s5  ;;  %1355 = vst.msk [vmem:[#allocation2] sm:$0xff] %vm1354_vm10, %v1313_v63  ;;  %v1247_v2 = vsel %vm335_vm1, %v1242_v29, %v3386_v1  ;;  %v2657_v29 = vld [vmem:[%s2885_s26 + $0x2bc] sm:$0xff]   ;;  %v1298_v61 = vor.u32 %v1296_v23, %v3381_v15 }
  0xa3   : > { %1146 = vrot.lane.b32.xlu0 %v2645_v27, %s2823_s5  ;;  %v525_v27 = vshrl.u32 %v3249_v13, 16  ;;  %v540_v40 = vsel %vm335_vm1, %v535_v52, %v539_v9 }
  0xa4   : > { %v457_v28 = vpop.permute.xlu1 %456 }
  0xa5   : > { %497 = vst.msk [vmem:[#allocation2 + $0x10] sm:$0xff] %vm494_vm4, %v457_v28  ;;  %v1471_v3 = vpop.permute.xlu0 %1470 }
  0xa6   : > { %1332 = vrot.lane.b32.xlu1 %v1287_v48, %s2824_s6  ;;  %1513 = vst.msk [vmem:[#allocation2] sm:$0xff] %vm1512_vm11, %v1471_v3  ;;  %v965_v3 = vshll.u32 %v2657_v29, 16 }
  0xa7   : > { %1320 = vrot.lane.b32.xlu0 %v1239_v56, %s2824_s6  ;;  %v627_v56 = vsel %vm598_vm0, %v624_v22, %v626_v53  ;;  %v2665_v53 = vld [vmem:[%s2885_s26 + $0x704] sm:$0xff]  }
  0xa8   : > { %v1473_v7 = vpop.permute.xlu1 %1472 }
  0xa9   : > { %1514 = vst.msk [vmem:[#allocation2 + $0x8] sm:$0xff] %vm1512_vm11, %v1473_v7  ;;  %v469_v60 = vpop.permute.xlu0 %468 }
  0xaa   : > { %1334 = vrot.lane.b32.xlu1 %v1295_v6, %s2824_s6  ;;  %503 = vst.msk [vmem:[#allocation2 + $0x40] sm:$0xff] %vm494_vm4, %v469_v60  ;;  %v2658_v6 = vld [vmem:[%s2885_s26 + $0x2c4] ss:$0 sps:$4 sm:$0x11]   ;;  %v967_v60 = vrot.slane %v965_v3, 1 }
  0xab   : > { %1322 = vrot.lane.b32.xlu0 %v1247_v2, %s2824_s6  ;;  %v973_v55 = vshll.u32 %v2658_v6, 16 }
  0xac   : > { %v471_v24 = vpop.permute.xlu1 %470 }
  0xad   : > { %504 = vst.msk [vmem:[#allocation2 + $0x48] sm:$0xff] %vm494_vm4, %v471_v24  ;;  %v459_v17 = vpop.permute.xlu0 %458  ;;  %v1527_v58 = vld [vmem:[#allocation2] sm:$0xff]  ;;  %v975_v24 = vrot.slane %v973_v55, 1 }
  0xae   : > { %1490 = vrot.lane.b32.xlu1 %v2651_v8, %s2825_s7  ;;  %498 = vst.msk [vmem:[#allocation2 + $0x18] sm:$0xff] %vm494_vm4, %v459_v17  ;;  %2508 = vmatprep.mubr.msk.bf16.mxu0 %vm1584_vm12, %v1527_v58  ;;  %v969_v8 = vshrl.u32 %v2657_v29, 16  ;;  %v2659_v17 = vld [vmem:[%s2885_s26 + $0x4f0] sm:$0xff]  }
  0xaf   : > { %1478 = vrot.lane.b32.xlu0 %v2652_v51, %s2825_s7  ;;  %v1304_v31 = vshrl.u32 %v2659_v17, 16 }
  0xb0   : > { %v558_v20 = vpop.permute.xlu1 %557  ;;  %v1528_v39 = vld [vmem:[#allocation2 + $0x8] sm:$0xff] }
  0xb1   : > { %592 = vst.msk [vmem:[#allocation2 + $0x40] sm:$0xff] %vm583_vm5, %v558_v20  ;;  %2509 = vmatmul.mubr.msk.bf16.vlgmr.msra.gmra.mrb[0].mxu0 %vm1584_vm12, %v1528_v39  ;;  %v546_v4 = vpop.permute.xlu0 %545  ;;  %v1300_v20 = vshll.u32 %v2659_v17, 16  ;;  %v2661_v39 = vld [vmem:[%s2885_s26 + $0x4f8] ss:$0 sps:$4 sm:$0x11]  }
  0xb2   : > { %476 = vrot.lane.b32.xlu1 %v3266_v33, %s2821_s30  ;;  %586 = vst.msk [vmem:[#allocation2 + $0x10] sm:$0xff] %vm583_vm5, %v546_v4  ;;  %v527_v33 = vor.u32 %v525_v27, %v3270_v41 }
  0xb3   : > { %464 = vrot.lane.b32.xlu0 %v3275_v35, %s2821_s30  ;;  %v1302_v46 = vrot.slane %v1300_v20, 1 }
  0xb4   : > { %v560_v0 = vpop.permute.xlu1 %559  ;;  %v532_v41 = vsel %vm335_vm1, %v527_v33, %v531_v43  ;;  %v1256_v33 = vshrl.u32 %v2660_v59, 16 }
  0xb5   : > { %593 = vst.msk [vmem:[#allocation2 + $0x48] sm:$0xff] %vm583_vm5, %v560_v0  ;;  %v548_v47 = vpop.permute.xlu0 %547  ;;  %v1308_v0 = vshll.u32 %v2661_v39, 16  ;;  %v1306_v15 = vor.u32 %v1304_v31, %v1302_v46 }
  0xb6   : > { %1492 = vrot.lane.b32.xlu1 %v2653_v25, %s2825_s7  ;;  %587 = vst.msk [vmem:[#allocation2 + $0x18] sm:$0xff] %vm583_vm5, %v548_v47  ;;  %v1252_v25 = vshll.u32 %v2660_v59, 16 }
  0xb7   : > { %1480 = vrot.lane.b32.xlu0 %v2654_v45, %s2825_s7  ;;  %v1310_v43 = vrot.slane %v1308_v0, 1 }
  0xb8   : > { %v645_v35 = vpop.permute.xlu1 %644  ;;  %v1254_v47 = vrot.slane %v1252_v25, 1 }
  0xb9   : > { %679 = vst.msk [vmem:[#allocation2 + $0x40] sm:$0xff] %vm670_vm6, %v645_v35  ;;  %v633_v5 = vpop.permute.xlu0 %632  ;;  %v1311_v35 = vsel %vm335_vm1, %v1306_v15, %v1310_v43 }
  0xba   : > { %478 = vrot.lane.b32.xlu1 %v451_v32, %s2821_s30  ;;  %673 = vst.msk [vmem:[#allocation2 + $0x10] sm:$0xff] %vm670_vm6, %v633_v5 }
  0xbb   : > { %466 = vrot.lane.b32.xlu0 %v3287_v49, %s2821_s30  ;;  %v625_v49 = vsel %vm598_vm0, %v622_v21, %v624_v22  ;;  %v2663_v22 = vld [vmem:[%s2885_s26 + $0x6fc] sm:$0xff]  }
  0xbc   : > { %v647_v34 = vpop.permute.xlu1 %646 }
  0xbd   : > { %680 = vst.msk [vmem:[#allocation2 + $0x48] sm:$0xff] %vm670_vm6, %v647_v34  ;;  %v635_v57 = vpop.permute.xlu0 %634 }
  0xbe   : > { %565 = vrot.lane.b32.xlu1 %v532_v41, %s2820_s29  ;;  %674 = vst.msk [vmem:[#allocation2 + $0x18] sm:$0xff] %vm670_vm6, %v635_v57  ;;  %v2662_v57 = vld [vmem:[%s2885_s26 + $0x72c] sm:$0xff]  }
  0xbf   : > { %553 = vrot.lane.b32.xlu0 %v3017_v26, %s2820_s29 }
  0xc0   : > { %v808_v63 = vpop.permute.xlu1 %807 }
  0xc1   : > { %842 = vst.msk [vmem:[#allocation2 + $0x40] sm:$0xff] %vm833_vm7, %v808_v63  ;;  %v796_v48 = vpop.permute.xlu0 %795 }
  0xc2   : > { %567 = vrot.lane.b32.xlu1 %v540_v40, %s2820_s29  ;;  %836 = vst.msk [vmem:[#allocation2 + $0x10] sm:$0xff] %vm833_vm7, %v796_v48 }
  0xc3   : > { %555 = vrot.lane.b32.xlu0 %v3022_v30, %s2820_s29  ;;  %v961_v30 = vshrl.u32 %v3316_v62, 16 }
  0xc4   : > { %v810_v28 = vpop.permute.xlu1 %809 }
  0xc5   : > { %843 = vst.msk [vmem:[#allocation2 + $0x48] sm:$0xff] %vm833_vm7, %v810_v28  ;;  %v798_v26 = vpop.permute.xlu0 %797 }
  0xc6   : > { %652 = vrot.lane.b32.xlu1 %v625_v49, %s2819_s28  ;;  %837 = vst.msk [vmem:[#allocation2 + $0x18] sm:$0xff] %vm833_vm7, %v798_v26 }
  0xc7   : > { %640 = vrot.lane.b32.xlu0 %v3180_v12, %s2819_s28  ;;  %v963_v12 = vor.u32 %v961_v30, %v3335_v37  ;;  %v971_v37 = vor.u32 %v969_v8, %v967_v60 }
  0xc8   : > { %v994_v13 = vpop.permute.xlu1 %993 }
  0xc9   : > { %1028 = vst.msk [vmem:[#allocation2 + $0x40] sm:$0xff] %vm1019_vm8, %v994_v13  ;;  %v982_v21 = vpop.permute.xlu0 %981 }
  0xca   : > { %654 = vrot.lane.b32.xlu1 %v627_v56, %s2819_s28  ;;  %1022 = vst.msk [vmem:[#allocation2 + $0x10] sm:$0xff] %vm1019_vm8, %v982_v21 }
  0xcb   : > { %642 = vrot.lane.b32.xlu0 %v3190_v18, %s2819_s28  ;;  %s2549_s28 = smul.u32 140, %s3748_s13 }
  0xcc   : > { %v996_v7 = vpop.permute.xlu1 %995 }
  0xcd   : > { %1029 = vst.msk [vmem:[#allocation2 + $0x48] sm:$0xff] %vm1019_vm8, %v996_v7  ;;  %v984_v2 = vpop.permute.xlu0 %983 }
  0xce   : > { %815 = vrot.lane.b32.xlu1 %v3122_v14, %s2818_s27  ;;  %1023 = vst.msk [vmem:[#allocation2 + $0x18] sm:$0xff] %vm1019_vm8, %v984_v2  ;;  %v968_v14 = vsel %vm335_vm1, %v963_v12, %v967_v60 }
  0xcf   : > { %803 = vrot.lane.b32.xlu0 %v3133_v19, %s2818_s27 }
  0xd0   : > { %v1153_v62 = vpop.permute.xlu1 %1152 }
  0xd1   : > { %1187 = vst.msk [vmem:[#allocation2 + $0x40] sm:$0xff] %vm1178_vm9, %v1153_v62  ;;  %v1141_v18 = vpop.permute.xlu0 %1140 }
  0xd2   : > { %817 = vrot.lane.b32.xlu1 %v3306_v54, %s2818_s27  ;;  %1181 = vst.msk [vmem:[#allocation2 + $0x10] sm:$0xff] %vm1178_vm9, %v1141_v18  ;;  %v976_v54 = vsel %vm335_vm1, %v971_v37, %v975_v24 }
  0xd3   : > { %805 = vrot.lane.b32.xlu0 %v3310_v50, %s2818_s27  ;;  %s184_s27 = smul.u32 28, %s2800_s12 }
  0xd4   : > { %v1155_v51 = vpop.permute.xlu1 %1154 }
  0xd5   : > { %1188 = vst.msk [vmem:[#allocation2 + $0x48] sm:$0xff] %vm1178_vm9, %v1155_v51  ;;  %v1143_v19 = vpop.permute.xlu0 %1142  ;;  %p187_p6 = scmp.lt.s32.totalorder %s184_s27, 139 }
  0xd6   : > { %1001 = vrot.lane.b32.xlu1 %v968_v14, %s2822_s4  ;;  %1182 = vst.msk [vmem:[#allocation2 + $0x18] sm:$0xff] %vm1178_vm9, %v1143_v19 }
  0xd7   : > { %989 = vrot.lane.b32.xlu0 %v3211_v10, %s2822_s4  ;;  %v1248_v10 = vshrl.u32 %v3366_v38, 16  ;;  %s3750_s27 = smov (!%p187_p6, %s184_s27), 139 }
  0xd8   : > { %v1329_v58 = vpop.permute.xlu1 %1328  ;;  %s190_s29 = sadd.s32 %s2549_s28, %s3750_s27 }
  0xd9   : > { %1363 = vst.msk [vmem:[#allocation2 + $0x40] sm:$0xff] %vm1354_vm10, %v1329_v58  ;;  %v1317_v50 = vpop.permute.xlu0 %1316  ;;  %v1250_v45 = vor.u32 %v1248_v10, %v3386_v1  ;;  %v1258_v1 = vor.u32 %v1256_v33, %v1254_v47  ;;  %s2214_s30 = sshll.u32 %s190_s29, 2 }
  0xda   : > { %1003 = vrot.lane.b32.xlu1 %v976_v54, %s2822_s4  ;;  %1357 = vst.msk [vmem:[#allocation2 + $0x10] sm:$0xff] %vm1354_vm10, %v1317_v50 }
  0xdb   : > { %991 = vrot.lane.b32.xlu0 %v3218_v36, %s2822_s4  ;;  %v1263_v52 = vsel %vm335_vm1, %v1258_v1, %v3185_v16  ;;  %v2664_v16 = vld [vmem:[%s2885_s26 + $0x734] sm:$0xff]  }
  0xdc   : > { %v1331_v4 = vpop.permute.xlu1 %1330 }
  0xdd   : > { %1364 = vst.msk [vmem:[#allocation2 + $0x48] sm:$0xff] %vm1354_vm10, %v1331_v4  ;;  %v1319_v27 = vpop.permute.xlu0 %1318 }
  0xde   : > { %1160 = vrot.lane.b32.xlu1 %v3360_v42, %s2823_s5  ;;  %1358 = vst.msk [vmem:[#allocation2 + $0x18] sm:$0xff] %vm1354_vm10, %v1319_v27  ;;  %v1303_v42 = vsel %vm335_vm1, %v1298_v61, %v1302_v46 }
  0xdf   : > { %1148 = vrot.lane.b32.xlu0 %v3366_v38, %s2823_s5  ;;  %v1255_v38 = vsel %vm335_vm1, %v1250_v45, %v1254_v47 }
  0xe0   : > { %v1487_v36 = vpop.permute.xlu1 %1486 }
  0xe1   : > { %1521 = vst.msk [vmem:[#allocation2 + $0x40] sm:$0xff] %vm1512_vm11, %v1487_v36  ;;  %v1475_v32 = vpop.permute.xlu0 %1474 }
  0xe2   : > { %1162 = vrot.lane.b32.xlu1 %v2659_v17, %s2823_s5  ;;  %1515 = vst.msk [vmem:[#allocation2 + $0x10] sm:$0xff] %vm1512_vm11, %v1475_v32 }
  0xe3   : > { %1150 = vrot.lane.b32.xlu0 %v2660_v59, %s2823_s5  ;;  %s3612_s5 = scalar_lea.vmem %s3736_s3, %s2214_s30 }
  0xe4   : > { %v473_v11 = vpop.permute.xlu1 %472 }
  0xe5   : > { %505 = vst.msk [vmem:[#allocation2 + $0x50] sm:$0xff] %vm494_vm4, %v473_v11  ;;  %v461_v44 = vpop.permute.xlu0 %460 }
  0xe6   : > { %1336 = vrot.lane.b32.xlu1 %v1303_v42, %s2824_s6  ;;  %499 = vst.msk [vmem:[#allocation2 + $0x20] sm:$0xff] %vm494_vm4, %v461_v44 }
  0xe7   : > { %1324 = vrot.lane.b32.xlu0 %v1255_v38, %s2824_s6 }
  0xe8   : > { %v1489_v5 = vpop.permute.xlu1 %1488  ;;  %v1535_v41 = vld [vmem:[#allocation2 + $0x40] sm:$0xff] }
  0xe9   : > { %1522 = vst.msk [vmem:[#allocation2 + $0x48] sm:$0xff] %vm1512_vm11, %v1489_v5  ;;  %2524 = vmatprep.mubr.msk.bf16.mxu1 %vm1584_vm12, %v1535_v41  ;;  %v1477_v9 = vpop.permute.xlu0 %1476  ;;  %v1529_v34 = vld [vmem:[#allocation2 + $0x10] sm:$0xff] }
  0xea   : > { %1338 = vrot.lane.b32.xlu1 %v1311_v35, %s2824_s6  ;;  %1516 = vst.msk [vmem:[#allocation2 + $0x18] sm:$0xff] %vm1512_vm11, %v1477_v9  ;;  %2512 = vmatprep.mubr.msk.bf16.mxu0 %vm1584_vm12, %v1529_v34 }
  0xeb   : > { %1326 = vrot.lane.b32.xlu0 %v1263_v52, %s2824_s6 }
  0xec   : > { %v475_v40 = vpop.permute.xlu1 %474 }
  0xed   : > { %506 = vst.msk [vmem:[#allocation2 + $0x58] sm:$0xff] %vm494_vm4, %v475_v40  ;;  %v463_v63 = vpop.permute.xlu0 %462 }
  0xee   : > { %1494 = vrot.lane.b32.xlu1 %v2662_v57, %s2825_s7  ;;  %500 = vst.msk [vmem:[#allocation2 + $0x28] sm:$0xff] %vm494_vm4, %v463_v63 }
  0xef   : > { %1482 = vrot.lane.b32.xlu0 %v2663_v22, %s2825_s7 }
  0xf0   : > { %v562_v48 = vpop.permute.xlu1 %561  ;;  %v1536_v49 = vld [vmem:[#allocation2 + $0x48] sm:$0xff] }
  0xf1   : > { %594 = vst.msk [vmem:[#allocation2 + $0x50] sm:$0xff] %vm583_vm5, %v562_v48  ;;  %2525 = vmatmul.mubr.msk.bf16.vlgmr.msra.gmra.mrb[0].mxu1 %vm1584_vm12, %v1536_v49  ;;  %v550_v28 = vpop.permute.xlu0 %549  ;;  %v1530_v26 = vld [vmem:[#allocation2 + $0x18] sm:$0xff] }
  0xf2   : > { %1496 = vrot.lane.b32.xlu1 %v2664_v16, %s2825_s7  ;;  %588 = vst.msk [vmem:[#allocation2 + $0x20] sm:$0xff] %vm583_vm5, %v550_v28  ;;  %2513 = vmatmul.mubr.msk.bf16.gmra.mrb[4].mxu0 %vm1584_vm12, %v1530_v26 }
  0xf3   : > { %1484 = vrot.lane.b32.xlu0 %v2665_v53, %s2825_s7 }
  0xf4   : > { %v564_v56 = vpop.permute.xlu1 %563 }
  0xf5   : > { %595 = vst.msk [vmem:[#allocation2 + $0x58] sm:$0xff] %vm583_vm5, %v564_v56  ;;  %v552_v29 = vpop.permute.xlu0 %551 }
  0xf6   : > { %589 = vst.msk [vmem:[#allocation2 + $0x28] sm:$0xff] %vm583_vm5, %v552_v29 }
  0xf8   : > { %v649_v13 = vpop.permute.xlu1 %648 }
  0xf9   : > { %681 = vst.msk [vmem:[#allocation2 + $0x50] sm:$0xff] %vm670_vm6, %v649_v13  ;;  %v637_v21 = vpop.permute.xlu0 %636  ;;  %v3601_v13 = vld [vmem:[%s3735_s2] ss:$0 sm:$0xff] }
  0xfa   : > { %675 = vst.msk [vmem:[#allocation2 + $0x20] sm:$0xff] %vm670_vm6, %v637_v21 }
  0xfc   : > { %v651_v30 = vpop.permute.xlu1 %650 }
  0xfd   : > { %682 = vst.msk [vmem:[#allocation2 + $0x58] sm:$0xff] %vm670_vm6, %v651_v30  ;;  %v639_v3 = vpop.permute.xlu0 %638 }
  0xfe   : > { %676 = vst.msk [vmem:[#allocation2 + $0x28] sm:$0xff] %vm670_vm6, %v639_v3 }
 0x100   : > { %v812_v6 = vpop.permute.xlu1 %811 }
 0x101   : > { %844 = vst.msk [vmem:[#allocation2 + $0x50] sm:$0xff] %vm833_vm7, %v812_v6  ;;  %v800_v7 = vpop.permute.xlu0 %799 }
 0x102   : > { %838 = vst.msk [vmem:[#allocation2 + $0x20] sm:$0xff] %vm833_vm7, %v800_v7 }
 0x104   : > { %v814_v2 = vpop.permute.xlu1 %813 }
 0x105   : > { %845 = vst.msk [vmem:[#allocation2 + $0x58] sm:$0xff] %vm833_vm7, %v814_v2  ;;  %v802_v12 = vpop.permute.xlu0 %801 }
 0x106   : > { %839 = vst.msk [vmem:[#allocation2 + $0x28] sm:$0xff] %vm833_vm7, %v802_v12 }
 0x108   : > { %v998_v60 = vpop.permute.xlu1 %997 }
 0x109   : > { %1030 = vst.msk [vmem:[#allocation2 + $0x50] sm:$0xff] %vm1019_vm8, %v998_v60  ;;  %v986_v8 = vpop.permute.xlu0 %985 }
 0x10a   : > { %1024 = vst.msk [vmem:[#allocation2 + $0x20] sm:$0xff] %vm1019_vm8, %v986_v8 }
 0x10c   : > { %v1000_v55 = vpop.permute.xlu1 %999 }
 0x10d   : > { %1031 = vst.msk [vmem:[#allocation2 + $0x58] sm:$0xff] %vm1019_vm8, %v1000_v55  ;;  %v988_v62 = vpop.permute.xlu0 %987 }
 0x10e   : > { %1025 = vst.msk [vmem:[#allocation2 + $0x28] sm:$0xff] %vm1019_vm8, %v988_v62 }
 0x110   : > { %v1157_v18 = vpop.permute.xlu1 %1156 }
 0x111   : > { %1189 = vst.msk [vmem:[#allocation2 + $0x50] sm:$0xff] %vm1178_vm9, %v1157_v18  ;;  %v1145_v14 = vpop.permute.xlu0 %1144 }
 0x112   : > { %1183 = vst.msk [vmem:[#allocation2 + $0x20] sm:$0xff] %vm1178_vm9, %v1145_v14 }
 0x114   : > { %v1159_v37 = vpop.permute.xlu1 %1158 }
 0x115   : > { %1190 = vst.msk [vmem:[#allocation2 + $0x58] sm:$0xff] %vm1178_vm9, %v1159_v37  ;;  %v1147_v24 = vpop.permute.xlu0 %1146 }
 0x116   : > { %1184 = vst.msk [vmem:[#allocation2 + $0x28] sm:$0xff] %vm1178_vm9, %v1147_v24 }
 0x118   : > { %v1333_v51 = vpop.permute.xlu1 %1332 }
 0x119   : > { %1365 = vst.msk [vmem:[#allocation2 + $0x50] sm:$0xff] %vm1354_vm10, %v1333_v51  ;;  %v1321_v19 = vpop.permute.xlu0 %1320 }
 0x11a   : > { %1359 = vst.msk [vmem:[#allocation2 + $0x20] sm:$0xff] %vm1354_vm10, %v1321_v19 }
 0x11c   : > { %v1335_v54 = vpop.permute.xlu1 %1334 }
 0x11d   : > { %1366 = vst.msk [vmem:[#allocation2 + $0x58] sm:$0xff] %vm1354_vm10, %v1335_v54  ;;  %v1323_v17 = vpop.permute.xlu0 %1322 }
 0x11e   : > { %1360 = vst.msk [vmem:[#allocation2 + $0x28] sm:$0xff] %vm1354_vm10, %v1323_v17 }
 0x120   : > { %v1491_v58 = vpop.permute.xlu1 %1490 }
 0x121   : > { %1523 = vst.msk [vmem:[#allocation2 + $0x50] sm:$0xff] %vm1512_vm11, %v1491_v58  ;;  %v1479_v59 = vpop.permute.xlu0 %1478 }
 0x122   : > { %1517 = vst.msk [vmem:[#allocation2 + $0x20] sm:$0xff] %vm1512_vm11, %v1479_v59 }
 0x124   : > { %v477_v50 = vpop.permute.xlu1 %476 }
 0x125   : > { %507 = vst.msk [vmem:[#allocation2 + $0x60] sm:$0xff] %vm494_vm4, %v477_v50  ;;  %v465_v23 = vpop.permute.xlu0 %464 }
 0x126   : > { %501 = vst.msk [vmem:[#allocation2 + $0x30] sm:$0xff] %vm494_vm4, %v465_v23 }
 0x128   : > { %v1493_v20 = vpop.permute.xlu1 %1492  ;;  %v1537_v39 = vld [vmem:[#allocation2 + $0x50] sm:$0xff] }
 0x129   : > { %1524 = vst.msk [vmem:[#allocation2 + $0x58] sm:$0xff] %vm1512_vm11, %v1493_v20  ;;  %2528 = vmatprep.mubr.msk.bf16.mxu1 %vm1584_vm12, %v1537_v39  ;;  %v1481_v4 = vpop.permute.xlu0 %1480  ;;  %v1531_v10 = vld [vmem:[#allocation2 + $0x20] sm:$0xff] }
 0x12a   : > { %1518 = vst.msk [vmem:[#allocation2 + $0x28] sm:$0xff] %vm1512_vm11, %v1481_v4  ;;  %2516 = vmatprep.mubr.msk.bf16.mxu0 %vm1584_vm12, %v1531_v10 }
 0x12c   : > { %v479_v25 = vpop.permute.xlu1 %478 }
 0x12d   : > { %508 = vst.msk [vmem:[#allocation2 + $0x68] sm:$0xff] %vm494_vm4, %v479_v25  ;;  %v467_v27 = vpop.permute.xlu0 %466 }
 0x12e   : > { %502 = vst.msk [vmem:[#allocation2 + $0x38] sm:$0xff] %vm494_vm4, %v467_v27 }
 0x130   : > { %v566_v61 = vpop.permute.xlu1 %565  ;;  %v1538_v46 = vld [vmem:[#allocation2 + $0x58] sm:$0xff] }
 0x131   : > { %596 = vst.msk [vmem:[#allocation2 + $0x60] sm:$0xff] %vm583_vm5, %v566_v61  ;;  %2529 = vmatmul.mubr.msk.bf16.gmra.mrb[4].mxu1 %vm1584_vm12, %v1538_v46  ;;  %v554_v31 = vpop.permute.xlu0 %553  ;;  %v1532_v0 = vld [vmem:[#allocation2 + $0x28] sm:$0xff] }
 0x132   : > { %590 = vst.msk [vmem:[#allocation2 + $0x30] sm:$0xff] %vm583_vm5, %v554_v31  ;;  %2517 = vmatmul.mubr.msk.bf16.gmra.mrb[8].mxu0 %vm1584_vm12, %v1532_v0 }
 0x134   : > { %v568_v36 = vpop.permute.xlu1 %567 }
 0x135   : > { %597 = vst.msk [vmem:[#allocation2 + $0x68] sm:$0xff] %vm583_vm5, %v568_v36  ;;  %v556_v45 = vpop.permute.xlu0 %555 }
 0x136   : > { %591 = vst.msk [vmem:[#allocation2 + $0x38] sm:$0xff] %vm583_vm5, %v556_v45 }
 0x138   : > { %v653_v47 = vpop.permute.xlu1 %652 }
 0x139   : > { %683 = vst.msk [vmem:[#allocation2 + $0x60] sm:$0xff] %vm670_vm6, %v653_v47  ;;  %v641_v33 = vpop.permute.xlu0 %640 }
 0x13a   : > { %677 = vst.msk [vmem:[#allocation2 + $0x30] sm:$0xff] %vm670_vm6, %v641_v33 }
 0x13c   : > { %v655_v32 = vpop.permute.xlu1 %654 }
 0x13d   : > { %684 = vst.msk [vmem:[#allocation2 + $0x68] sm:$0xff] %vm670_vm6, %v655_v32  ;;  %v643_v42 = vpop.permute.xlu0 %642 }
 0x13e   : > { %678 = vst.msk [vmem:[#allocation2 + $0x38] sm:$0xff] %vm670_vm6, %v643_v42 }
 0x140   : > { %v816_v15 = vpop.permute.xlu1 %815 }
 0x141   : > { %846 = vst.msk [vmem:[#allocation2 + $0x60] sm:$0xff] %vm833_vm7, %v816_v15  ;;  %v804_v43 = vpop.permute.xlu0 %803 }
 0x142   : > { %840 = vst.msk [vmem:[#allocation2 + $0x30] sm:$0xff] %vm833_vm7, %v804_v43 }
 0x144   : > { %v818_v11 = vpop.permute.xlu1 %817 }
 0x145   : > { %847 = vst.msk [vmem:[#allocation2 + $0x68] sm:$0xff] %vm833_vm7, %v818_v11  ;;  %v806_v38 = vpop.permute.xlu0 %805 }
 0x146   : > { %841 = vst.msk [vmem:[#allocation2 + $0x38] sm:$0xff] %vm833_vm7, %v806_v38 }
 0x148   : > { %v1002_v1 = vpop.permute.xlu1 %1001 }
 0x149   : > { %1032 = vst.msk [vmem:[#allocation2 + $0x60] sm:$0xff] %vm1019_vm8, %v1002_v1  ;;  %v990_v44 = vpop.permute.xlu0 %989 }
 0x14a   : > { %1026 = vst.msk [vmem:[#allocation2 + $0x30] sm:$0xff] %vm1019_vm8, %v990_v44 }
 0x14c   : > { %v1004_v35 = vpop.permute.xlu1 %1003 }
 0x14d   : > { %1033 = vst.msk [vmem:[#allocation2 + $0x68] sm:$0xff] %vm1019_vm8, %v1004_v35  ;;  %v992_v5 = vpop.permute.xlu0 %991 }
 0x14e   : > { %1027 = vst.msk [vmem:[#allocation2 + $0x38] sm:$0xff] %vm1019_vm8, %v992_v5 }
 0x150   : > { %v1161_v41 = vpop.permute.xlu1 %1160 }
 0x151   : > { %1191 = vst.msk [vmem:[#allocation2 + $0x60] sm:$0xff] %vm1178_vm9, %v1161_v41  ;;  %v1149_v52 = vpop.permute.xlu0 %1148 }
 0x152   : > { %1185 = vst.msk [vmem:[#allocation2 + $0x30] sm:$0xff] %vm1178_vm9, %v1149_v52 }
 0x154   : > { %v1163_v9 = vpop.permute.xlu1 %1162 }
 0x155   : > { %1192 = vst.msk [vmem:[#allocation2 + $0x68] sm:$0xff] %vm1178_vm9, %v1163_v9  ;;  %v1151_v34 = vpop.permute.xlu0 %1150 }
 0x156   : > { %1186 = vst.msk [vmem:[#allocation2 + $0x38] sm:$0xff] %vm1178_vm9, %v1151_v34 }
 0x158   : > { %v1337_v57 = vpop.permute.xlu1 %1336 }
 0x159   : > { %1367 = vst.msk [vmem:[#allocation2 + $0x60] sm:$0xff] %vm1354_vm10, %v1337_v57  ;;  %v1325_v40 = vpop.permute.xlu0 %1324 }
 0x15a   : > { %1361 = vst.msk [vmem:[#allocation2 + $0x30] sm:$0xff] %vm1354_vm10, %v1325_v40 }
 0x15c   : > { %v1339_v22 = vpop.permute.xlu1 %1338 }
 0x15d   : > { %1368 = vst.msk [vmem:[#allocation2 + $0x68] sm:$0xff] %vm1354_vm10, %v1339_v22  ;;  %v1327_v63 = vpop.permute.xlu0 %1326 }
 0x15e   : > { %1362 = vst.msk [vmem:[#allocation2 + $0x38] sm:$0xff] %vm1354_vm10, %v1327_v63 }
 0x160   : > { %v1495_v16 = vpop.permute.xlu1 %1494 }
 0x161   : > { %1525 = vst.msk [vmem:[#allocation2 + $0x60] sm:$0xff] %vm1512_vm11, %v1495_v16  ;;  %v1483_v48 = vpop.permute.xlu0 %1482 }
 0x162   : > { %1519 = vst.msk [vmem:[#allocation2 + $0x30] sm:$0xff] %vm1512_vm11, %v1483_v48 }
 0x164   : > { %v1497_v49 = vpop.permute.xlu1 %1496 }
 0x165   : > { %1526 = vst.msk [vmem:[#allocation2 + $0x68] sm:$0xff] %vm1512_vm11, %v1497_v49  ;;  %v1485_v53 = vpop.permute.xlu0 %1484 }
 0x166   : > { %1520 = vst.msk [vmem:[#allocation2 + $0x38] sm:$0xff] %vm1512_vm11, %v1485_v53 }
 0x168   : > { %v1539_v28 = vld [vmem:[#allocation2 + $0x60] sm:$0xff] }
 0x169   : > { %2532 = vmatprep.mubr.msk.bf16.mxu1 %vm1584_vm12, %v1539_v28  ;;  %v1533_v26 = vld [vmem:[#allocation2 + $0x30] sm:$0xff] }
 0x16a   : > { %2520 = vmatprep.mubr.msk.bf16.mxu0 %vm1584_vm12, %v1533_v26 }
 0x16c   : > { %v1540_v56 = vld [vmem:[#allocation2 + $0x68] sm:$0xff] }
 0x16d   : > { %2533 = vmatmul.mubr.msk.bf16.gmra.mrb[8].mxu1 %vm1584_vm12, %v1540_v56  ;;  %v1534_v29 = vld [vmem:[#allocation2 + $0x38] sm:$0xff] }
 0x16e   : > { %2521 = vmatmul.mubr.msk.bf16.gmra.mrb[12].mxu0 %vm1584_vm12, %v1534_v29 }
 0x184   : > { %v2510_v21 = vpop.f32.mrb[0].mxu0 }
 0x185   : > { %v1674_v30 = vadd.f32 %v2510_v21, %v3601_v13  ;;  %v1665_v3 = vpop.f32.mrb[1].mxu0 }
 0x186   : > { %v1666_v6 = vadd.f32 %v3601_v13, %v1665_v3  ;;  %v2511_v7 = vpop.f32.mrb[2].mxu0 }
 0x187   : > { %v2395_v2 = vmul.f32 -1.442695, %v1674_v30  ;;  %v1677_v12 = vadd.f32 %v2511_v7, %v3601_v13  ;;  %v1668_v60 = vpop.f32.mrb[3].mxu0 }
 0x188   : > { %v2393_v8 = vmul.f32 -1.442695, %v1666_v6  ;;  %v1669_v55 = vadd.f32 %v3601_v13, %v1668_v60 }
 0x189   : > { %2666 = vpow2.f32 %v2395_v2  ;;  %v2396_v62 = vmul.f32 -1.442695, %v1677_v12 }
 0x18a   : > { %2668 = vpow2.f32 %v2393_v8  ;;  %v2394_v18 = vmul.f32 -1.442695, %v1669_v55 }
 0x18b   : > { %2670 = vpow2.f32 %v2396_v62 }
 0x18c   : > { %2672 = vpow2.f32 %v2394_v18 }
 0x193   : > { %v2667_v14 = vpop.eup %2666 }
 0x194   : > { %v2669_v37 = vpop.eup %2668  ;;  %v1862_v24 = vadd.f32 1.0, %v2667_v14 }
 0x195   : > { %v2671_v51 = vpop.eup %2670  ;;  %v1860_v19 = vadd.f32 1.0, %v2669_v37 }
 0x196   : > { %v2673_v54 = vpop.eup %2672  ;;  %2674 = vrcp.f32 %v1862_v24  ;;  %v1863_v17 = vadd.f32 1.0, %v2671_v51 }
 0x197   : > { %2676 = vrcp.f32 %v1860_v19  ;;  %v1861_v58 = vadd.f32 1.0, %v2673_v54 }
 0x198   : > { %2678 = vrcp.f32 %v1863_v17 }
 0x199   : > { %2680 = vrcp.f32 %v1861_v58 }
 0x1a0   : > { %v2675_v59 = vpop.eup %2674 }
 0x1a1   : > { %v2677_v50 = vpop.eup %2676  ;;  %v1946_v23 = vmul.f32 %v2675_v59, %v1674_v30 }
 0x1a2   : > { %v2679_v20 = vpop.eup %2678  ;;  %v1944_v39 = vmul.f32 %v2677_v50, %v1666_v6 }
 0x1a3   : > { %v2681_v4 = vpop.eup %2680  ;;  %v2453_v10 = vpack.c.bf16 %v1946_v23, %v1946_v23  ;;  %v1947_v25 = vmul.f32 %v2679_v20, %v1677_v12 }
 0x1a4   : > { %v2451_v27 = vpack.c.bf16 %v1944_v39, %v1944_v39  ;;  %v1945_v61 = vmul.f32 %v2681_v4, %v1669_v55 }
 0x1a5   : > { %2087 = vst.msk [vmem:[%s3612_s5 + $0x8] sm:$0xf] %vm2084_vm13, %v2453_v10  ;;  %v2454_v46 = vpack.c.bf16 %v1947_v25, %v1947_v25 }
 0x1a6   : > { %2085 = vst.msk [vmem:[%s3612_s5] sm:$0xf] %vm2084_vm13, %v2451_v27  ;;  %v2452_v31 = vpack.c.bf16 %v1945_v61, %v1945_v61 }
 0x1a7   : > { %2088 = vst.msk [vmem:[%s3612_s5 + $0xc] sm:$0xf] %vm2084_vm13, %v2454_v46 }
 0x1a8   : > { %2086 = vst.msk [vmem:[%s3612_s5 + $0x4] sm:$0xf] %vm2084_vm13, %v2452_v31 }
 0x1c4   : > { %v2526_v0 = vpop.f32.mrb[0].mxu1 }
 0x1c5   : > { %v1738_v36 = vadd.f32 %v2526_v0, %v3601_v13  ;;  %v1729_v45 = vpop.f32.mrb[1].mxu1  ;;  %v2514_v47 = vpop.f32.mrb[4].mxu0 }
 0x1c6   : > { %v1730_v33 = vadd.f32 %v3601_v13, %v1729_v45  ;;  %v2527_v32 = vpop.f32.mrb[2].mxu1  ;;  %v1690_v42 = vadd.f32 %v2514_v47, %v3601_v13  ;;  %v1681_v43 = vpop.f32.mrb[5].mxu0 }
 0x1c7   : > { %v2411_v15 = vmul.f32 -1.442695, %v1738_v36  ;;  %v3626_v11 = vadd.f32 %v2527_v32, %v3601_v13  ;;  %v1732_v38 = vpop.f32.mrb[3].mxu1  ;;  %v1682_v1 = vadd.f32 %v3601_v13, %v1681_v43  ;;  %v2515_v35 = vpop.f32.mrb[6].mxu0 }
 0x1c8   : > { %v2409_v44 = vmul.f32 -1.442695, %v1730_v33  ;;  %v3630_v5 = vadd.f32 %v3601_v13, %v1732_v38  ;;  %v2399_v41 = vmul.f32 -1.442695, %v1690_v42  ;;  %v1693_v52 = vadd.f32 %v2515_v35, %v3601_v13  ;;  %v1684_v9 = vpop.f32.mrb[7].mxu0 }
 0x1c9   : > { %2682 = vpow2.f32 %v2411_v15  ;;  %v2397_v34 = vmul.f32 -1.442695, %v1682_v1  ;;  %v2412_v57 = vmul.f32 -1.442695, %v3626_v11  ;;  %v1685_v40 = vadd.f32 %v3601_v13, %v1684_v9 }
 0x1ca   : > { %2684 = vpow2.f32 %v2409_v44  ;;  %v2400_v22 = vmul.f32 -1.442695, %v1693_v52  ;;  %v2410_v16 = vmul.f32 -1.442695, %v3630_v5 }
 0x1cb   : > { %2686 = vpow2.f32 %v2399_v41  ;;  %v2398_v63 = vmul.f32 -1.442695, %v1685_v40 }
 0x1cc   : > { %2688 = vpow2.f32 %v2397_v34 }
 0x1cd   : > { %2690 = vpow2.f32 %v2400_v22 }
 0x1ce   : > { %2692 = vpow2.f32 %v2412_v57 }
 0x1cf   : > { %2694 = vpow2.f32 %v2398_v63 }
 0x1d0   : > { %2696 = vpow2.f32 %v2410_v16 }
 0x1d3   : > { %v2683_v48 = vpop.eup %2682 }
 0x1d4   : > { %v2685_v49 = vpop.eup %2684  ;;  %v1878_v53 = vadd.f32 1.0, %v2683_v48 }
 0x1d5   : > { %v2687_v28 = vpop.eup %2686  ;;  %v1876_v26 = vadd.f32 1.0, %v2685_v49 }
 0x1d6   : > { %v2689_v56 = vpop.eup %2688  ;;  %v1866_v29 = vadd.f32 1.0, %v2687_v28  ;;  %2698 = vrcp.f32 %v1878_v53 }
 0x1d7   : > { %v2691_v21 = vpop.eup %2690  ;;  %v1864_v30 = vadd.f32 1.0, %v2689_v56  ;;  %2700 = vrcp.f32 %v1876_v26 }
 0x1d8   : > { %v2693_v3 = vpop.eup %2692  ;;  %2702 = vrcp.f32 %v1866_v29  ;;  %v1867_v6 = vadd.f32 1.0, %v2691_v21 }
 0x1d9   : > { %v2695_v7 = vpop.eup %2694  ;;  %2704 = vrcp.f32 %v1864_v30  ;;  %v1879_v2 = vadd.f32 1.0, %v2693_v3 }
 0x1da   : > { %v2697_v12 = vpop.eup %2696  ;;  %2706 = vrcp.f32 %v1867_v6  ;;  %v1865_v60 = vadd.f32 1.0, %v2695_v7 }
 0x1db   : > { %2708 = vrcp.f32 %v1879_v2  ;;  %v1877_v8 = vadd.f32 1.0, %v2697_v12 }
 0x1dc   : > { %2710 = vrcp.f32 %v1865_v60 }
 0x1dd   : > { %2712 = vrcp.f32 %v1877_v8 }
 0x1e0   : > { %v2699_v55 = vpop.eup %2698 }
 0x1e1   : > { %v2701_v62 = vpop.eup %2700  ;;  %v1962_v18 = vmul.f32 %v2699_v55, %v1738_v36 }
 0x1e2   : > { %v2703_v14 = vpop.eup %2702  ;;  %v1960_v37 = vmul.f32 %v2701_v62, %v1730_v33 }
 0x1e3   : > { %v2705_v24 = vpop.eup %2704  ;;  %v1950_v51 = vmul.f32 %v2703_v14, %v1690_v42  ;;  %v2469_v19 = vpack.c.bf16 %v1962_v18, %v1962_v18 }
 0x1e4   : > { %v2707_v54 = vpop.eup %2706  ;;  %v1948_v17 = vmul.f32 %v2705_v24, %v1682_v1  ;;  %v2467_v58 = vpack.c.bf16 %v1960_v37, %v1960_v37 }
 0x1e5   : > { %v2709_v59 = vpop.eup %2708  ;;  %v2457_v50 = vpack.c.bf16 %v1950_v51, %v1950_v51  ;;  %2103 = vst.msk [vmem:[%s3612_s5 + $0x48] sm:$0xf] %vm2084_vm13, %v2469_v19  ;;  %v1951_v23 = vmul.f32 %v2707_v54, %v1693_v52 }
 0x1e6   : > { %v2711_v20 = vpop.eup %2710  ;;  %v2455_v39 = vpack.c.bf16 %v1948_v17, %v1948_v17  ;;  %2101 = vst.msk [vmem:[%s3612_s5 + $0x40] sm:$0xf] %vm2084_vm13, %v2467_v58  ;;  %v1963_v4 = vmul.f32 %v2709_v59, %v3626_v11 }
 0x1e7   : > { %v2713_v10 = vpop.eup %2712  ;;  %2091 = vst.msk [vmem:[%s3612_s5 + $0x18] sm:$0xf] %vm2084_vm13, %v2457_v50  ;;  %v2458_v25 = vpack.c.bf16 %v1951_v23, %v1951_v23  ;;  %v1949_v27 = vmul.f32 %v2711_v20, %v1685_v40 }
 0x1e8   : > { %2089 = vst.msk [vmem:[%s3612_s5 + $0x10] sm:$0xf] %vm2084_vm13, %v2455_v39  ;;  %v2470_v61 = vpack.c.bf16 %v1963_v4, %v1963_v4  ;;  %v1961_v46 = vmul.f32 %v2713_v10, %v3630_v5 }
 0x1e9   : > { %2092 = vst.msk [vmem:[%s3612_s5 + $0x1c] sm:$0xf] %vm2084_vm13, %v2458_v25  ;;  %v2456_v31 = vpack.c.bf16 %v1949_v27, %v1949_v27 }
 0x1ea   : > { %2104 = vst.msk [vmem:[%s3612_s5 + $0x4c] sm:$0xf] %vm2084_vm13, %v2470_v61  ;;  %v2468_v0 = vpack.c.bf16 %v1961_v46, %v1961_v46 }
 0x1eb   : > { %2090 = vst.msk [vmem:[%s3612_s5 + $0x14] sm:$0xf] %vm2084_vm13, %v2456_v31 }
 0x1ec   : > { %2102 = vst.msk [vmem:[%s3612_s5 + $0x44] sm:$0xf] %vm2084_vm13, %v2468_v0 }
 0x204   : > { %v2530_v36 = vpop.f32.mrb[4].mxu1 }
 0x205   : > { %v1754_v45 = vadd.f32 %v2530_v36, %v3601_v13  ;;  %v1745_v47 = vpop.f32.mrb[5].mxu1  ;;  %v2518_v33 = vpop.f32.mrb[8].mxu0 }
 0x206   : > { %v1746_v32 = vadd.f32 %v3601_v13, %v1745_v47  ;;  %v2531_v42 = vpop.f32.mrb[6].mxu1  ;;  %v1706_v15 = vadd.f32 %v2518_v33, %v3601_v13  ;;  %v1697_v11 = vpop.f32.mrb[9].mxu0 }
 0x207   : > { %v2415_v43 = vmul.f32 -1.442695, %v1754_v45  ;;  %v3658_v38 = vadd.f32 %v2531_v42, %v3601_v13  ;;  %v1748_v1 = vpop.f32.mrb[7].mxu1  ;;  %v1698_v44 = vadd.f32 %v3601_v13, %v1697_v11  ;;  %v2519_v5 = vpop.f32.mrb[10].mxu0 }
 0x208   : > { %v2413_v35 = vmul.f32 -1.442695, %v1746_v32  ;;  %v3662_v41 = vadd.f32 %v3601_v13, %v1748_v1  ;;  %v2403_v52 = vmul.f32 -1.442695, %v1706_v15  ;;  %v1709_v9 = vadd.f32 %v2519_v5, %v3601_v13  ;;  %v1700_v34 = vpop.f32.mrb[11].mxu0 }
 0x209   : > { %2714 = vpow2.f32 %v2415_v43  ;;  %v2401_v57 = vmul.f32 -1.442695, %v1698_v44  ;;  %v2416_v40 = vmul.f32 -1.442695, %v3658_v38  ;;  %v1701_v22 = vadd.f32 %v3601_v13, %v1700_v34 }
 0x20a   : > { %2716 = vpow2.f32 %v2413_v35  ;;  %v2404_v63 = vmul.f32 -1.442695, %v1709_v9  ;;  %v2414_v48 = vmul.f32 -1.442695, %v3662_v41 }
 0x20b   : > { %2718 = vpow2.f32 %v2403_v52  ;;  %v2402_v16 = vmul.f32 -1.442695, %v1701_v22 }
 0x20c   : > { %2720 = vpow2.f32 %v2401_v57 }
 0x20d   : > { %2722 = vpow2.f32 %v2404_v63 }
 0x20e   : > { %2724 = vpow2.f32 %v2416_v40 }
 0x20f   : > { %2726 = vpow2.f32 %v2402_v16 }
 0x210   : > { %2728 = vpow2.f32 %v2414_v48 }
 0x213   : > { %v2715_v49 = vpop.eup %2714 }
 0x214   : > { %v2717_v53 = vpop.eup %2716  ;;  %v1882_v28 = vadd.f32 1.0, %v2715_v49 }
 0x215   : > { %v2719_v26 = vpop.eup %2718  ;;  %v1880_v56 = vadd.f32 1.0, %v2717_v53 }
 0x216   : > { %v2721_v29 = vpop.eup %2720  ;;  %v1870_v21 = vadd.f32 1.0, %v2719_v26  ;;  %2730 = vrcp.f32 %v1882_v28 }
 0x217   : > { %v2723_v30 = vpop.eup %2722  ;;  %v1868_v3 = vadd.f32 1.0, %v2721_v29  ;;  %2732 = vrcp.f32 %v1880_v56 }
 0x218   : > { %v2725_v6 = vpop.eup %2724  ;;  %2734 = vrcp.f32 %v1870_v21  ;;  %v1871_v7 = vadd.f32 1.0, %v2723_v30 }
 0x219   : > { %v2727_v2 = vpop.eup %2726  ;;  %2736 = vrcp.f32 %v1868_v3  ;;  %v1883_v12 = vadd.f32 1.0, %v2725_v6 }
 0x21a   : > { %v2729_v60 = vpop.eup %2728  ;;  %2738 = vrcp.f32 %v1871_v7  ;;  %v1869_v8 = vadd.f32 1.0, %v2727_v2 }
 0x21b   : > { %2740 = vrcp.f32 %v1883_v12  ;;  %v1881_v55 = vadd.f32 1.0, %v2729_v60 }
 0x21c   : > { %2742 = vrcp.f32 %v1869_v8 }
 0x21d   : > { %2744 = vrcp.f32 %v1881_v55 }
 0x220   : > { %v2731_v62 = vpop.eup %2730 }
 0x221   : > { %v2733_v18 = vpop.eup %2732  ;;  %v1966_v14 = vmul.f32 %v2731_v62, %v1754_v45 }
 0x222   : > { %v2735_v37 = vpop.eup %2734  ;;  %v1964_v24 = vmul.f32 %v2733_v18, %v1746_v32 }
 0x223   : > { %v2737_v51 = vpop.eup %2736  ;;  %v1954_v19 = vmul.f32 %v2735_v37, %v1706_v15  ;;  %v2473_v54 = vpack.c.bf16 %v1966_v14, %v1966_v14 }
 0x224   : > { %v2739_v17 = vpop.eup %2738  ;;  %v1952_v58 = vmul.f32 %v2737_v51, %v1698_v44  ;;  %v2471_v59 = vpack.c.bf16 %v1964_v24, %v1964_v24 }
 0x225   : > { %v2741_v50 = vpop.eup %2740  ;;  %v2461_v23 = vpack.c.bf16 %v1954_v19, %v1954_v19  ;;  %2107 = vst.msk [vmem:[%s3612_s5 + $0x58] sm:$0xf] %vm2084_vm13, %v2473_v54  ;;  %v1955_v20 = vmul.f32 %v2739_v17, %v1709_v9 }
 0x226   : > { %v2743_v39 = vpop.eup %2742  ;;  %v2459_v4 = vpack.c.bf16 %v1952_v58, %v1952_v58  ;;  %2105 = vst.msk [vmem:[%s3612_s5 + $0x50] sm:$0xf] %vm2084_vm13, %v2471_v59  ;;  %v1967_v10 = vmul.f32 %v2741_v50, %v3658_v38 }
 0x227   : > { %v2745_v25 = vpop.eup %2744  ;;  %2095 = vst.msk [vmem:[%s3612_s5 + $0x28] sm:$0xf] %vm2084_vm13, %v2461_v23  ;;  %v2462_v27 = vpack.c.bf16 %v1955_v20, %v1955_v20  ;;  %v1953_v61 = vmul.f32 %v2743_v39, %v1701_v22 }
 0x228   : > { %2093 = vst.msk [vmem:[%s3612_s5 + $0x20] sm:$0xf] %vm2084_vm13, %v2459_v4  ;;  %v2474_v46 = vpack.c.bf16 %v1967_v10, %v1967_v10  ;;  %v1965_v31 = vmul.f32 %v2745_v25, %v3662_v41 }
 0x229   : > { %2096 = vst.msk [vmem:[%s3612_s5 + $0x2c] sm:$0xf] %vm2084_vm13, %v2462_v27  ;;  %v2460_v0 = vpack.c.bf16 %v1953_v61, %v1953_v61 }
 0x22a   : > { %2108 = vst.msk [vmem:[%s3612_s5 + $0x5c] sm:$0xf] %vm2084_vm13, %v2474_v46  ;;  %v2472_v36 = vpack.c.bf16 %v1965_v31, %v1965_v31 }
 0x22b   : > { %2094 = vst.msk [vmem:[%s3612_s5 + $0x24] sm:$0xf] %vm2084_vm13, %v2460_v0 }
 0x22c   : > { %2106 = vst.msk [vmem:[%s3612_s5 + $0x54] sm:$0xf] %vm2084_vm13, %v2472_v36 }
 0x240   : > { %v2534_v45 = vpop.f32.mrb[8].mxu1 }
 0x241   : > { %v1770_v47 = vadd.f32 %v2534_v45, %v3601_v13  ;;  %v1761_v33 = vpop.f32.mrb[9].mxu1  ;;  %v2522_v32 = vpop.f32.mrb[12].mxu0 }
 0x242   : > { %v1762_v42 = vadd.f32 %v3601_v13, %v1761_v33  ;;  %v2535_v15 = vpop.f32.mrb[10].mxu1  ;;  %v1722_v43 = vadd.f32 %v2522_v32, %v3601_v13  ;;  %v1713_v38 = vpop.f32.mrb[13].mxu0 }
 0x243   : > { %v2419_v11 = vmul.f32 -1.442695, %v1770_v47  ;;  %v3690_v1 = vadd.f32 %v2535_v15, %v3601_v13  ;;  %v1764_v44 = vpop.f32.mrb[11].mxu1  ;;  %v1714_v35 = vadd.f32 %v3601_v13, %v1713_v38  ;;  %v2523_v41 = vpop.f32.mrb[14].mxu0 }
 0x244   : > { %v2417_v5 = vmul.f32 -1.442695, %v1762_v42  ;;  %v3694_v52 = vadd.f32 %v3601_v13, %v1764_v44  ;;  %v2407_v9 = vmul.f32 -1.442695, %v1722_v43  ;;  %v1725_v34 = vadd.f32 %v2523_v41, %v3601_v13  ;;  %v1716_v57 = vpop.f32.mrb[15].mxu0 }
 0x245   : > { %2746 = vpow2.f32 %v2419_v11  ;;  %v2405_v40 = vmul.f32 -1.442695, %v1714_v35  ;;  %v2420_v22 = vmul.f32 -1.442695, %v3690_v1  ;;  %v1717_v63 = vadd.f32 %v3601_v13, %v1716_v57 }
 0x246   : > { %2748 = vpow2.f32 %v2417_v5  ;;  %v2408_v16 = vmul.f32 -1.442695, %v1725_v34  ;;  %v2418_v49 = vmul.f32 -1.442695, %v3694_v52 }
 0x247   : > { %2750 = vpow2.f32 %v2407_v9  ;;  %v2406_v48 = vmul.f32 -1.442695, %v1717_v63 }
 0x248   : > { %2752 = vpow2.f32 %v2405_v40 }
 0x249   : > { %2754 = vpow2.f32 %v2408_v16 }
 0x24a   : > { %2756 = vpow2.f32 %v2420_v22 }
 0x24b   : > { %2758 = vpow2.f32 %v2406_v48 }
 0x24c   : > { %2760 = vpow2.f32 %v2418_v49 }
 0x24f   : > { %v2747_v53 = vpop.eup %2746 }
 0x250   : > { %v2749_v28 = vpop.eup %2748  ;;  %v1886_v26 = vadd.f32 1.0, %v2747_v53 }
 0x251   : > { %v2751_v56 = vpop.eup %2750  ;;  %v1884_v29 = vadd.f32 1.0, %v2749_v28 }
 0x252   : > { %v2753_v21 = vpop.eup %2752  ;;  %v1874_v30 = vadd.f32 1.0, %v2751_v56  ;;  %2762 = vrcp.f32 %v1886_v26 }
 0x253   : > { %v2755_v3 = vpop.eup %2754  ;;  %v1872_v13 = vadd.f32 1.0, %v2753_v21  ;;  %2764 = vrcp.f32 %v1884_v29 }
 0x254   : > { %v2757_v6 = vpop.eup %2756  ;;  %2766 = vrcp.f32 %v1874_v30  ;;  %v1875_v7 = vadd.f32 1.0, %v2755_v3 }
 0x255   : > { %v2759_v2 = vpop.eup %2758  ;;  %2768 = vrcp.f32 %v1872_v13  ;;  %v1887_v12 = vadd.f32 1.0, %v2757_v6 }
 0x256   : > { %v2761_v60 = vpop.eup %2760  ;;  %2770 = vrcp.f32 %v1875_v7  ;;  %v1873_v8 = vadd.f32 1.0, %v2759_v2 }
 0x257   : > { %2772 = vrcp.f32 %v1887_v12  ;;  %v1885_v55 = vadd.f32 1.0, %v2761_v60 }
 0x258   : > { %2774 = vrcp.f32 %v1873_v8 }
 0x259   : > { %2776 = vrcp.f32 %v1885_v55 }
 0x25c   : > { %v2763_v62 = vpop.eup %2762 }
 0x25d   : > { %v2765_v18 = vpop.eup %2764  ;;  %v1970_v14 = vmul.f32 %v2763_v62, %v1770_v47 }
 0x25e   : > { %v2767_v37 = vpop.eup %2766  ;;  %v1968_v24 = vmul.f32 %v2765_v18, %v1762_v42 }
 0x25f   : > { %v2769_v51 = vpop.eup %2768  ;;  %v1958_v19 = vmul.f32 %v2767_v37, %v1722_v43  ;;  %v2477_v54 = vpack.c.bf16 %v1970_v14, %v1970_v14 }
 0x260   : > { %v2771_v17 = vpop.eup %2770  ;;  %v1956_v58 = vmul.f32 %v2769_v51, %v1714_v35  ;;  %v2475_v59 = vpack.c.bf16 %v1968_v24, %v1968_v24 }
 0x261   : > { %v2773_v50 = vpop.eup %2772  ;;  %v2465_v23 = vpack.c.bf16 %v1958_v19, %v1958_v19  ;;  %2111 = vst.msk [vmem:[%s3612_s5 + $0x68] sm:$0xf] %vm2084_vm13, %v2477_v54  ;;  %v1959_v20 = vmul.f32 %v2771_v17, %v1725_v34 }
 0x262   : > { %v2775_v39 = vpop.eup %2774  ;;  %v2463_v4 = vpack.c.bf16 %v1956_v58, %v1956_v58  ;;  %2109 = vst.msk [vmem:[%s3612_s5 + $0x60] sm:$0xf] %vm2084_vm13, %v2475_v59  ;;  %v1971_v10 = vmul.f32 %v2773_v50, %v3690_v1 }
 0x263   : > { %v2777_v25 = vpop.eup %2776  ;;  %2099 = vst.msk [vmem:[%s3612_s5 + $0x38] sm:$0xf] %vm2084_vm13, %v2465_v23  ;;  %v2466_v27 = vpack.c.bf16 %v1959_v20, %v1959_v20  ;;  %v1957_v61 = vmul.f32 %v2775_v39, %v1717_v63 }
 0x264   : > { %2097 = vst.msk [vmem:[%s3612_s5 + $0x30] sm:$0xf] %vm2084_vm13, %v2463_v4  ;;  %v2478_v46 = vpack.c.bf16 %v1971_v10, %v1971_v10  ;;  %v1969_v31 = vmul.f32 %v2777_v25, %v3694_v52 }
 0x265   : > { %2100 = vst.msk [vmem:[%s3612_s5 + $0x3c] sm:$0xf] %vm2084_vm13, %v2466_v27  ;;  %v2464_v0 = vpack.c.bf16 %v1957_v61, %v1957_v61 }
 0x266   : > { %2112 = vst.msk [vmem:[%s3612_s5 + $0x6c] sm:$0xf] %vm2084_vm13, %v2478_v46  ;;  %v2476_v36 = vpack.c.bf16 %v1969_v31, %v1969_v31 }
 0x267   : > { %2098 = vst.msk [vmem:[%s3612_s5 + $0x34] sm:$0xf] %vm2084_vm13, %v2464_v0 }
 0x268   : > { %2110 = vst.msk [vmem:[%s3612_s5 + $0x64] sm:$0xf] %vm2084_vm13, %v2476_v36 }
 0x269 PF: > { %s13_s16 = sadd.s32 1, %s2816_s16   ;;  %s3737_s12 = smov %s2808_s14 }
 0x26a   : > { %p10_p7 = scmp.ge.s32.totalorder %s13_s16, 12   ;;  %s3738_s13 = smov %s2812_s15 }
 0x26b   : > { %s3739_s14 = smov %s3742_s17  ;;  %s3740_s15 = smov %s3746_s18 }
 0x26c   :  { %12 = sbr.rel (!%p10_p7) target bundleno = 3 (0x3), region = 66 }

// kernel: tpu_custom_call.1
= control target key start
LH: loop header
LB: loop body
LE: loop exit
PB: predicated region body
PF: predicated region fallthrough
CT: control target
= control target key end

     0   :  { %s4650_s12 = smov 0   ;;  %s4652_s13 = smov 0   ;;  %s5524_s0 = inlined_call_operand.vmem [shape: bf16[2,4,1155,8], index: 0, kind: input, shape index: {}]   ;;  %s5525_s1 = inlined_call_operand.vmem [shape: bf16[72,16], index: 1, kind: input, shape index: {}]   ;;  %s5526_s2 = inlined_call_operand.vmem [shape: f32[1,16], index: 2, kind: input, shape index: {}]   ;;  %s5527_s3 = inlined_call_operand.vmem [shape: bf16[2,1120,16], index: 3, kind: output, shape index: {}]  }
   0x1   :  { %s4654_s14 = smov 0   ;;  %s4656_s15 = smov 0  }
   0x2   :  { %s4658_s16 = smov 0  }
   0x3 LB: > { %s22_s17 = sadd.s32 1, %s4620_s14  ;;  %s25_s18 = sadd.s32 1, %s4624_s15  ;;  %s4628_s16 = sphi %s4658_s16, %s13_s16   ;;  %s4624_s15 = sphi %s4656_s15, %s5532_s15   ;;  %s4620_s14 = sphi %s4654_s14, %s5531_s14   ;;  %s4616_s13 = sphi %s4652_s13, %s5530_s13   ;;  %s4612_s12 = sphi %s4650_s12, %s5529_s12  }
   0x4   : > { %p23_p0 = scmp.ge.s32.totalorder %s22_s17, 5  ;;  %p3357_p1 = scmp.ge.s32.totalorder %s4628_s16, 1 }
   0x5   : > { %p151_p2 = scmp.lt.s32.totalorder %s4628_s16, 11 }
   0x6   : > { %s5534_s17 = smov (%p23_p0, %s22_s17), 0  ;;  %s5536_s18 = smov (!%p23_p0, %s25_s18), %s4624_s15 }
   0x7   : > { %p152_p3 = pnand %p3357_p1, %p151_p2  ;;  %p27_p4 = scmp.ge.s32.totalorder %s5536_s18, 2 }
   0x8   : > { %vm468_vm0 = vcmask (!%p152_p3), 1043456   ;;  %v4685_v0 = vld [vmem:[%s5525_s1 + $0x4] sm:$0xf] (!%p152_p3)  ;;  %p179_p5 = scmp.lt.s32.totalorder (!%p152_p3), %s4616_s13, 1  ;;  %s195_s21 = smul.u32 (!%p152_p3), 224, %s4612_s12  ;;  %vm425_vm1 = vcmask (!%p152_p3), 64512  }
   0x9   : > { %s5538_s18 = smov (%p27_p4, %s5536_s18), 0  ;;  %155 = sbr.rel (%p152_p3) target bundleno = 525 (0x20d), region = 32 }
   0xa   : > { %4366 = vmatprep.subr.msk.bf16.mxu0 (!%p152_p3), %vm468_vm0, %v4685_v0  ;;  %v4692_v1 = vsel (!%p152_p3), %vm468_vm0, %v4685_v0, 0  ;;  %v1585_v2 = vld [vmem:[%s5525_s1 + $0x1c] sm:$0xf] (!%p152_p3)  ;;  %v234_v3 = vld [vmem:[%s5525_s1 + $0x8] sm:$0xf] (!%p152_p3)  ;;  %s196_s26 = sshra.s32 (!%p152_p3), %s195_s21, 3 }
   0xb   : > { %3987 = vmatpush3.bf16.msra.mxu0 (!%p152_p3), %v4692_v1  ;;  %4362 = vmatprep.subr.msk.bf16.mxu1 (!%p152_p3), %vm468_vm0, %v234_v3  ;;  %v470_v4 = vsel (!%p152_p3), %vm468_vm0, %v234_v3, 0  ;;  %v233_v5 = vld [vmem:[%s5525_s1] sm:$0xf] (!%p152_p3)  ;;  %s3360_s30 = sshll.u32 (!%p152_p3), %s196_s26, 2  ;;  %v4720_v7 = vld [vmem:[%s5525_s1 + $0xc] sm:$0xf] (!%p152_p3) }
   0xc   : > { %4368 = vmatprep.subr.msk.bf16.mxu0 (!%p152_p3), %vm468_vm0, %v1585_v2  ;;  %3867 = vmatpush3.bf16.msra.mxu1 (!%p152_p3), %v470_v4  ;;  %v1746_v9 = vsel (!%p152_p3), %vm468_vm0, %v1585_v2, 0  ;;  %vm308_vm2 = vsmask.f32 (!%p152_p3), 7424  ;;  %v646_v13 = vsel (!%p152_p3), %vm468_vm0, %v233_v5, 0  ;;  %v4774_v37 = vld [vmem:[%s5525_s1 + $0x18] sm:$0xf] (!%p152_p3) }
   0xd   : > { %4363 = vmatprep.subr.msk.bf16.mxu1 (!%p152_p3), %vm468_vm0, %v233_v5  ;;  %vm1012_vm3 = vcmask (!%p152_p3), 1046528   ;;  %s184_s27 = smul.u32 (!%p152_p3), 28, %s4612_s12  ;;  %vm3229_vm4 = vcmask (!%p152_p3), 125952  }
   0xf   : > { %p5323_p6 = scmp.lt.s32.totalorder (!%p152_p3), %s184_s27, 139 }
  0x10   : > { %s5540_s13 = smov (!%p179_p5, %s4616_s13), 1 }
  0x11   : > { %s4372_s29 = smul.u32 2320, %s5540_s13  ;;  %s5542_s27 = smov (!%p5323_p6, %s184_s27), 139 }
  0x13   : > { %s183_s6 = scalar_lea.vmem %s5524_s0, %s4372_s29  ;;  %s4373_s29 = smul.u32 140, %s5540_s13 }
  0x14   : > { %s4714_s7 = scalar_lea.vmem %s183_s6, %s3360_s30 }
  0x15   : > { %v4414_v6 = vld [vmem:[%s4714_s7 + $0x244] sm:$0xff]   ;;  %v4415_v8 = vld [vmem:[%s4714_s7 + $0x24c] sm:$0xff]   ;;  %v4744_v19 = vld [vmem:[%s4714_s7 + $0x254] sm:$0xff]   ;;  %s5350_s12 = sadd.s32 %s4373_s29, %s5542_s27 }
  0x16   : > { %3988 = vmatprep.mubr.msk.bf16.mxu0 %vm425_vm1, %v4414_v6  ;;  %v4727_v10 = vld [vmem:[%s4714_s7] sm:$0xff]   ;;  %v4730_v11 = vld [vmem:[%s4714_s7 + $0x8] sm:$0xff]   ;;  %v4733_v12 = vld [vmem:[%s4714_s7 + $0x10] sm:$0xff]   ;;  %v1599_v56 = vshrl.u32 %v4744_v19, 16  ;;  %v1601_v57 = vshll.u32 %v4744_v19, 16  ;;  %s3359_s13 = sshll.u32 %s5350_s12, 2 }
  0x17   : > { %3989 = vmatmul.mubr.msk.bf16.vlgmr.msra.gmra.mrb[0].mxu0 %vm425_vm1, %v4415_v8  ;;  %v310_v14 = vshrl.u32 %v4727_v10, 16  ;;  %v312_v15 = vshll.u32 %v4727_v10, 16  ;;  %v317_v16 = vshll.u32 %v4730_v11, 16  ;;  %v321_v17 = vshrl.u32 %v4730_v11, 16  ;;  %v4747_v22 = vld [vmem:[%s4714_s7 + $0x25c] sm:$0xff]   ;;  %v4761_v32 = vld [vmem:[%s4714_s7 + $0x264] sm:$0xff]   ;;  %s5375_s5 = scalar_lea.vmem %s5527_s3, %s3359_s13 }
  0x18   : > { %4017 = vmatpush3.bf16.msra.mxu0 %v1746_v9  ;;  %v325_v18 = vshll.u32 %v4733_v12, 16  ;;  %v4750_v23 = vld [vmem:[%s4714_s7 + $0x18] sm:$0xff]   ;;  %3992 = vmatprep.mubr.msk.bf16.mxu0 %vm425_vm1, %v4744_v19  ;;  %v329_v25 = vshrl.u32 %v4733_v12, 16  ;;  %v4757_v29 = vld [vmem:[%s4714_s7 + $0x20] sm:$0xff]   ;;  %v4781_v40 = vld [vmem:[%s4714_s7 + $0x28] sm:$0xff]   ;;  %v1605_v58 = vshll.u32 %v4747_v22, 16 }
  0x19   : > { %4369 = vmatprep.subr.msk.bf16.mxu0 %vm468_vm0, %v4720_v7  ;;  %v314_v20 = vrot.slane %v312_v15, 1  ;;  %v319_v21 = vrot.slane %v317_v16, 1  ;;  %v333_v28 = vshll.u32 %v4750_v23, 16  ;;  %v337_v31 = vshrl.u32 %v4750_v23, 16  ;;  %v4785_v42 = vld [vmem:[%s4714_s7 + $0x30] sm:$0xff]   ;;  %v4800_v50 = vld [vmem:[%s4714_s7 + $0x38] sm:$0xff]  }
  0x1a   : > { %v327_v24 = vrot.slane %v325_v18, 1  ;;  %v341_v36 = vshll.u32 %v4757_v29, 16  ;;  %v345_v41 = vshrl.u32 %v4757_v29, 16  ;;  %v4790_v44 = vld [vmem:[%s4714_s7 + $0x26c] sm:$0xff]   ;;  %v349_v46 = vshll.u32 %v4781_v40, 16  ;;  %v4796_v47 = vld [vmem:[%s4714_s7 + $0x274] sm:$0xff]  }
  0x1b   : > { %v315_v26 = vor.u32 %v314_v20, %v310_v14  ;;  %v323_v27 = vor.u32 %v321_v17, %v319_v21  ;;  %v335_v35 = vrot.slane %v333_v28, 1  ;;  %v357_v49 = vshll.u32 %v4785_v42, 16  ;;  %v4821_v60 = vld [vmem:[%s4714_s7 + $0x40] sm:$0xff]   ;;  %v4830_v6 = vld [vmem:[%s4714_s7 + $0x48] sm:$0xff]  }
  0x1c   : > { %v331_v30 = vor.u32 %v329_v25, %v327_v24  ;;  %v343_v39 = vrot.slane %v341_v36, 1  ;;  %v351_v48 = vrot.slane %v349_v46, 1  ;;  %v353_v52 = vshrl.u32 %v4781_v40, 16  ;;  %v4827_v3 = vld [vmem:[%s4714_s7 + $0x27c] sm:$0xff]   ;;  %v4850_v25 = vld [vmem:[%s4714_s7 + $0x50] sm:$0xff]  }
  0x1d   : > { %v320_v33 = vsel %vm308_vm2, %v315_v26, %v319_v21  ;;  %v328_v34 = vsel %vm308_vm2, %v323_v27, %v327_v24  ;;  %v339_v43 = vor.u32 %v337_v31, %v335_v35  ;;  %v361_v54 = vshrl.u32 %v4785_v42, 16 }
  0x1e   : > { %3868 = vmatprep.mubr.msk.bf16.mxu1 %vm425_vm1, %v320_v33  ;;  %v4778_v38 = vsel %vm308_vm2, %v331_v30, %v335_v35  ;;  %v347_v45 = vor.u32 %v345_v41, %v343_v39  ;;  %v365_v55 = vshll.u32 %v4800_v50, 16  ;;  %v359_v59 = vrot.slane %v357_v49, 1  ;;  %v4860_v35 = vld [vmem:[%s4714_s7 + $0x58] sm:$0xff]  }
  0x1f   : > { %3993 = vmatmul.mubr.msk.bf16.gmra.mrb[4].mxu0 %vm425_vm1, %v4747_v22  ;;  %3869 = vmatmul.mubr.msk.bf16.vlgmr.msra.gmra.mrb[0].mxu1 %vm425_vm1, %v328_v34  ;;  %v4803_v51 = vsel %vm308_vm2, %v339_v43, %v343_v39  ;;  %v355_v61 = vor.u32 %v353_v52, %v351_v48  ;;  %v1603_v62 = vrot.slane %v1601_v57, 1  ;;  %v1607_v63 = vrot.slane %v1605_v58, 1  ;;  %v4868_v43 = vld [vmem:[%s5525_s1 + $0x14] sm:$0xf]  ;;  %v4879_v52 = vld [vmem:[%s4714_s7 + $0x284] sm:$0xff]  }
  0x20   : > { %3996 = vmatprep.mubr.msk.bf16.mxu0 %vm425_vm1, %v4761_v32  ;;  %3897 = vmatpush3.bf16.msra.mxu1 %v646_v13  ;;  %v4809_v53 = vsel %vm308_vm2, %v347_v45, %v351_v48  ;;  %v1612_v2 = vshll.u32 %v4761_v32, 16  ;;  %v363_v4 = vor.u32 %v361_v54, %v359_v59  ;;  %v367_v5 = vrot.slane %v365_v55, 1  ;;  %v4888_v58 = vld [vmem:[%s4714_s7 + $0x60] sm:$0xff]  }
  0x21   : > { %3872 = vmatprep.mubr.msk.bf16.mxu1 %vm425_vm1, %v4778_v38  ;;  %4364 = vmatprep.subr.msk.bf16.mxu1 %vm468_vm0, %v4774_v37  ;;  %v1604_v8 = vor.u32 %v1603_v62, %v1599_v56  ;;  %v1609_v9 = vshrl.u32 %v4747_v22, 16  ;;  %v369_v13 = vshrl.u32 %v4800_v50, 16  ;;  %v373_v14 = vshll.u32 %v4821_v60, 16  ;;  %v4893_v62 = vld [vmem:[%s4714_s7 + $0x28c] sm:$0xff]  }
  0x22   : > { %v1616_v15 = vshrl.u32 %v4761_v32, 16  ;;  %v1619_v16 = vshll.u32 %v4790_v44, 16  ;;  %v4838_v17 = vsel %vm308_vm2, %v355_v61, %v359_v59  ;;  %v1614_v19 = vrot.slane %v1612_v2, 1 }
  0x23   : > { %v1608_v18 = vsel %vm308_vm2, %v1604_v8, %v1607_v63  ;;  %v4844_v20 = vsel %vm308_vm2, %v363_v4, %v367_v5  ;;  %v377_v21 = vshrl.u32 %v4821_v60, 16  ;;  %v381_v22 = vshll.u32 %v4830_v6, 16  ;;  %v4901_v8 = vld [vmem:[%s4714_s7 + $0x68] sm:$0xff]  }
  0x24   : > { %v1611_v24 = vor.u32 %v1609_v9, %v1607_v63  ;;  %v375_v26 = vrot.slane %v373_v14, 1  ;;  %v1618_v27 = vor.u32 %v1616_v15, %v1614_v19  ;;  %v1621_v28 = vrot.slane %v1619_v16, 1 }
  0x25   : > { %v371_v30 = vor.u32 %v369_v13, %v367_v5  ;;  %v2067_v31 = vsel %vm468_vm0, %v4720_v7, 0  ;;  %v383_v33 = vrot.slane %v381_v22, 1  ;;  %v1626_v34 = vshll.u32 %v4796_v47, 16 }
  0x26   : > { %v379_v32 = vor.u32 %v377_v21, %v375_v26  ;;  %v1615_v36 = vsel %vm308_vm2, %v1611_v24, %v1614_v19  ;;  %v389_v39 = vshll.u32 %v4850_v25, 16  ;;  %v1623_v41 = vshrl.u32 %v4790_v44, 16 }
  0x27   : > { %3997 = vmatmul.mubr.msk.bf16.gmra.mrb[8].mxu0 %vm425_vm1, %v4790_v44  ;;  %3873 = vmatmul.mubr.msk.bf16.gmra.mrb[4].mxu1 %vm425_vm1, %v4803_v51  ;;  %v385_v7 = vshrl.u32 %v4830_v6, 16  ;;  %v1622_v45 = vsel %vm308_vm2, %v1618_v27, %v1621_v28  ;;  %v1630_v46 = vshrl.u32 %v4796_v47, 16  ;;  %v1633_v48 = vshll.u32 %v4827_v3, 16 }
  0x28   : > { %4000 = vmatprep.mubr.msk.bf16.mxu0 %vm425_vm1, %v4796_v47  ;;  %3876 = vmatprep.mubr.msk.bf16.mxu1 %vm425_vm1, %v4809_v53  ;;  %v4875_v49 = vsel %vm308_vm2, %v371_v30, %v375_v26  ;;  %v393_v44 = vshrl.u32 %v4850_v25, 16  ;;  %v4883_v54 = vsel %vm308_vm2, %v379_v32, %v383_v33  ;;  %v1628_v55 = vrot.slane %v1626_v34, 1  ;;  %v4915_v26 = vld [vmem:[%s4714_s7 + $0x294] sm:$0xff]  }
  0x29   : > { %v397_v56 = vshll.u32 %v4860_v35, 16  ;;  %v391_v47 = vrot.slane %v389_v39, 1  ;;  %v1625_v57 = vor.u32 %v1623_v41, %v1621_v28  ;;  %v1635_v61 = vrot.slane %v1633_v48, 1 }
  0x2a   : > { %v1632_v59 = vor.u32 %v1630_v46, %v1628_v55  ;;  %v387_v63 = vor.u32 %v385_v7, %v383_v33  ;;  %v1640_v2 = vshll.u32 %v4879_v52, 16  ;;  %v401_v13 = vshrl.u32 %v4860_v35, 16 }
  0x2b   : > { %v395_v4 = vor.u32 %v393_v44, %v391_v47  ;;  %v399_v5 = vrot.slane %v397_v56, 1  ;;  %v1629_v9 = vsel %vm308_vm2, %v1625_v57, %v1628_v55  ;;  %v1637_v14 = vshrl.u32 %v4827_v3, 16 }
  0x2c   : > { %v405_v15 = vshll.u32 %v4888_v58, 16  ;;  %v1636_v16 = vsel %vm308_vm2, %v1632_v59, %v1635_v61  ;;  %v1644_v19 = vshrl.u32 %v4879_v52, 16  ;;  %v1647_v21 = vshll.u32 %v4893_v62, 16 }
  0x2d   : > { %v4912_v22 = vsel %vm308_vm2, %v387_v63, %v391_v47  ;;  %v1642_v24 = vrot.slane %v1640_v2, 1  ;;  %v409_v27 = vshrl.u32 %v4888_v58, 16  ;;  %v413_v28 = vshll.u32 %v4901_v8, 16 }
  0x2e   : > { %v1639_v30 = vor.u32 %v1637_v14, %v1635_v61  ;;  %v407_v32 = vrot.slane %v405_v15, 1  ;;  %v1649_v34 = vrot.slane %v1647_v21, 1  ;;  %v1654_v46 = vshll.u32 %v4915_v26, 16  ;;  %v4955_v15 = vld [vmem:[%s4714_s7 + $0x2ac] sm:$0xff]  }
  0x2f   : > { %4001 = vmatmul.mubr.msk.bf16.gmra.mrb[12].mxu0 %vm425_vm1, %v4827_v3  ;;  %3877 = vmatmul.mubr.msk.bf16.gmra.mrb[8].mxu1 %vm425_vm1, %v4838_v17  ;;  %v4919_v3 = vsel %vm308_vm2, %v395_v4, %v399_v5  ;;  %v1646_v33 = vor.u32 %v1644_v19, %v1642_v24  ;;  %v415_v7 = vrot.slane %v413_v28, 1  ;;  %v1651_v44 = vshrl.u32 %v4893_v62, 16  ;;  %v4947_v4 = vld [vmem:[%s4714_s7 + $0x2a4] sm:$0xff]  }
  0x30   : > { %4018 = vmatprep.mubr.msk.bf16.mxu0 %vm425_vm1, %v1608_v18  ;;  %3880 = vmatprep.mubr.msk.bf16.mxu1 %vm425_vm1, %v4844_v20  ;;  %v228_v18 = vld [vmem:[%s4714_s7 + $0x70] sm:$0xf]  ;;  %v411_v41 = vor.u32 %v409_v27, %v407_v32  ;;  %v1643_v48 = vsel %vm308_vm2, %v1639_v30, %v1642_v24  ;;  %v1658_v56 = vshrl.u32 %v4915_v26, 16  ;;  %v417_v59 = vshrl.u32 %v4901_v8, 16 }
  0x31   : > { %v3375_v39 = vcombine.low %v228_v18, %v228_v18  ;;  %v1650_v55 = vsel %vm308_vm2, %v1646_v33, %v1649_v34  ;;  %v1656_v2 = vrot.slane %v1654_v46, 1  ;;  %v1668_v21 = vshll.u32 %v4947_v4, 16 }
  0x32   : > { %v4944_v63 = vsel %vm308_vm2, %v411_v41, %v415_v7  ;;  %v1672_v30 = vshrl.u32 %v4947_v4, 16 }
  0x33   : > { %v421_v61 = vshll.u32 %v3375_v39, 16  ;;  %v4444_v39 = vld [vmem:[%s4714_s7 + $0x2b4] sm:$0xff]  }
  0x35   : > { %v423_v19 = vrot.slane %v421_v61, 1 }
  0x37   : > { %4019 = vmatmul.mubr.msk.bf16.vlgmr.msra.gmra.mrb[0].mxu0 %vm425_vm1, %v1615_v36  ;;  %3881 = vmatmul.mubr.msk.bf16.gmra.mrb[12].mxu1 %vm425_vm1, %v4875_v49  ;;  %v403_v36 = vor.u32 %v401_v13, %v399_v5  ;;  %v1660_v13 = vor.u32 %v1658_v56, %v1656_v2  ;;  %v1679_v56 = vshrl.u32 %v4955_v15, 16 }
  0x38   : > { %4047 = vmatpush3.bf16.msra.mxu0 %v2067_v31  ;;  %4022 = vmatprep.mubr.msk.bf16.mxu0 %vm425_vm1, %v1622_v45  ;;  %v4925_v31 = vld [vmem:[%s4714_s7 + $0x29c] sm:$0xff]   ;;  %v229_v45 = vld [vmem:[%s4714_s7 + $0x74] sm:$0xf] }
  0x39   : > { %4370 = vmatprep.subr.msk.bf16.mxu0 %vm468_vm0, %v4868_v43  ;;  %3884 = vmatprep.mubr.msk.bf16.mxu1 %vm425_vm1, %v4883_v54  ;;  %v1661_v47 = vshll.u32 %v4925_v31, 16  ;;  %v4939_v57 = vsel %vm308_vm2, %v403_v36, %v407_v32  ;;  %v4949_v5 = vcombine.low %v228_v18, %v229_v45  ;;  %v1665_v24 = vshrl.u32 %v4925_v31, 16 }
  0x3a   : > { %v1675_v32 = vshll.u32 %v4955_v15, 16  ;;  %v1670_v36 = vrot.slane %v1668_v21, 1 }
  0x3b   : > { %v1663_v14 = vrot.slane %v1661_v47, 1  ;;  %v806_v27 = vshll.u32 %v4949_v5, 16 }
  0x3c   : > { %v1674_v45 = vor.u32 %v1672_v30, %v1670_v36  ;;  %v1677_v46 = vrot.slane %v1675_v32, 1  ;;  %v4447_v30 = vld [vmem:[%s4714_s7 + $0x488] sm:$0xff]   ;;  %v4448_v32 = vld [vmem:[%s4714_s7 + $0x490] sm:$0xff]  }
  0x3d   : > { %v1664_v28 = vsel %vm308_vm2, %v1660_v13, %v1663_v14  ;;  %v1667_v41 = vor.u32 %v1665_v24, %v1663_v14 }
  0x3e   : > { %v1678_v47 = vsel %vm308_vm2, %v1674_v45, %v1677_v46  ;;  %v1681_v14 = vor.u32 %v1679_v56, %v1677_v46  ;;  %v5044_v45 = vld [vmem:[%s4714_s7 + $0x4b0] sm:$0xff]   ;;  %v5047_v46 = vld [vmem:[%s4714_s7 + $0x4b8] sm:$0xff]  }
  0x3f   : > { %4023 = vmatmul.mubr.msk.bf16.gmra.mrb[4].mxu0 %vm425_vm1, %v1629_v9  ;;  %3885 = vmatmul.mubr.msk.bf16.gmra.mrb[16].mxu1 %vm425_vm1, %v4912_v22  ;;  %v1653_v9 = vor.u32 %v1651_v44, %v1649_v34  ;;  %v4967_v34 = vrot.slane %v806_v27, 1  ;;  %v1683_v44 = vshll.u32 %v4444_v39, 16  ;;  %v5075_v56 = vld [vmem:[%s4714_s7 + $0x4d8] sm:$0xff]  }
  0x40   : > { %4026 = vmatprep.mubr.msk.bf16.mxu0 %vm425_vm1, %v1636_v16  ;;  %3888 = vmatprep.mubr.msk.bf16.mxu1 %vm425_vm1, %v4919_v3  ;;  %v419_v16 = vor.u32 %v417_v59, %v415_v7  ;;  %v1687_v59 = vshrl.u32 %v4444_v39, 16  ;;  %v5019_v39 = vld [vmem:[%s5525_s1 + $0x10] sm:$0xf] }
  0x41   : > { %v1657_v18 = vsel %vm308_vm2, %v1653_v9, %v1656_v2  ;;  %v4446_v2 = vld [vmem:[%s4714_s7 + $0x2c4] ss:$0 sps:$4 sm:$0x11]   ;;  %v836_v9 = vsel %vm468_vm0, %v4774_v37, 0  ;;  %v1685_v13 = vrot.slane %v1683_v44, 1  ;;  %v5061_v44 = vld [vmem:[%s4714_s7 + $0x4c8] sm:$0xff]  }
  0x42   : > { %v424_v33 = vsel %vm308_vm2, %v419_v16, %v423_v19  ;;  %v4974_v7 = vsel %vm308_vm2, %v419_v16, %v4967_v34 }
  0x43   : > { %v1689_v16 = vor.u32 %v1687_v59, %v1685_v13  ;;  %v1686_v37 = vsel %vm308_vm2, %v1681_v14, %v1685_v13  ;;  %v2248_v59 = vshll.u32 %v4447_v30, 16  ;;  %v2252_v13 = vshll.u32 %v4448_v32, 16  ;;  %v5103_v14 = vld [vmem:[%s4714_s7 + $0x4f0] sm:$0xff]  }
  0x47   : > { %4027 = vmatmul.mubr.msk.bf16.gmra.mrb[8].mxu0 %vm425_vm1, %v1643_v48  ;;  %3889 = vmatmul.mubr.msk.bf16.gmra.mrb[20].mxu1 %vm425_vm1, %v4939_v57  ;;  %v4445_v48 = vld [vmem:[%s4714_s7 + $0x2bc] sm:$0xff]  }
  0x48   : > { %4030 = vmatprep.mubr.msk.bf16.mxu0 %vm425_vm1, %v1650_v55  ;;  %3892 = vmatprep.mubr.msk.bf16.mxu1 %vm425_vm1, %v4944_v63  ;;  %v1671_v55 = vsel %vm308_vm2, %v1667_v41, %v1670_v36  ;;  %v1691_v61 = vshll.u32 %v4445_v48, 16  ;;  %v1695_v21 = vshrl.u32 %v4445_v48, 16  ;;  %v2391_v36 = vsel %vm468_vm0, %v4868_v43, 0  ;;  %v5030_v43 = vld [vmem:[%s4714_s7 + $0x4a0] sm:$0xff]   ;;  %v5033_v41 = vld [vmem:[%s4714_s7 + $0x4a8] sm:$0xff]  }
  0x49   : > { %v5058_v48 = vld [vmem:[%s4714_s7 + $0x4c0] sm:$0xff]  }
  0x4a   : > { %v1693_v19 = vrot.slane %v1691_v61, 1  ;;  %v5092_v61 = vld [vmem:[%s4714_s7 + $0x4e8] sm:$0xff]  }
  0x4c   : > { %v1694_v24 = vsel %vm308_vm2, %v1689_v16, %v1693_v19 }
  0x4f   : > { %4031 = vmatmul.mubr.msk.bf16.gmra.mrb[12].mxu0 %vm425_vm1, %v1657_v18  ;;  %3893 = vmatmul.mubr.msk.bf16.gmra.mrb[24].mxu1 %vm425_vm1, %v424_v33  ;;  %v1699_v18 = vshll.u32 %v4446_v2, 16  ;;  %v4449_v33 = vld [vmem:[%s4714_s7 + $0x498] sm:$0xff]   ;;  %v2246_v2 = vshrl.u32 %v4447_v30, 16 }
  0x50   : > { %4034 = vmatprep.mubr.msk.bf16.mxu0 %vm425_vm1, %v1664_v28  ;;  %3898 = vmatprep.mubr.msk.bf16.mxu1 %vm425_vm1, %v4727_v10  ;;  %v1011_v10 = vld [vmem:[%s5525_s1 + $0x20] sm:$0xf] }
  0x51   : > { %v1701_v27 = vrot.slane %v1699_v18, 1 }
  0x57   : > { %4035 = vmatmul.mubr.msk.bf16.gmra.mrb[16].mxu0 %vm425_vm1, %v1671_v55  ;;  %3899 = vmatmul.mubr.msk.bf16.vlgmr.msra.gmra.mrb[0].mxu1 %vm425_vm1, %v4730_v11  ;;  %v1697_v11 = vor.u32 %v1695_v21, %v1693_v19  ;;  %v5072_v55 = vld [vmem:[%s4714_s7 + $0x4d0] sm:$0xff]   ;;  %v2263_v19 = vshrl.u32 %v4449_v33, 16 }
  0x58   : > { %4038 = vmatprep.mubr.msk.bf16.mxu0 %vm425_vm1, %v1678_v47  ;;  %3927 = vmatpush3.bf16.msra.mxu1 %v836_v9  ;;  %v1085_v47 = vsel %vm468_vm0, %v1011_v10, 0  ;;  %v2250_v9 = vrot.slane %v2248_v59, 1  ;;  %v2284_v59 = vshrl.u32 %v5044_v45, 16 }
  0x59   : > { %3902 = vmatprep.mubr.msk.bf16.mxu1 %vm425_vm1, %v4733_v12  ;;  %4365 = vmatprep.subr.msk.bf16.mxu1 %vm468_vm0, %v1011_v10  ;;  %v1702_v28 = vsel %vm308_vm2, %v1697_v11, %v1701_v27  ;;  %v2256_v10 = vshrl.u32 %v4448_v32, 16  ;;  %v2270_v27 = vshrl.u32 %v5030_v43, 16 }
  0x5f   : > { %4039 = vmatmul.mubr.msk.bf16.gmra.mrb[20].mxu0 %vm425_vm1, %v1686_v37  ;;  %3903 = vmatmul.mubr.msk.bf16.gmra.mrb[4].mxu1 %vm425_vm1, %v4750_v23  ;;  %v2266_v37 = vshll.u32 %v5030_v43, 16 }
  0x60   : > { %4042 = vmatprep.mubr.msk.bf16.mxu0 %vm425_vm1, %v1694_v24  ;;  %3906 = vmatprep.mubr.msk.bf16.mxu1 %vm425_vm1, %v4757_v29  ;;  %v2273_v24 = vshll.u32 %v5033_v41, 16 }
  0x67   : > { %4043 = vmatmul.mubr.msk.bf16.gmra.mrb[24].mxu0 %vm425_vm1, %v1702_v28  ;;  %3907 = vmatmul.mubr.msk.bf16.gmra.mrb[8].mxu1 %vm425_vm1, %v4781_v40  ;;  %v2711_v28 = vsel %vm468_vm0, %v5019_v39, 0 }
  0x68   : > { %4048 = vmatprep.mubr.msk.bf16.mxu0 %vm425_vm1, %v4447_v30  ;;  %3910 = vmatprep.mubr.msk.bf16.mxu1 %vm425_vm1, %v4785_v42 }
  0x6f   : > { %4049 = vmatmul.mubr.msk.bf16.vlgmr.msra.gmra.mrb[0].mxu0 %vm425_vm1, %v4448_v32  ;;  %3911 = vmatmul.mubr.msk.bf16.gmra.mrb[12].mxu1 %vm425_vm1, %v4800_v50  ;;  %v2277_v32 = vshrl.u32 %v5033_v41, 16 }
  0x70   : > { %4077 = vmatpush3.bf16.msra.mxu0 %v2391_v36  ;;  %4052 = vmatprep.mubr.msk.bf16.mxu0 %vm425_vm1, %v4449_v33 }
  0x71   : > { %4371 = vmatprep.subr.msk.bf16.mxu0 %vm468_vm0, %v5019_v39  ;;  %3914 = vmatprep.mubr.msk.bf16.mxu1 %vm425_vm1, %v4821_v60  ;;  %v2287_v39 = vshll.u32 %v5047_v46, 16 }
  0x77   : > { %4053 = vmatmul.mubr.msk.bf16.gmra.mrb[4].mxu0 %vm425_vm1, %v5030_v43  ;;  %3915 = vmatmul.mubr.msk.bf16.gmra.mrb[16].mxu1 %vm425_vm1, %v4830_v6 }
  0x78   : > { %4056 = vmatprep.mubr.msk.bf16.mxu0 %vm425_vm1, %v5033_v41  ;;  %3918 = vmatprep.mubr.msk.bf16.mxu1 %vm425_vm1, %v4850_v25  ;;  %v5130_v41 = vld [vmem:[%s4714_s7 + $0x78] sm:$0xff]  }
  0x7f   : > { %4057 = vmatmul.mubr.msk.bf16.gmra.mrb[8].mxu0 %vm425_vm1, %v5044_v45  ;;  %3919 = vmatmul.mubr.msk.bf16.gmra.mrb[20].mxu1 %vm425_vm1, %v4860_v35 }
  0x80   : > { %4060 = vmatprep.mubr.msk.bf16.mxu0 %vm425_vm1, %v5047_v46  ;;  %3922 = vmatprep.mubr.msk.bf16.mxu1 %vm425_vm1, %v4888_v58 }
  0x87   : > { %4061 = vmatmul.mubr.msk.bf16.gmra.mrb[12].mxu0 %vm425_vm1, %v5058_v48  ;;  %3923 = vmatmul.mubr.msk.bf16.gmra.mrb[24].mxu1 %vm425_vm1, %v4901_v8 }
  0x88   : > { %4064 = vmatprep.mubr.msk.bf16.mxu0 %vm425_vm1, %v5061_v44  ;;  %3928 = vmatprep.mubr.msk.bf16.mxu1 %vm425_vm1, %v4778_v38  ;;  %v5087_v38 = vld [vmem:[%s4714_s7 + $0x4e0] sm:$0xff]  }
  0x8f   : > { %4065 = vmatmul.mubr.msk.bf16.gmra.mrb[16].mxu0 %vm425_vm1, %v5072_v55  ;;  %3929 = vmatmul.mubr.msk.bf16.vlgmr.msra.gmra.mrb[0].mxu1 %vm425_vm1, %v4803_v51  ;;  %v2251_v51 = vor.u32 %v2250_v9, %v2246_v2  ;;  %v2291_v9 = vshrl.u32 %v5047_v46, 16  ;;  %v5146_v46 = vld [vmem:[%s4714_s7 + $0x80] ss:$0 sps:$4 sm:$0x11]  }
  0x90   : > { %4068 = vmatprep.mubr.msk.bf16.mxu0 %vm425_vm1, %v5075_v56  ;;  %3957 = vmatpush3.bf16.msra.mxu1 %v1085_v47 }
  0x91   : > { %3932 = vmatprep.mubr.msk.bf16.mxu1 %vm425_vm1, %v4809_v53  ;;  %4367 = vmatprep.subr.msk.bf16.mxu1 %vm468_vm0, %v4685_v0  ;;  %v2254_v53 = vrot.slane %v2252_v13, 1  ;;  %v2259_v0 = vshll.u32 %v4449_v33, 16  ;;  %v2275_v33 = vrot.slane %v2273_v24, 1  ;;  %v2289_v13 = vrot.slane %v2287_v39, 1 }
  0x93   : > { %v2255_v16 = vsel %vm308_vm2, %v2251_v51, %v2254_v53  ;;  %v2261_v21 = vrot.slane %v2259_v0, 1  ;;  %v2258_v18 = vor.u32 %v2256_v10, %v2254_v53  ;;  %v2279_v36 = vor.u32 %v2277_v32, %v2275_v33 }
  0x94   : > { %v814_v51 = vshll.u32 %v5130_v41, 16  ;;  %v1014_v32 = vrot.slane %v4750_v23, 1 }
  0x95   : > { %v2262_v11 = vsel %vm308_vm2, %v2258_v18, %v2261_v21 }
  0x97   : > { %4069 = vmatmul.mubr.msk.bf16.gmra.mrb[20].mxu0 %vm425_vm1, %v5087_v38  ;;  %3933 = vmatmul.mubr.msk.bf16.gmra.mrb[4].mxu1 %vm425_vm1, %v4838_v17  ;;  %v2265_v17 = vor.u32 %v2263_v19, %v2261_v21  ;;  %v2301_v19 = vshll.u32 %v5061_v44, 16  ;;  %v2298_v21 = vshrl.u32 %v5058_v48, 16 }
  0x98   : > { %4072 = vmatprep.mubr.msk.bf16.mxu0 %vm425_vm1, %v5092_v61  ;;  %3936 = vmatprep.mubr.msk.bf16.mxu1 %vm425_vm1, %v4844_v20  ;;  %v2268_v20 = vrot.slane %v2266_v37, 1 }
  0x99   : > { %v2303_v24 = vrot.slane %v2301_v19, 1  ;;  %v1022_v19 = vrot.slane %v4800_v50, 1  ;;  %v1024_v50 = vrot.slane %v4821_v60, 1  ;;  %v1028_v60 = vrot.slane %v4850_v25, 1 }
  0x9a   : > { %v2269_v30 = vsel %vm308_vm2, %v2265_v17, %v2268_v20  ;;  %v2308_v17 = vshll.u32 %v5072_v55, 16  ;;  %v1032_v25 = vrot.slane %v4888_v58, 1  ;;  %v1036_v58 = vrot.slane %v4949_v5, 1 }
  0x9f   : > { %4073 = vmatmul.mubr.msk.bf16.gmra.mrb[24].mxu0 %vm425_vm1, %v5103_v14  ;;  %3937 = vmatmul.mubr.msk.bf16.gmra.mrb[8].mxu1 %vm425_vm1, %v4875_v49  ;;  %v2280_v49 = vshll.u32 %v5044_v45, 16  ;;  %v2293_v45 = vor.u32 %v2291_v9, %v2289_v13  ;;  %v2329_v9 = vshll.u32 %v5092_v61, 16 }
  0xa0   : > { %4078 = vmatprep.mubr.msk.bf16.mxu0 %vm425_vm1, %v2255_v16  ;;  %3940 = vmatprep.mubr.msk.bf16.mxu1 %vm425_vm1, %v4883_v54  ;;  %v2272_v54 = vor.u32 %v2270_v27, %v2268_v20  ;;  %v816_v16 = vrot.slane %v814_v51, 1  ;;  %v818_v20 = vshrl.u32 %v5130_v41, 16  ;;  %v2310_v27 = vrot.slane %v2308_v17, 1 }
  0xa1   : > { %v2282_v43 = vrot.slane %v2280_v49, 1  ;;  %v2315_v49 = vshll.u32 %v5075_v56, 16  ;;  %v2333_v51 = vshrl.u32 %v5092_v61, 16  ;;  %v1020_v61 = vrot.slane %v4785_v42, 1 }
  0xa2   : > { %v2276_v47 = vsel %vm308_vm2, %v2272_v54, %v2275_v33  ;;  %v2312_v54 = vshrl.u32 %v5072_v55, 16 }
  0xa3   : > { %v2283_v2 = vsel %vm308_vm2, %v2279_v36, %v2282_v43  ;;  %v2286_v53 = vor.u32 %v2284_v59, %v2282_v43  ;;  %v2322_v43 = vshll.u32 %v5087_v38, 16  ;;  %v2317_v23 = vrot.slane %v2315_v49, 1 }
  0xa5   : > { %v2290_v37 = vsel %vm308_vm2, %v2286_v53, %v2289_v13  ;;  %v2324_v55 = vrot.slane %v2322_v43, 1  ;;  %v2326_v13 = vshrl.u32 %v5087_v38, 16  ;;  %v2336_v53 = vshll.u32 %v5103_v14, 16 }
  0xa7   : > { %4079 = vmatmul.mubr.msk.bf16.vlgmr.msra.gmra.mrb[0].mxu0 %vm425_vm1, %v2262_v11  ;;  %3941 = vmatmul.mubr.msk.bf16.gmra.mrb[12].mxu1 %vm425_vm1, %v4912_v22  ;;  %v2294_v22 = vshll.u32 %v5058_v48, 16 }
  0xa8   : > { %4107 = vmatpush3.bf16.msra.mxu0 %v2711_v28  ;;  %4082 = vmatprep.mubr.msk.bf16.mxu0 %vm425_vm1, %v2269_v30  ;;  %v1013_v30 = vrot.slane %v4733_v12, 1 }
  0xa9   : > { %3944 = vmatprep.mubr.msk.bf16.mxu1 %vm425_vm1, %v4919_v3  ;;  %v810_v3 = vshrl.u32 %v4949_v5, 16  ;;  %v2296_v0 = vrot.slane %v2294_v22, 1  ;;  %v1040_v5 = vrot.slane %v5146_v46, 1 }
  0xaa   : > { %v1015_v12 = vsel %vm1012_vm3, %v1013_v30, %v1014_v32  ;;  %v4467_v30 = vld [vmem:[%s4714_s7 + $0x6e4] sm:$0xff]  }
  0xab   : > { %v812_v10 = vor.u32 %v810_v3, %v4967_v34  ;;  %v2297_v18 = vsel %vm308_vm2, %v2293_v45, %v2296_v0  ;;  %v2300_v11 = vor.u32 %v2298_v21, %v2296_v0  ;;  %v2331_v0 = vrot.slane %v2329_v9, 1 }
  0xac   : > { %v2340_v21 = vshrl.u32 %v5103_v14, 16  ;;  %v1026_v14 = vrot.slane %v4830_v6, 1  ;;  %v4465_v6 = vld [vmem:[%s4714_s7 + $0x6d4] sm:$0xff]  }
  0xad   : > { %v817_v34 = vsel %vm308_vm2, %v812_v10, %v816_v16  ;;  %v2304_v33 = vsel %vm308_vm2, %v2300_v11, %v2303_v24  ;;  %v4463_v10 = vld [vmem:[%s4714_s7 + $0x4f8] ss:$0 sps:$4 sm:$0x11]   ;;  %v2335_v38 = vor.u32 %v2333_v51, %v2331_v0 }
  0xae   : > { %v1027_v11 = vsel %vm1012_vm3, %v1024_v50, %v1026_v14 }
  0xaf   : > { %4083 = vmatmul.mubr.msk.bf16.gmra.mrb[4].mxu0 %vm425_vm1, %v2276_v47  ;;  %3945 = vmatmul.mubr.msk.bf16.gmra.mrb[16].mxu1 %vm425_vm1, %v4939_v57  ;;  %v2305_v57 = vshrl.u32 %v5061_v44, 16  ;;  %v820_v44 = vor.u32 %v818_v20, %v816_v16  ;;  %v2314_v47 = vor.u32 %v2312_v54, %v2310_v27  ;;  %v2338_v16 = vrot.slane %v2336_v53, 1  ;;  %v4469_v54 = vld [vmem:[%s4714_s7 + $0x6f4] sm:$0xff]  }
  0xb0   : > { %4086 = vmatprep.mubr.msk.bf16.mxu0 %vm425_vm1, %v2283_v2  ;;  %3948 = vmatprep.mubr.msk.bf16.mxu1 %vm425_vm1, %v4944_v63  ;;  %v822_v63 = vshll.u32 %v5146_v46, 16  ;;  %v1018_v2 = vrot.slane %v4781_v40, 1  ;;  %v2328_v40 = vor.u32 %v2326_v13, %v2324_v55  ;;  %v4475_v46 = vld [vmem:[%s4714_s7 + $0x724] sm:$0xff]  }
  0xb1   : > { %v2307_v48 = vor.u32 %v2305_v57, %v2303_v24  ;;  %v2318_v22 = vsel %vm308_vm2, %v2314_v47, %v2317_v23  ;;  %v2339_v57 = vsel %vm308_vm2, %v2335_v38, %v2338_v16  ;;  %v2342_v42 = vor.u32 %v2340_v21, %v2338_v16  ;;  %v4474_v47 = vld [vmem:[%s4714_s7 + $0x71c] sm:$0xff]  }
  0xb2   : > { %v824_v28 = vrot.slane %v822_v63, 1  ;;  %v1021_v17 = vsel %vm1012_vm3, %v1018_v2, %v1020_v61  ;;  %v1025_v24 = vsel %vm1012_vm3, %v1022_v19, %v1024_v50 }
  0xb3   : > { %v2311_v36 = vsel %vm308_vm2, %v2307_v48, %v2310_v27  ;;  %v1030_v48 = vrot.slane %v4860_v35, 1  ;;  %v4466_v27 = vld [vmem:[%s4714_s7 + $0x6dc] sm:$0xff]   ;;  %v1034_v35 = vrot.slane %v4901_v8, 1  ;;  %v1038_v8 = vrot.slane %v5130_v41, 1  ;;  %v4471_v41 = vld [vmem:[%s4714_s7 + $0x704] sm:$0xff]  }
  0xb4   : > { %v825_v39 = vsel %vm308_vm2, %v820_v44, %v824_v28  ;;  %v1029_v44 = vsel %vm1012_vm3, %v1026_v14, %v1028_v60 }
  0xb5   : > { %v1031_v28 = vsel %vm1012_vm3, %v1028_v60, %v1030_v48  ;;  %v1033_v49 = vsel %vm1012_vm3, %v1030_v48, %v1032_v25  ;;  %v1039_v43 = vsel %vm1012_vm3, %v1036_v58, %v1038_v8 }
  0xb7   : > { %4087 = vmatmul.mubr.msk.bf16.gmra.mrb[8].mxu0 %vm425_vm1, %v2290_v37  ;;  %3949 = vmatmul.mubr.msk.bf16.gmra.mrb[20].mxu1 %vm425_vm1, %v4974_v7  ;;  %v2319_v7 = vshrl.u32 %v5075_v56, 16  ;;  %v1016_v56 = vrot.slane %v4757_v29, 1  ;;  %v2332_v37 = vsel %vm308_vm2, %v2328_v40, %v2331_v0 }
  0xb8   : > { %4090 = vmatprep.mubr.msk.bf16.mxu0 %vm425_vm1, %v2297_v18  ;;  %3952 = vmatprep.mubr.msk.bf16.mxu1 %vm425_vm1, %v817_v34  ;;  %v2344_v18 = vshll.u32 %v4463_v10, 16  ;;  %v4464_v34 = vld [vmem:[%s4714_s7 + $0x6cc] sm:$0xff]  }
  0xb9   : > { %v2321_v59 = vor.u32 %v2319_v7, %v2317_v23  ;;  %v1017_v45 = vsel %vm1012_vm3, %v1014_v32, %v1016_v56  ;;  %v1019_v29 = vsel %vm1012_vm3, %v1016_v56, %v1018_v2  ;;  %v4468_v32 = vld [vmem:[%s4714_s7 + $0x6ec] sm:$0xff]   ;;  %v1037_v7 = vsel %vm1012_vm3, %v1034_v35, %v1036_v58  ;;  %v4473_v23 = vld [vmem:[%s4714_s7 + $0x714] sm:$0xff]  }
  0xba   : > { %v2346_v20 = vrot.slane %v2344_v18, 1 }
  0xbb   : > { %v2325_v3 = vsel %vm308_vm2, %v2321_v59, %v2324_v55  ;;  %v4476_v59 = vld [vmem:[%s4714_s7 + $0x72c] sm:$0xff]  }
  0xbc   : > { %v2347_v63 = vsel %vm308_vm2, %v2342_v42, %v2346_v20 }
  0xbf   : > { %4091 = vmatmul.mubr.msk.bf16.gmra.mrb[12].mxu0 %vm425_vm1, %v2304_v33  ;;  %3953 = vmatmul.mubr.msk.bf16.gmra.mrb[24].mxu1 %vm425_vm1, %v825_v39  ;;  %v1035_v33 = vsel %vm1012_vm3, %v1032_v25, %v1034_v35  ;;  %v4472_v39 = vld [vmem:[%s4714_s7 + $0x70c] sm:$0xff]  }
  0xc0   : > { %4094 = vmatprep.mubr.msk.bf16.mxu0 %vm425_vm1, %v2311_v36  ;;  %3958 = vmatprep.mubr.msk.bf16.mxu1 %vm425_vm1, %v1015_v12  ;;  %v4470_v36 = vld [vmem:[%s4714_s7 + $0x6fc] sm:$0xff]   ;;  %v1041_v12 = vsel %vm1012_vm3, %v1038_v8, %v1040_v5 }
  0xc7   : > { %4095 = vmatmul.mubr.msk.bf16.gmra.mrb[16].mxu0 %vm425_vm1, %v2318_v22  ;;  %3959 = vmatmul.mubr.msk.bf16.vlgmr.msra.gmra.mrb[0].mxu1 %vm425_vm1, %v1017_v45  ;;  %v5278_v45 = vld [vmem:[%s5526_s2] ss:$0 sm:$0xff] }
  0xc8   : > { %4098 = vmatprep.mubr.msk.bf16.mxu0 %vm425_vm1, %v2325_v3  ;;  %4137 = vmatpush3.bf16.msra.mxu1 %v4692_v1  ;;  %v1023_v1 = vsel %vm1012_vm3, %v1020_v61, %v1022_v19 }
  0xc9   : > { %3962 = vmatprep.mubr.msk.bf16.mxu1 %vm425_vm1, %v1019_v29 }
  0xcf   : > { %4099 = vmatmul.mubr.msk.bf16.gmra.mrb[20].mxu0 %vm425_vm1, %v2332_v37  ;;  %3963 = vmatmul.mubr.msk.bf16.gmra.mrb[4].mxu1 %vm425_vm1, %v1021_v17 }
  0xd0   : > { %4102 = vmatprep.mubr.msk.bf16.mxu0 %vm425_vm1, %v2339_v57  ;;  %3966 = vmatprep.mubr.msk.bf16.mxu1 %vm425_vm1, %v1023_v1 }
  0xd7   : > { %4103 = vmatmul.mubr.msk.bf16.gmra.mrb[24].mxu0 %vm425_vm1, %v2347_v63  ;;  %3967 = vmatmul.mubr.msk.bf16.gmra.mrb[8].mxu1 %vm425_vm1, %v1025_v24 }
  0xd8   : > { %4108 = vmatprep.mubr.msk.bf16.mxu0 %vm425_vm1, %v4464_v34  ;;  %3970 = vmatprep.mubr.msk.bf16.mxu1 %vm425_vm1, %v1027_v11 }
  0xdf   : > { %4109 = vmatmul.mubr.msk.bf16.vlgmr.msra.gmra.mrb[0].mxu0 %vm425_vm1, %v4465_v6  ;;  %3971 = vmatmul.mubr.msk.bf16.gmra.mrb[12].mxu1 %vm425_vm1, %v1029_v44 }
  0xe0   : > { %4112 = vmatprep.mubr.msk.bf16.mxu0 %vm425_vm1, %v4466_v27  ;;  %3974 = vmatprep.mubr.msk.bf16.mxu1 %vm425_vm1, %v1031_v28 }
  0xe7   : > { %4113 = vmatmul.mubr.msk.bf16.gmra.mrb[4].mxu0 %vm425_vm1, %v4467_v30  ;;  %3975 = vmatmul.mubr.msk.bf16.gmra.mrb[16].mxu1 %vm425_vm1, %v1033_v49 }
  0xe8   : > { %4116 = vmatprep.mubr.msk.bf16.mxu0 %vm425_vm1, %v4468_v32  ;;  %3978 = vmatprep.mubr.msk.bf16.mxu1 %vm425_vm1, %v1035_v33 }
  0xef   : > { %4117 = vmatmul.mubr.msk.bf16.gmra.mrb[8].mxu0 %vm425_vm1, %v4469_v54  ;;  %3979 = vmatmul.mubr.msk.bf16.gmra.mrb[20].mxu1 %vm425_vm1, %v1037_v7 }
  0xf0   : > { %4120 = vmatprep.mubr.msk.bf16.mxu0 %vm425_vm1, %v4470_v36  ;;  %3982 = vmatprep.mubr.msk.bf16.mxu1 %vm425_vm1, %v1039_v43 }
  0xf7   : > { %4121 = vmatmul.mubr.msk.bf16.gmra.mrb[12].mxu0 %vm425_vm1, %v4471_v41  ;;  %3983 = vmatmul.mubr.msk.bf16.gmra.mrb[24].mxu1 %vm425_vm1, %v1041_v12 }
  0xf8   : > { %4124 = vmatprep.mubr.msk.bf16.mxu0 %vm425_vm1, %v4472_v39  ;;  %4004 = vmatprep.mubr.msk.bf16.mxu1 %vm425_vm1, %v4879_v52  ;;  %v4477_v52 = vld [vmem:[%s4714_s7 + $0x734] sm:$0xff]  }
  0xff   : > { %4125 = vmatmul.mubr.msk.bf16.gmra.mrb[16].mxu0 %vm425_vm1, %v4473_v23  ;;  %4005 = vmatmul.mubr.msk.bf16.vlgmr.msra.gmra.mrb[16].mxu1 %vm425_vm1, %v4893_v62 }
 0x100   : > { %4128 = vmatprep.mubr.msk.bf16.mxu0 %vm425_vm1, %v4474_v47  ;;  %4008 = vmatprep.mubr.msk.bf16.mxu1 %vm425_vm1, %v4915_v26 }
 0x107   : > { %4129 = vmatmul.mubr.msk.bf16.gmra.mrb[20].mxu0 %vm425_vm1, %v4475_v46  ;;  %4009 = vmatmul.mubr.msk.bf16.gmra.mrb[20].mxu1 %vm425_vm1, %v4925_v31 }
 0x108   : > { %4132 = vmatprep.mubr.msk.bf16.mxu0 %vm425_vm1, %v4476_v59  ;;  %4012 = vmatprep.mubr.msk.bf16.mxu1 %vm425_vm1, %v4947_v4 }
 0x10f   : > { %4133 = vmatmul.mubr.msk.bf16.gmra.mrb[24].mxu0 %vm425_vm1, %v4477_v52  ;;  %4013 = vmatmul.mubr.msk.bf16.gmra.mrb[24].mxu1 %vm425_vm1, %v4955_v15 }
 0x19a   : > { %v3960_v62 = vpop.f32.mrb[0].mxu1 }
 0x19b   : > { %v1121_v26 = vpop.f32.mrb[1].mxu1 }
 0x19c   : > { %v3961_v55 = vpop.f32.mrb[2].mxu1 }
 0x19d   : > { %v1124_v56 = vpop.f32.mrb[3].mxu1 }
 0x1a2   : > { %v3964_v2 = vpop.f32.mrb[4].mxu1 }
 0x1a3   : > { %v1137_v9 = vpop.f32.mrb[5].mxu1 }
 0x1a4   : > { %v3965_v22 = vpop.f32.mrb[6].mxu1 }
 0x1a5   : > { %v1140_v13 = vpop.f32.mrb[7].mxu1 }
 0x1aa   : > { %v3968_v3 = vpop.f32.mrb[8].mxu1 }
 0x1ab   : > { %v1153_v51 = vpop.f32.mrb[9].mxu1 }
 0x1ac   : > { %v3969_v31 = vpop.f32.mrb[10].mxu1 }
 0x1ad   : > { %v5273_v53 = vpop.f32.mrb[11].mxu1 }
 0x1b2   : > { %v4110_v4 = vpop.f32.mrb[0].mxu0  ;;  %v5280_v0 = vpop.f32.mrb[12].mxu1 }
 0x1b3   : > { %v4138_v15 = vadd.f32 %v4110_v4, %v3960_v62  ;;  %v2747_v29 = vpop.f32.mrb[1].mxu0  ;;  %v5282_v38 = vpop.f32.mrb[13].mxu1 }
 0x1b4   : > { %v4139_v40 = vadd.f32 %v2747_v29, %v1121_v26  ;;  %v4111_v10 = vpop.f32.mrb[2].mxu0  ;;  %v5287_v37 = vpop.f32.mrb[14].mxu1 }
 0x1b5   : > { %v5285_v16 = vadd.f32 %v4138_v15, %v5278_v45  ;;  %v4140_v61 = vadd.f32 %v4111_v10, %v3961_v55  ;;  %v2750_v19 = vpop.f32.mrb[3].mxu0  ;;  %v5293_v17 = vpop.f32.mrb[15].mxu1 }
 0x1b6   : > { %v5290_v21 = vadd.f32 %v4139_v40, %v5278_v45  ;;  %v4141_v18 = vadd.f32 %v2750_v19, %v1124_v56 }
 0x1b7   : > { %v3647_v57 = vmul.f32 -1.442695, %v5285_v16  ;;  %v5296_v1 = vadd.f32 %v4140_v61, %v5278_v45 }
 0x1b8   : > { %v3645_v42 = vmul.f32 -1.442695, %v5290_v21  ;;  %v5300_v20 = vadd.f32 %v4141_v18, %v5278_v45 }
 0x1b9   : > { %4478 = vpow2.f32 %v3647_v57  ;;  %v3648_v50 = vmul.f32 -1.442695, %v5296_v1 }
 0x1ba   : > { %4480 = vpow2.f32 %v3645_v42  ;;  %v3646_v14 = vmul.f32 -1.442695, %v5300_v20  ;;  %v4114_v63 = vpop.f32.mrb[4].mxu0 }
 0x1bb   : > { %4482 = vpow2.f32 %v3648_v50  ;;  %v4142_v34 = vadd.f32 %v4114_v63, %v3964_v2  ;;  %v2763_v24 = vpop.f32.mrb[5].mxu0 }
 0x1bc   : > { %4484 = vpow2.f32 %v3646_v14  ;;  %v4143_v11 = vadd.f32 %v2763_v24, %v1137_v9  ;;  %v4115_v60 = vpop.f32.mrb[6].mxu0 }
 0x1bd   : > { %v5305_v6 = vadd.f32 %v4142_v34, %v5278_v45  ;;  %v4144_v48 = vadd.f32 %v4115_v60, %v3965_v22  ;;  %v2766_v27 = vpop.f32.mrb[7].mxu0 }
 0x1be   : > { %v5308_v44 = vadd.f32 %v4143_v11, %v5278_v45  ;;  %v4145_v28 = vadd.f32 %v2766_v27, %v1140_v13 }
 0x1bf   : > { %v3651_v25 = vmul.f32 -1.442695, %v5305_v6  ;;  %v5312_v30 = vadd.f32 %v4144_v48, %v5278_v45 }
 0x1c0   : > { %v3649_v35 = vmul.f32 -1.442695, %v5308_v44  ;;  %v5317_v32 = vadd.f32 %v4145_v28, %v5278_v45 }
 0x1c1   : > { %4486 = vpow2.f32 %v3651_v25  ;;  %v3652_v49 = vmul.f32 -1.442695, %v5312_v30 }
 0x1c2   : > { %4488 = vpow2.f32 %v3649_v35  ;;  %v3650_v33 = vmul.f32 -1.442695, %v5317_v32  ;;  %v4118_v58 = vpop.f32.mrb[8].mxu0 }
 0x1c3   : > { %v4479_v54 = vpop.eup %4478  ;;  %4490 = vpow2.f32 %v3652_v49  ;;  %v4146_v8 = vadd.f32 %v4118_v58, %v3968_v3  ;;  %v2779_v36 = vpop.f32.mrb[9].mxu0 }
 0x1c4   : > { %v4481_v7 = vpop.eup %4480  ;;  %v3007_v43 = vadd.f32 1.0, %v4479_v54  ;;  %4492 = vpow2.f32 %v3650_v33  ;;  %v4147_v5 = vadd.f32 %v2779_v36, %v1153_v51  ;;  %v4119_v41 = vpop.f32.mrb[10].mxu0 }
 0x1c5   : > { %v4483_v39 = vpop.eup %4482  ;;  %v3005_v12 = vadd.f32 1.0, %v4481_v7  ;;  %v5328_v23 = vadd.f32 %v4146_v8, %v5278_v45  ;;  %v4148_v47 = vadd.f32 %v4119_v41, %v3969_v31  ;;  %v2782_v46 = vpop.f32.mrb[11].mxu0 }
 0x1c6   : > { %v4485_v59 = vpop.eup %4484  ;;  %4494 = vrcp.f32 %v3007_v43  ;;  %v3008_v52 = vadd.f32 1.0, %v4483_v39  ;;  %v5331_v62 = vadd.f32 %v4147_v5, %v5278_v45  ;;  %v4149_v26 = vadd.f32 %v2782_v46, %v5273_v53 }
 0x1c7   : > { %4496 = vrcp.f32 %v3005_v12  ;;  %v3006_v55 = vadd.f32 1.0, %v4485_v59  ;;  %v3655_v56 = vmul.f32 -1.442695, %v5328_v23  ;;  %v5337_v2 = vadd.f32 %v4148_v47, %v5278_v45 }
 0x1c8   : > { %4498 = vrcp.f32 %v3008_v52  ;;  %v3653_v9 = vmul.f32 -1.442695, %v5331_v62  ;;  %v5345_v22 = vadd.f32 %v4149_v26, %v5278_v45 }
 0x1c9   : > { %4500 = vrcp.f32 %v3006_v55  ;;  %v3656_v13 = vmul.f32 -1.442695, %v5337_v2 }
 0x1ca   : > { %4502 = vpow2.f32 %v3655_v56  ;;  %v3654_v3 = vmul.f32 -1.442695, %v5345_v22  ;;  %v4122_v51 = vpop.f32.mrb[12].mxu0 }
 0x1cb   : > { %v4487_v31 = vpop.eup %4486  ;;  %4504 = vpow2.f32 %v3653_v9  ;;  %v4150_v53 = vadd.f32 %v4122_v51, %v5280_v0  ;;  %v2795_v4 = vpop.f32.mrb[13].mxu0 }
 0x1cc   : > { %v4489_v15 = vpop.eup %4488  ;;  %v3011_v29 = vadd.f32 1.0, %v4487_v31  ;;  %4506 = vpow2.f32 %v3656_v13  ;;  %v4151_v40 = vadd.f32 %v2795_v4, %v5282_v38  ;;  %v4123_v10 = vpop.f32.mrb[14].mxu0 }
 0x1cd   : > { %v4491_v61 = vpop.eup %4490  ;;  %v3009_v19 = vadd.f32 1.0, %v4489_v15  ;;  %4508 = vpow2.f32 %v3654_v3  ;;  %v5354_v18 = vadd.f32 %v4150_v53, %v5278_v45  ;;  %v4152_v57 = vadd.f32 %v4123_v10, %v5287_v37  ;;  %v2798_v42 = vpop.f32.mrb[15].mxu0 }
 0x1ce   : > { %v4493_v0 = vpop.eup %4492  ;;  %4510 = vrcp.f32 %v3011_v29  ;;  %v3012_v50 = vadd.f32 1.0, %v4491_v61  ;;  %v5358_v14 = vadd.f32 %v4151_v40, %v5278_v45  ;;  %v4153_v63 = vadd.f32 %v2798_v42, %v5293_v17 }
 0x1cf   : > { %4512 = vrcp.f32 %v3009_v19  ;;  %v3010_v38 = vadd.f32 1.0, %v4493_v0  ;;  %v3659_v34 = vmul.f32 -1.442695, %v5354_v18  ;;  %v5364_v24 = vadd.f32 %v4152_v57, %v5278_v45 }
 0x1d0   : > { %v4495_v11 = vpop.eup %4494  ;;  %4514 = vrcp.f32 %v3012_v50  ;;  %v3657_v37 = vmul.f32 -1.442695, %v5358_v14  ;;  %v5368_v60 = vadd.f32 %v4153_v63, %v5278_v45 }
 0x1d1   : > { %v4497_v48 = vpop.eup %4496  ;;  %v3091_v27 = vmul.f32 %v4495_v11, %v5285_v16  ;;  %4516 = vrcp.f32 %v3010_v38  ;;  %v3660_v17 = vmul.f32 -1.442695, %v5364_v24 }
 0x1d2   : > { %v4499_v28 = vpop.eup %4498  ;;  %v3089_v25 = vmul.f32 %v4497_v48, %v5290_v21  ;;  %4518 = vpow2.f32 %v3659_v34  ;;  %v3658_v35 = vmul.f32 -1.442695, %v5368_v60  ;;  %v4126_v49 = vpop.f32.mrb[16].mxu0 }
 0x1d3   : > { %v4501_v33 = vpop.eup %4500  ;;  %v3705_v58 = vpack.c.bf16 %v3091_v27, %v3091_v27  ;;  %v3092_v16 = vmul.f32 %v4499_v28, %v5296_v1  ;;  %4520 = vpow2.f32 %v3657_v37  ;;  %v2811_v54 = vpop.f32.mrb[17].mxu0 }
 0x1d4   : > { %v4503_v8 = vpop.eup %4502  ;;  %v3703_v36 = vpack.c.bf16 %v3089_v25, %v3089_v25  ;;  %v3090_v7 = vmul.f32 %v4501_v33, %v5300_v20  ;;  %4522 = vpow2.f32 %v3660_v17  ;;  %v4006_v43 = vpop.f32.mrb[16].mxu1 }
 0x1d5   : > { %v4127_v5 = vpop.f32.mrb[18].mxu0  ;;  %v4505_v21 = vpop.eup %4504  ;;  %3232 = vst.msk [vmem:[%s5375_s5 + $0x8] sm:$0xf] %vm3229_vm4, %v3705_v58  ;;  %v3706_v41 = vpack.c.bf16 %v3092_v16, %v3092_v16  ;;  %v3015_v39 = vadd.f32 1.0, %v4503_v8  ;;  %4524 = vpow2.f32 %v3658_v35  ;;  %v4154_v47 = vadd.f32 %v4126_v49, %v4006_v43 }
 0x1d6   : > { %v1510_v12 = vpop.f32.mrb[17].mxu1  ;;  %v2814_v1 = vpop.f32.mrb[19].mxu0  ;;  %3230 = vst.msk [vmem:[%s5375_s5] sm:$0xf] %vm3229_vm4, %v3703_v36  ;;  %v3704_v59 = vpack.c.bf16 %v3090_v7, %v3090_v7  ;;  %v3013_v52 = vadd.f32 1.0, %v4505_v21 }
 0x1d7   : > { %v4507_v46 = vpop.eup %4506  ;;  %v4007_v20 = vpop.f32.mrb[18].mxu1  ;;  %v4155_v26 = vadd.f32 %v2811_v54, %v1510_v12  ;;  %3233 = vst.msk [vmem:[%s5375_s5 + $0xc] sm:$0xf] %vm3229_vm4, %v3706_v41  ;;  %4526 = vrcp.f32 %v3015_v39  ;;  %v5388_v9 = vadd.f32 %v4154_v47, %v5278_v45 }
 0x1d8   : > { %v4509_v55 = vpop.eup %4508  ;;  %v3016_v56 = vadd.f32 1.0, %v4507_v46  ;;  %v1513_v13 = vpop.f32.mrb[19].mxu1  ;;  %v4156_v3 = vadd.f32 %v4127_v5, %v4007_v20  ;;  %3231 = vst.msk [vmem:[%s5375_s5 + $0x4] sm:$0xf] %vm3229_vm4, %v3704_v59  ;;  %4528 = vrcp.f32 %v3013_v52 }
 0x1d9   : > { %v4511_v51 = vpop.eup %4510  ;;  %v3014_v31 = vadd.f32 1.0, %v4509_v55  ;;  %v5393_v53 = vadd.f32 %v4155_v26, %v5278_v45  ;;  %v4157_v4 = vadd.f32 %v2814_v1, %v1513_v13  ;;  %v3663_v40 = vmul.f32 -1.442695, %v5388_v9 }
 0x1da   : > { %v4513_v15 = vpop.eup %4512  ;;  %v3095_v29 = vmul.f32 %v4511_v51, %v5305_v6  ;;  %4530 = vrcp.f32 %v3016_v56  ;;  %v5398_v10 = vadd.f32 %v4156_v3, %v5278_v45  ;;  %v4130_v0 = vpop.f32.mrb[20].mxu0 }
 0x1db   : > { %v4515_v61 = vpop.eup %4514  ;;  %v3093_v19 = vmul.f32 %v4513_v15, %v5308_v44  ;;  %4532 = vrcp.f32 %v3014_v31  ;;  %v3661_v57 = vmul.f32 -1.442695, %v5393_v53  ;;  %v5403_v42 = vadd.f32 %v4157_v4, %v5278_v45  ;;  %v2827_v34 = vpop.f32.mrb[21].mxu0 }
 0x1dc   : > { %v4517_v50 = vpop.eup %4516  ;;  %v3709_v63 = vpack.c.bf16 %v3095_v29, %v3095_v29  ;;  %v3096_v6 = vmul.f32 %v4515_v61, %v5312_v30  ;;  %4534 = vpow2.f32 %v3663_v40  ;;  %v3664_v38 = vmul.f32 -1.442695, %v5398_v10  ;;  %v4010_v27 = vpop.f32.mrb[20].mxu1 }
 0x1dd   : > { %v4519_v11 = vpop.eup %4518  ;;  %v3707_v37 = vpack.c.bf16 %v3093_v19, %v3093_v19  ;;  %v3094_v44 = vmul.f32 %v4517_v50, %v5317_v32  ;;  %4536 = vpow2.f32 %v3661_v57  ;;  %v3662_v48 = vmul.f32 -1.442695, %v5403_v42  ;;  %v4131_v17 = vpop.f32.mrb[22].mxu0 }
 0x1de   : > { %v4521_v28 = vpop.eup %4520  ;;  %3236 = vst.msk [vmem:[%s5375_s5 + $0x18] sm:$0xf] %vm3229_vm4, %v3709_v63  ;;  %v3710_v25 = vpack.c.bf16 %v3096_v6, %v3096_v6  ;;  %v3019_v30 = vadd.f32 1.0, %v4519_v11  ;;  %4538 = vpow2.f32 %v3664_v38  ;;  %v1526_v35 = vpop.f32.mrb[21].mxu1  ;;  %v4158_v49 = vadd.f32 %v4130_v0, %v4010_v27 }
 0x1df   : > { %v2830_v33 = vpop.f32.mrb[23].mxu0  ;;  %v4523_v58 = vpop.eup %4522  ;;  %3234 = vst.msk [vmem:[%s5375_s5 + $0x10] sm:$0xf] %vm3229_vm4, %v3707_v37  ;;  %v3708_v32 = vpack.c.bf16 %v3094_v44, %v3094_v44  ;;  %v3017_v16 = vadd.f32 1.0, %v4521_v28  ;;  %4540 = vpow2.f32 %v3662_v48  ;;  %v4159_v8 = vadd.f32 %v2827_v34, %v1526_v35 }
 0x1e0   : > { %v4011_v54 = vpop.f32.mrb[22].mxu1  ;;  %v4525_v36 = vpop.eup %4524  ;;  %3237 = vst.msk [vmem:[%s5375_s5 + $0x1c] sm:$0xf] %vm3229_vm4, %v3710_v25  ;;  %4542 = vrcp.f32 %v3019_v30  ;;  %v3020_v7 = vadd.f32 1.0, %v4523_v58  ;;  %v5416_v43 = vadd.f32 %v4158_v49, %v5278_v45 }
 0x1e1   : > { %v1529_v5 = vpop.f32.mrb[23].mxu1  ;;  %v4160_v21 = vadd.f32 %v4131_v17, %v4011_v54  ;;  %3235 = vst.msk [vmem:[%s5375_s5 + $0x14] sm:$0xf] %vm3229_vm4, %v3708_v32  ;;  %4544 = vrcp.f32 %v3017_v16  ;;  %v3018_v41 = vadd.f32 1.0, %v4525_v36  ;;  %v5421_v39 = vadd.f32 %v4159_v8, %v5278_v45  ;;  %v4527_v47 = vpop.eup %4526 }
 0x1e2   : > { %v4161_v12 = vadd.f32 %v2830_v33, %v1529_v5  ;;  %4546 = vrcp.f32 %v3020_v7  ;;  %v3667_v1 = vmul.f32 -1.442695, %v5416_v43  ;;  %v4529_v59 = vpop.eup %4528  ;;  %v3099_v52 = vmul.f32 %v4527_v47, %v5328_v23  ;;  %v4134_v55 = vpop.f32.mrb[24].mxu0 }
 0x1e3   : > { %v5425_v46 = vadd.f32 %v4160_v21, %v5278_v45  ;;  %4548 = vrcp.f32 %v3018_v41  ;;  %v3665_v20 = vmul.f32 -1.442695, %v5421_v39  ;;  %v3097_v13 = vmul.f32 %v4529_v59, %v5331_v62  ;;  %v2843_v51 = vpop.f32.mrb[25].mxu0  ;;  %v4014_v29 = vpop.f32.mrb[24].mxu1 }
 0x1e4   : > { %v5430_v26 = vadd.f32 %v4161_v12, %v5278_v45  ;;  %v4531_v56 = vpop.eup %4530  ;;  %4550 = vpow2.f32 %v3667_v1  ;;  %v3713_v4 = vpack.c.bf16 %v3099_v52, %v3099_v52  ;;  %v4135_v40 = vpop.f32.mrb[26].mxu0  ;;  %v4162_v0 = vadd.f32 %v4134_v55, %v4014_v29 }
 0x1e5   : > { %v3668_v3 = vmul.f32 -1.442695, %v5425_v46  ;;  %v4533_v31 = vpop.eup %4532  ;;  %v3100_v15 = vmul.f32 %v4531_v56, %v5337_v2  ;;  %4552 = vpow2.f32 %v3665_v20  ;;  %v3711_v19 = vpack.c.bf16 %v3097_v13, %v3097_v13  ;;  %v1542_v62 = vpop.f32.mrb[25].mxu1 }
 0x1e6   : > { %v3666_v23 = vmul.f32 -1.442695, %v5430_v26  ;;  %v4535_v61 = vpop.eup %4534  ;;  %v3098_v57 = vmul.f32 %v4533_v31, %v5345_v22  ;;  %v2846_v50 = vpop.f32.mrb[27].mxu0  ;;  %3240 = vst.msk [vmem:[%s5375_s5 + $0x28] sm:$0xf] %vm3229_vm4, %v3713_v4  ;;  %v4163_v34 = vadd.f32 %v2843_v51, %v1542_v62  ;;  %v5442_v22 = vadd.f32 %v4162_v0, %v5278_v45 }
 0x1e7   : > { %4554 = vpow2.f32 %v3668_v3  ;;  %v4537_v63 = vpop.eup %4536  ;;  %v3714_v6 = vpack.c.bf16 %v3100_v15, %v3100_v15  ;;  %v3023_v2 = vadd.f32 1.0, %v4535_v61  ;;  %v4015_v38 = vpop.f32.mrb[26].mxu1  ;;  %3238 = vst.msk [vmem:[%s5375_s5 + $0x20] sm:$0xf] %vm3229_vm4, %v3711_v19 }
 0x1e8   : > { %4556 = vpow2.f32 %v3666_v23  ;;  %v4539_v11 = vpop.eup %4538  ;;  %v3712_v37 = vpack.c.bf16 %v3098_v57, %v3098_v57  ;;  %v3021_v44 = vadd.f32 1.0, %v4537_v63  ;;  %v1545_v48 = vpop.f32.mrb[27].mxu1  ;;  %v4164_v27 = vadd.f32 %v4135_v40, %v4015_v38 }
 0x1e9   : > { %v4541_v17 = vpop.eup %4540  ;;  %3241 = vst.msk [vmem:[%s5375_s5 + $0x2c] sm:$0xf] %vm3229_vm4, %v3714_v6  ;;  %4558 = vrcp.f32 %v3023_v2  ;;  %v3024_v28 = vadd.f32 1.0, %v4539_v11  ;;  %v5447_v25 = vadd.f32 %v4163_v34, %v5278_v45  ;;  %v4165_v30 = vadd.f32 %v2846_v50, %v1545_v48 }
 0x1ea   : > { %v4543_v35 = vpop.eup %4542  ;;  %3239 = vst.msk [vmem:[%s5375_s5 + $0x24] sm:$0xf] %vm3229_vm4, %v3712_v37  ;;  %4560 = vrcp.f32 %v3021_v44  ;;  %v3022_v49 = vadd.f32 1.0, %v4541_v17  ;;  %v3671_v33 = vmul.f32 -1.442695, %v5442_v22  ;;  %v5453_v58 = vadd.f32 %v4164_v27, %v5278_v45 }
 0x1eb   : > { %v4545_v32 = vpop.eup %4544  ;;  %v3103_v16 = vmul.f32 %v4543_v35, %v5354_v18  ;;  %4562 = vrcp.f32 %v3024_v28  ;;  %v3669_v54 = vmul.f32 -1.442695, %v5447_v25  ;;  %v5458_v8 = vadd.f32 %v4165_v30, %v5278_v45 }
 0x1ec   : > { %v4547_v36 = vpop.eup %4546  ;;  %v3101_v7 = vmul.f32 %v4545_v32, %v5358_v14  ;;  %4564 = vrcp.f32 %v3022_v49  ;;  %v3672_v5 = vmul.f32 -1.442695, %v5453_v58 }
 0x1ed   : > { %v4549_v21 = vpop.eup %4548  ;;  %v3717_v41 = vpack.c.bf16 %v3103_v16, %v3103_v16  ;;  %v3104_v12 = vmul.f32 %v4547_v36, %v5364_v24  ;;  %4566 = vpow2.f32 %v3671_v33  ;;  %v3670_v18 = vmul.f32 -1.442695, %v5458_v8 }
 0x1ee   : > { %v4551_v47 = vpop.eup %4550  ;;  %v3715_v1 = vpack.c.bf16 %v3101_v7, %v3101_v7  ;;  %v3102_v45 = vmul.f32 %v4549_v21, %v5368_v60  ;;  %4568 = vpow2.f32 %v3669_v54 }
 0x1ef   : > { %v4553_v59 = vpop.eup %4552  ;;  %3244 = vst.msk [vmem:[%s5375_s5 + $0x38] sm:$0xf] %vm3229_vm4, %v3717_v41  ;;  %v3718_v14 = vpack.c.bf16 %v3104_v12, %v3104_v12  ;;  %v3027_v52 = vadd.f32 1.0, %v4551_v47  ;;  %4570 = vpow2.f32 %v3672_v5 }
 0x1f0   : > { %3242 = vst.msk [vmem:[%s5375_s5 + $0x30] sm:$0xf] %vm3229_vm4, %v3715_v1  ;;  %v3716_v24 = vpack.c.bf16 %v3102_v45, %v3102_v45  ;;  %v3025_v55 = vadd.f32 1.0, %v4553_v59  ;;  %4572 = vpow2.f32 %v3670_v18 }
 0x1f1   : > { %v4555_v20 = vpop.eup %4554  ;;  %3245 = vst.msk [vmem:[%s5375_s5 + $0x3c] sm:$0xf] %vm3229_vm4, %v3718_v14  ;;  %4574 = vrcp.f32 %v3027_v52 }
 0x1f2   : > { %v4557_v56 = vpop.eup %4556  ;;  %v3028_v13 = vadd.f32 1.0, %v4555_v20  ;;  %3243 = vst.msk [vmem:[%s5375_s5 + $0x34] sm:$0xf] %vm3229_vm4, %v3716_v24  ;;  %4576 = vrcp.f32 %v3025_v55 }
 0x1f3   : > { %v3026_v60 = vadd.f32 1.0, %v4557_v56  ;;  %v4559_v3 = vpop.eup %4558 }
 0x1f4   : > { %4578 = vrcp.f32 %v3028_v13  ;;  %v4561_v51 = vpop.eup %4560  ;;  %v3107_v31 = vmul.f32 %v4559_v3, %v5388_v9 }
 0x1f5   : > { %4580 = vrcp.f32 %v3026_v60  ;;  %v4563_v4 = vpop.eup %4562  ;;  %v3105_v15 = vmul.f32 %v4561_v51, %v5393_v53 }
 0x1f6   : > { %v4565_v23 = vpop.eup %4564  ;;  %v3721_v29 = vpack.c.bf16 %v3107_v31, %v3107_v31  ;;  %v3108_v40 = vmul.f32 %v4563_v4, %v5398_v10 }
 0x1f7   : > { %v4567_v61 = vpop.eup %4566  ;;  %v3719_v19 = vpack.c.bf16 %v3105_v15, %v3105_v15  ;;  %v3106_v57 = vmul.f32 %v4565_v23, %v5403_v42 }
 0x1f8   : > { %v4569_v62 = vpop.eup %4568  ;;  %3248 = vst.msk [vmem:[%s5375_s5 + $0x48] sm:$0xf] %vm3229_vm4, %v3721_v29  ;;  %v3722_v0 = vpack.c.bf16 %v3108_v40, %v3108_v40  ;;  %v3031_v50 = vadd.f32 1.0, %v4567_v61 }
 0x1f9   : > { %v4571_v9 = vpop.eup %4570  ;;  %3246 = vst.msk [vmem:[%s5375_s5 + $0x40] sm:$0xf] %vm3229_vm4, %v3719_v19  ;;  %v3720_v63 = vpack.c.bf16 %v3106_v57, %v3106_v57  ;;  %v3029_v53 = vadd.f32 1.0, %v4569_v62 }
 0x1fa   : > { %v4573_v6 = vpop.eup %4572  ;;  %3249 = vst.msk [vmem:[%s5375_s5 + $0x4c] sm:$0xf] %vm3229_vm4, %v3722_v0  ;;  %4582 = vrcp.f32 %v3031_v50  ;;  %v3032_v10 = vadd.f32 1.0, %v4571_v9 }
 0x1fb   : > { %v4575_v2 = vpop.eup %4574  ;;  %3247 = vst.msk [vmem:[%s5375_s5 + $0x44] sm:$0xf] %vm3229_vm4, %v3720_v63  ;;  %4584 = vrcp.f32 %v3029_v53  ;;  %v3030_v42 = vadd.f32 1.0, %v4573_v6 }
 0x1fc   : > { %v4577_v38 = vpop.eup %4576  ;;  %v3111_v34 = vmul.f32 %v4575_v2, %v5416_v43  ;;  %4586 = vrcp.f32 %v3032_v10 }
 0x1fd   : > { %v3109_v37 = vmul.f32 %v4577_v38, %v5421_v39  ;;  %4588 = vrcp.f32 %v3030_v42 }
 0x1fe   : > { %v4579_v11 = vpop.eup %4578  ;;  %v3725_v48 = vpack.c.bf16 %v3111_v34, %v3111_v34 }
 0x1ff   : > { %v4581_v44 = vpop.eup %4580  ;;  %v3112_v27 = vmul.f32 %v4579_v11, %v5425_v46  ;;  %v3723_v17 = vpack.c.bf16 %v3109_v37, %v3109_v37 }
 0x200   : > { %v3110_v28 = vmul.f32 %v4581_v44, %v5430_v26  ;;  %3252 = vst.msk [vmem:[%s5375_s5 + $0x58] sm:$0xf] %vm3229_vm4, %v3725_v48 }
 0x201   : > { %v3726_v30 = vpack.c.bf16 %v3112_v27, %v3112_v27  ;;  %3250 = vst.msk [vmem:[%s5375_s5 + $0x50] sm:$0xf] %vm3229_vm4, %v3723_v17 }
 0x202   : > { %v3724_v43 = vpack.c.bf16 %v3110_v28, %v3110_v28 }
 0x203   : > { %3253 = vst.msk [vmem:[%s5375_s5 + $0x5c] sm:$0xf] %vm3229_vm4, %v3726_v30 }
 0x204   : > { %3251 = vst.msk [vmem:[%s5375_s5 + $0x54] sm:$0xf] %vm3229_vm4, %v3724_v43  ;;  %v4583_v39 = vpop.eup %4582 }
 0x205   : > { %v4585_v35 = vpop.eup %4584  ;;  %v3115_v46 = vmul.f32 %v4583_v39, %v5442_v22 }
 0x206   : > { %v4587_v49 = vpop.eup %4586  ;;  %v3113_v26 = vmul.f32 %v4585_v35, %v5447_v25 }
 0x207   : > { %v4589_v33 = vpop.eup %4588  ;;  %v3729_v32 = vpack.c.bf16 %v3115_v46, %v3115_v46  ;;  %v3116_v16 = vmul.f32 %v4587_v49, %v5453_v58 }
 0x208   : > { %v3727_v54 = vpack.c.bf16 %v3113_v26, %v3113_v26  ;;  %v3114_v36 = vmul.f32 %v4589_v33, %v5458_v8 }
 0x209   : > { %3256 = vst.msk [vmem:[%s5375_s5 + $0x68] sm:$0xf] %vm3229_vm4, %v3729_v32  ;;  %v3730_v7 = vpack.c.bf16 %v3116_v16, %v3116_v16 }
 0x20a   : > { %3254 = vst.msk [vmem:[%s5375_s5 + $0x60] sm:$0xf] %vm3229_vm4, %v3727_v54  ;;  %v3728_v5 = vpack.c.bf16 %v3114_v36, %v3114_v36 }
 0x20b   : > { %3257 = vst.msk [vmem:[%s5375_s5 + $0x6c] sm:$0xf] %vm3229_vm4, %v3730_v7 }
 0x20c   : > { %3255 = vst.msk [vmem:[%s5375_s5 + $0x64] sm:$0xf] %vm3229_vm4, %v3728_v5 }
 0x20d PF: > { %s13_s16 = sadd.s32 1, %s4628_s16   ;;  %s5529_s12 = smov %s4620_s14 }
 0x20e   : > { %p10_p7 = scmp.ge.s32.totalorder %s13_s16, 12   ;;  %s5530_s13 = smov %s4624_s15 }
 0x20f   : > { %s5531_s14 = smov %s5534_s17  ;;  %s5532_s15 = smov %s5538_s18 }
 0x210   :  { %12 = sbr.rel (!%p10_p7) target bundleno = 3 (0x3), region = 66 }

</bundles_post_ra>
